<compile_context>
chip_gen: v7x
topology: tpu7x:2x2x1
jax: 0.10.0
libtpu: 0.0.40
codegen_flags: <defaults>
</compile_context>

<pallas_src>
import functools

import numpy as np

import jax
import jax.numpy as jnp
from jax.experimental import pallas as pl
from jax.experimental.pallas import tpu as pltpu


def _round_up(x, m):
    return ((x + m - 1) // m) * m


def _stft_loss_kernel(xf_ref, yf_ref, c_ref, s_ref, acc_ref, *,
                      n_rows, n_bins, row_tile, bin_tile):
    i = pl.program_id(0)   # frame-row tile
    j = pl.program_id(1)   # frequency-bin tile

    @pl.when((i == 0) & (j == 0))
    def _init():
        acc_ref[...] = jnp.zeros_like(acc_ref)

    xf = xf_ref[...]
    yf = yf_ref[...]
    c = c_ref[...]
    s = s_ref[...]

    # Windowed DFT (window folded into the basis) -> magnitude spectrogram.
    x_re = jnp.dot(xf, c, preferred_element_type=jnp.float32)
    x_im = jnp.dot(xf, s, preferred_element_type=jnp.float32)
    y_re = jnp.dot(yf, c, preferred_element_type=jnp.float32)
    y_im = jnp.dot(yf, s, preferred_element_type=jnp.float32)

    x_mag = jnp.sqrt(jnp.maximum(x_re * x_re + x_im * x_im, 1e-7))
    y_mag = jnp.sqrt(jnp.maximum(y_re * y_re + y_im * y_im, 1e-7))

    # Mask padded rows (frames) and padded frequency bins out of the loss.
    row_ids = i * row_tile + jax.lax.broadcasted_iota(
        jnp.int32, (row_tile, bin_tile), 0)
    col_ids = j * bin_tile + jax.lax.broadcasted_iota(
        jnp.int32, (row_tile, bin_tile), 1)
    valid = (row_ids < n_rows) & (col_ids < n_bins)

    diff = y_mag - x_mag
    s_diff = jnp.sum(jnp.where(valid, diff * diff, 0.0))
    s_ysq = jnp.sum(jnp.where(valid, y_mag * y_mag, 0.0))
    s_l1 = jnp.sum(jnp.where(valid, jnp.abs(jnp.log(y_mag) - jnp.log(x_mag)), 0.0))

    # Scatter the three partial sums into lanes 0/1/2 of row 0 and accumulate.
    rows8 = jax.lax.broadcasted_iota(jnp.int32, acc_ref.shape, 0)
    lanes = jax.lax.broadcasted_iota(jnp.int32, acc_ref.shape, 1)
    partial = (jnp.where((rows8 == 0) & (lanes == 0), s_diff, 0.0)
               + jnp.where((rows8 == 0) & (lanes == 1), s_ysq, 0.0)
               + jnp.where((rows8 == 0) & (lanes == 2), s_l1, 0.0))
    acc_ref[...] += partial


def _hann_window_np(win_length):
    # torch.hann_window(win_length) default (periodic=True)
    n = np.arange(win_length, dtype=np.float64)
    return 0.5 - 0.5 * np.cos(2.0 * np.pi * n / win_length)


def _windowed_dft_bases(fft_size, win_length, n_bins_pad):
    """cos/sin DFT bases (n_fft, n_bins_pad) with the centered hann window folded
    into the rows; columns beyond n_bins = n_fft//2+1 are zero-padded."""
    n_bins = fft_size // 2 + 1
    n = np.arange(fft_size, dtype=np.float64)
    k = np.arange(n_bins, dtype=np.float64)
    ang = 2.0 * np.pi * np.outer(n, k) / fft_size
    win = np.zeros(fft_size, dtype=np.float64)
    lpad = (fft_size - win_length) // 2          # torch.stft centers the window
    win[lpad:lpad + win_length] = _hann_window_np(win_length)
    c = np.zeros((fft_size, n_bins_pad), dtype=np.float32)
    s = np.zeros((fft_size, n_bins_pad), dtype=np.float32)
    c[:, :n_bins] = (win[:, None] * np.cos(ang)).astype(np.float32)
    s[:, :n_bins] = (win[:, None] * np.sin(ang)).astype(np.float32)
    return jnp.asarray(c), jnp.asarray(s)


def _frame_signal(x, fft_size, hop_size):
    """torch.stft-style framing (center=True, pad_mode='reflect')."""
    B, T = x.shape
    pad = fft_size // 2
    xp = jnp.pad(x, ((0, 0), (pad, pad)), mode="reflect")
    n_frames = 1 + T // hop_size
    idx = (hop_size * np.arange(n_frames)[:, None]
           + np.arange(fft_size)[None, :]).astype(np.int32)
    frames = jnp.take(xp, jnp.asarray(idx), axis=1)    # (B, n_frames, n_fft)
    return frames.reshape(B * n_frames, fft_size), n_frames


def _single_resolution_loss(x, y, fft_size, hop_size, win_length, *,
                            row_tile=256, bin_tile=256):
    B, T = x.shape
    xf, n_frames = _frame_signal(x, fft_size, hop_size)
    yf, _ = _frame_signal(y, fft_size, hop_size)
    n_rows = B * n_frames
    n_bins = fft_size // 2 + 1

    # 256-row / 256-bin tiles at production sizes (256-wide MXU on v6e/v7x);
    # shrink the row tile to fit tiny inputs instead of padding several-x.
    row_tile = max(8, min(row_tile, _round_up(n_rows, 8)))
    rows_pad = _round_up(n_rows, row_tile)
    nbins_pad = _round_up(n_bins, bin_tile)

    xf = jnp.pad(xf, ((0, rows_pad - n_rows), (0, 0)))
    yf = jnp.pad(yf, ((0, rows_pad - n_rows), (0, 0)))
    c_mat, s_mat = _windowed_dft_bases(fft_size, win_length, nbins_pad)

    kernel = functools.partial(_stft_loss_kernel, n_rows=n_rows, n_bins=n_bins,
                               row_tile=row_tile, bin_tile=bin_tile)
    grid = (rows_pad // row_tile, nbins_pad // bin_tile)

    acc = pl.pallas_call(
        kernel,
        out_shape=jax.ShapeDtypeStruct((8, 128), jnp.float32),
        grid_spec=pltpu.PrefetchScalarGridSpec(
            num_scalar_prefetch=0,
            grid=grid,
            in_specs=[
                pl.BlockSpec((row_tile, fft_size), lambda i, j: (i, 0)),   # x frames
                pl.BlockSpec((row_tile, fft_size), lambda i, j: (i, 0)),   # y frames
                pl.BlockSpec((fft_size, bin_tile), lambda i, j: (0, j)),   # cos basis
                pl.BlockSpec((fft_size, bin_tile), lambda i, j: (0, j)),   # sin basis
            ],
            out_specs=pl.BlockSpec((8, 128), lambda i, j: (0, 0)),
        ),
        compiler_params=pltpu.CompilerParams(
            # Both axes accumulate into the same pinned output -> reduction axes.
            dimension_semantics=("arbitrary", "arbitrary"),
            vmem_limit_bytes=32 * 1024 * 1024),
    )(xf, yf, c_mat, s_mat)

    sum_diff_sq = acc[0, 0]
    sum_y_sq = acc[0, 1]
    sum_l1 = acc[0, 2]

    sc_loss = jnp.sqrt(sum_diff_sq) / jnp.sqrt(sum_y_sq)     # spectral convergence
    mag_loss = sum_l1 / float(n_rows * n_bins)               # log-STFT-magnitude L1
    return sc_loss, mag_loss


def multi_resolution_stft_loss(x, y,
                               fft_sizes=(1024, 2048, 512),
                               hop_sizes=(120, 240, 50),
                               win_lengths=(600, 1200, 240),
                               sc_lambda=0.1, mag_lambda=0.1):
    """x, y: predicted / groundtruth signals, (B, T) or (B, #subband, T)."""
    if x.ndim == 3:
        x = x.reshape(-1, x.shape[-1])
        y = y.reshape(-1, y.shape[-1])
    sc_loss = jnp.float32(0.0)
    mag_loss = jnp.float32(0.0)
    for fs, ss, wl in zip(fft_sizes, hop_sizes, win_lengths):
        sc, mg = _single_resolution_loss(x, y, fs, ss, wl)
        sc_loss = sc_loss + sc
        mag_loss = mag_loss + mg
    n_res = len(fft_sizes)
    return sc_loss * sc_lambda / n_res, mag_loss * mag_lambda / n_res


# ----------------------- pure-JAX reference (rfft-based) -----------------------

def _stft_mag_ref(x, fft_size, hop_size, win_length):
    B, T = x.shape
    pad = fft_size // 2
    xp = jnp.pad(x, ((0, 0), (pad, pad)), mode="reflect")
    n_frames = 1 + T // hop_size
    idx = (hop_size * np.arange(n_frames)[:, None]
           + np.arange(fft_size)[None, :]).astype(np.int32)
    frames = jnp.take(xp, jnp.asarray(idx), axis=1)
    win = np.zeros(fft_size, dtype=np.float64)
    lpad = (fft_size - win_length) // 2
    win[lpad:lpad + win_length] = _hann_window_np(win_length)
    spec = jnp.fft.rfft(frames * jnp.asarray(win, dtype=x.dtype), axis=-1)
    mag2 = jnp.real(spec) ** 2 + jnp.imag(spec) ** 2
    return jnp.sqrt(jnp.maximum(mag2, 1e-7))


def _reference_loss(x, y, fft_sizes, hop_sizes, win_lengths, sc_lambda, mag_lambda):
    sc_loss = 0.0
    mag_loss = 0.0
    for fs, ss, wl in zip(fft_sizes, hop_sizes, win_lengths):
        xm = _stft_mag_ref(x, fs, ss, wl)
        ym = _stft_mag_ref(y, fs, ss, wl)
        sc_loss += jnp.sqrt(jnp.sum((ym - xm) ** 2)) / jnp.sqrt(jnp.sum(ym ** 2))
        mag_loss += jnp.mean(jnp.abs(jnp.log(ym) - jnp.log(xm)))
    n = len(fft_sizes)
    return sc_loss * sc_lambda / n, mag_loss * mag_lambda / n


if __name__ == "__main__":
    key = jax.random.PRNGKey(0)
    k_sig, k_noise = jax.random.split(key)

    B, T = 2, 2400   # small (B, T) audio pair (T > n_fft//2 so reflect-pad is valid)
    y = jax.random.normal(k_sig, (B, T), dtype=jnp.float32)             # groundtruth
    x = y + 0.3 * jax.random.normal(k_noise, (B, T), dtype=jnp.float32)  # predicted

    sc_loss, mag_loss = multi_resolution_stft_loss(x, y)
    sc_loss, mag_loss = jax.block_until_ready((sc_loss, mag_loss))

    sc_ref, mag_ref = _reference_loss(
        x, y, (1024, 2048, 512), (120, 240, 50), (600, 1200, 240), 0.1, 0.1)

    assert jnp.isfinite(sc_loss) and jnp.isfinite(mag_loss)
    assert jnp.allclose(sc_loss, sc_ref, rtol=1e-2, atol=1e-4), (sc_loss, sc_ref)
    assert jnp.allclose(mag_loss, mag_ref, rtol=1e-2, atol=1e-4), (mag_loss, mag_ref)

    print("KERNEL_OK")
</pallas_src>

<mosaic_0001>
module attributes {stable_mosaic.version = 11 : i64} {
  func.func @_stft_loss_kernel(%arg0: i32, %arg1: i32, %arg2: memref<48x1024xf32, #tpu.memory_space<vmem>>, %arg3: memref<48x1024xf32, #tpu.memory_space<vmem>>, %arg4: memref<1024x256xf32, #tpu.memory_space<vmem>>, %arg5: memref<1024x256xf32, #tpu.memory_space<vmem>>, %arg6: memref<8x128xf32, #tpu.memory_space<vmem>>) attributes {dimension_semantics = [#tpu.dimension_semantics<arbitrary>, #tpu.dimension_semantics<arbitrary>], iteration_bounds = array<i64: 1, 3>, scalar_prefetch = 0 : i64, scratch_operands = 0 : i64, tpu.core_type = #tpu.core_type<tc>, window_params = [{transform_indices = @transform_0, window_bounds = array<i64: 48, 1024>}, {transform_indices = @transform_1, window_bounds = array<i64: 48, 1024>}, {transform_indices = @transform_2, window_bounds = array<i64: 1024, 256>}, {transform_indices = @transform_3, window_bounds = array<i64: 1024, 256>}, {pipeline_mode = #tpu.pipeline_mode<synchronous>, transform_indices = @transform_4, window_bounds = array<i64: 8, 128>}]} {
    %c0_i32 = arith.constant 0 : i32
    %0 = arith.cmpi eq, %arg0, %c0_i32 : i32
    %c0_i32_0 = arith.constant 0 : i32
    %1 = arith.cmpi eq, %arg1, %c0_i32_0 : i32
    %2 = arith.andi %0, %1 : i1
    %3 = arith.extui %2 : i1 to i32
    %c0_i32_1 = arith.constant 0 : i32
    %4 = arith.cmpi ne, %3, %c0_i32_1 : i32
    scf.if %4 {
      %cst_31 = arith.constant 0.000000e+00 : f32
      %94 = vector.broadcast %cst_31 : f32 to vector<8x128xf32>
      %c0_32 = arith.constant 0 : index
      %c0_33 = arith.constant 0 : index
      %95 = vector.load %arg6[%c0_32, %c0_33] : memref<8x128xf32, #tpu.memory_space<vmem>>, vector<8x128xf32>
      tpu.vector_store %arg6[%c0_32, %c0_33], %94 {strides = array<i32>} : memref<8x128xf32, #tpu.memory_space<vmem>>, vector<8x128xf32>,
    } else {
    }
    %c0 = arith.constant 0 : index
    %c0_2 = arith.constant 0 : index
    %5 = vector.load %arg2[%c0, %c0_2] : memref<48x1024xf32, #tpu.memory_space<vmem>>, vector<48x1024xf32>
    %c0_3 = arith.constant 0 : index
    %c0_4 = arith.constant 0 : index
    %6 = vector.load %arg3[%c0_3, %c0_4] : memref<48x1024xf32, #tpu.memory_space<vmem>>, vector<48x1024xf32>
    %c0_5 = arith.constant 0 : index
    %c0_6 = arith.constant 0 : index
    %7 = vector.load %arg4[%c0_5, %c0_6] : memref<1024x256xf32, #tpu.memory_space<vmem>>, vector<1024x256xf32>
    %c0_7 = arith.constant 0 : index
    %c0_8 = arith.constant 0 : index
    %8 = vector.load %arg5[%c0_7, %c0_8] : memref<1024x256xf32, #tpu.memory_space<vmem>>, vector<1024x256xf32>
    %cst = arith.constant dense<0.000000e+00> : vector<48x256xf32>
    %9 = tpu.matmul %5, %7, %cst {dimension_numbers = #tpu.dot_dimension_numbers<[1], [0], [0], [1], [0, 0, 1, 1], [], []>} : vector<48x1024xf32>, vector<1024x256xf32>, vector<48x256xf32> -> vector<48x256xf32>
    %cst_9 = arith.constant dense<0.000000e+00> : vector<48x256xf32>
    %10 = tpu.matmul %5, %8, %cst_9 {dimension_numbers = #tpu.dot_dimension_numbers<[1], [0], [0], [1], [0, 0, 1, 1], [], []>} : vector<48x1024xf32>, vector<1024x256xf32>, vector<48x256xf32> -> vector<48x256xf32>
    %cst_10 = arith.constant dense<0.000000e+00> : vector<48x256xf32>
    %11 = tpu.matmul %6, %7, %cst_10 {dimension_numbers = #tpu.dot_dimension_numbers<[1], [0], [0], [1], [0, 0, 1, 1], [], []>} : vector<48x1024xf32>, vector<1024x256xf32>, vector<48x256xf32> -> vector<48x256xf32>
    %cst_11 = arith.constant dense<0.000000e+00> : vector<48x256xf32>
    %12 = tpu.matmul %6, %8, %cst_11 {dimension_numbers = #tpu.dot_dimension_numbers<[1], [0], [0], [1], [0, 0, 1, 1], [], []>} : vector<48x1024xf32>, vector<1024x256xf32>, vector<48x256xf32> -> vector<48x256xf32>
    %13 = arith.mulf %9, %9 : vector<48x256xf32>
    %14 = arith.mulf %10, %10 : vector<48x256xf32>
    %15 = arith.addf %13, %14 : vector<48x256xf32>
    %cst_12 = arith.constant 1.000000e-07 : f32
    %16 = vector.broadcast %cst_12 : f32 to vector<48x256xf32>
    %17 = arith.maximumf %15, %16 : vector<48x256xf32>
    %18 = math.sqrt %17 : vector<48x256xf32>
    %19 = arith.mulf %11, %11 : vector<48x256xf32>
    %20 = arith.mulf %12, %12 : vector<48x256xf32>
    %21 = arith.addf %19, %20 : vector<48x256xf32>
    %cst_13 = arith.constant 1.000000e-07 : f32
    %22 = vector.broadcast %cst_13 : f32 to vector<48x256xf32>
    %23 = arith.maximumf %21, %22 : vector<48x256xf32>
    %24 = math.sqrt %23 : vector<48x256xf32>
    %c48_i32 = arith.constant 48 : i32
    %25 = arith.muli %arg0, %c48_i32 : i32
    %26 = tpu.iota {dimensions = array<i32: 0>} : vector<48x256xi32>
    %27 = vector.broadcast %25 : i32 to vector<48x256xi32>
    %28 = arith.addi %27, %26 : vector<48x256xi32>
    %c256_i32 = arith.constant 256 : i32
    %29 = arith.muli %arg1, %c256_i32 : i32
    %30 = tpu.iota {dimensions = array<i32: 1>} : vector<48x256xi32>
    %31 = vector.broadcast %29 : i32 to vector<48x256xi32>
    %32 = arith.addi %31, %30 : vector<48x256xi32>
    %c42_i32 = arith.constant 42 : i32
    %33 = vector.broadcast %c42_i32 : i32 to vector<48x256xi32>
    %34 = arith.cmpi slt, %28, %33 : vector<48x256xi32>
    %c513_i32 = arith.constant 513 : i32
    %35 = vector.broadcast %c513_i32 : i32 to vector<48x256xi32>
    %36 = arith.cmpi slt, %32, %35 : vector<48x256xi32>
    %37 = arith.andi %34, %36 : vector<48x256xi1>
    %38 = arith.subf %24, %18 : vector<48x256xf32>
    %39 = arith.mulf %38, %38 : vector<48x256xf32>
    %cst_14 = arith.constant 0.000000e+00 : f32
    %40 = vector.broadcast %cst_14 : f32 to vector<48x256xf32>
    %41 = arith.select %37, %39, %40 : vector<48x256xi1>, vector<48x256xf32>
    %42 = vector.shape_cast %41 : vector<48x256xf32> to vector<1x48x256xf32>
    %cst_15 = arith.constant dense<0.000000e+00> : vector<1xf32>
    %43 = vector.multi_reduction <add>, %42, %cst_15 [1, 2] : vector<1x48x256xf32> to vector<1xf32>
    %44 = vector.shape_cast %43 : vector<1xf32> to vector<1x1x1xf32>
    %45 = vector.extract %44[0, 0, 0] : f32 from vector<1x1x1xf32>
    %46 = arith.mulf %24, %24 : vector<48x256xf32>
    %cst_16 = arith.constant 0.000000e+00 : f32
    %47 = vector.broadcast %cst_16 : f32 to vector<48x256xf32>
    %48 = arith.select %37, %46, %47 : vector<48x256xi1>, vector<48x256xf32>
    %49 = vector.shape_cast %48 : vector<48x256xf32> to vector<1x48x256xf32>
    %cst_17 = arith.constant dense<0.000000e+00> : vector<1xf32>
    %50 = vector.multi_reduction <add>, %49, %cst_17 [1, 2] : vector<1x48x256xf32> to vector<1xf32>
    %51 = vector.shape_cast %50 : vector<1xf32> to vector<1x1x1xf32>
    %52 = vector.extract %51[0, 0, 0] : f32 from vector<1x1x1xf32>
    %53 = math.log %24 : vector<48x256xf32>
    %54 = math.log %18 : vector<48x256xf32>
    %55 = arith.subf %53, %54 : vector<48x256xf32>
    %56 = math.absf %55 : vector<48x256xf32>
    %cst_18 = arith.constant 0.000000e+00 : f32
    %57 = vector.broadcast %cst_18 : f32 to vector<48x256xf32>
    %58 = arith.select %37, %56, %57 : vector<48x256xi1>, vector<48x256xf32>
    %59 = vector.shape_cast %58 : vector<48x256xf32> to vector<1x48x256xf32>
    %cst_19 = arith.constant dense<0.000000e+00> : vector<1xf32>
    %60 = vector.multi_reduction <add>, %59, %cst_19 [1, 2] : vector<1x48x256xf32> to vector<1xf32>
    %61 = vector.shape_cast %60 : vector<1xf32> to vector<1x1x1xf32>
    %62 = vector.extract %61[0, 0, 0] : f32 from vector<1x1x1xf32>
    %63 = tpu.iota {dimensions = array<i32: 0>} : vector<8x128xi32>
    %64 = tpu.iota {dimensions = array<i32: 1>} : vector<8x128xi32>
    %c0_i32_20 = arith.constant 0 : i32
    %65 = vector.broadcast %c0_i32_20 : i32 to vector<8x128xi32>
    %66 = arith.cmpi eq, %63, %65 : vector<8x128xi32>
    %c0_i32_21 = arith.constant 0 : i32
    %67 = vector.broadcast %c0_i32_21 : i32 to vector<8x128xi32>
    %68 = arith.cmpi eq, %64, %67 : vector<8x128xi32>
    %69 = arith.andi %66, %68 : vector<8x128xi1>
    %cst_22 = arith.constant 0.000000e+00 : f32
    %70 = vector.broadcast %45 : f32 to vector<8x128xf32>
    %71 = vector.broadcast %cst_22 : f32 to vector<8x128xf32>
    %72 = arith.select %69, %70, %71 : vector<8x128xi1>, vector<8x128xf32>
    %c0_i32_23 = arith.constant 0 : i32
    %73 = vector.broadcast %c0_i32_23 : i32 to vector<8x128xi32>
    %74 = arith.cmpi eq, %63, %73 : vector<8x128xi32>
    %c1_i32 = arith.constant 1 : i32
    %75 = vector.broadcast %c1_i32 : i32 to vector<8x128xi32>
    %76 = arith.cmpi eq, %64, %75 : vector<8x128xi32>
    %77 = arith.andi %74, %76 : vector<8x128xi1>
    %cst_24 = arith.constant 0.000000e+00 : f32
    %78 = vector.broadcast %52 : f32 to vector<8x128xf32>
    %79 = vector.broadcast %cst_24 : f32 to vector<8x128xf32>
    %80 = arith.select %77, %78, %79 : vector<8x128xi1>, vector<8x128xf32>
    %81 = arith.addf %72, %80 : vector<8x128xf32>
    %c0_i32_25 = arith.constant 0 : i32
    %82 = vector.broadcast %c0_i32_25 : i32 to vector<8x128xi32>
    %83 = arith.cmpi eq, %63, %82 : vector<8x128xi32>
    %c2_i32 = arith.constant 2 : i32
    %84 = vector.broadcast %c2_i32 : i32 to vector<8x128xi32>
    %85 = arith.cmpi eq, %64, %84 : vector<8x128xi32>
    %86 = arith.andi %83, %85 : vector<8x128xi1>
    %cst_26 = arith.constant 0.000000e+00 : f32
    %87 = vector.broadcast %62 : f32 to vector<8x128xf32>
    %88 = vector.broadcast %cst_26 : f32 to vector<8x128xf32>
    %89 = arith.select %86, %87, %88 : vector<8x128xi1>, vector<8x128xf32>
    %90 = arith.addf %81, %89 : vector<8x128xf32>
    %c0_27 = arith.constant 0 : index
    %c0_28 = arith.constant 0 : index
    %91 = vector.load %arg6[%c0_27, %c0_28] : memref<8x128xf32, #tpu.memory_space<vmem>>, vector<8x128xf32>
    %92 = arith.addf %91, %90 : vector<8x128xf32>
    %c0_29 = arith.constant 0 : index
    %c0_30 = arith.constant 0 : index
    %93 = vector.load %arg6[%c0_29, %c0_30] : memref<8x128xf32, #tpu.memory_space<vmem>>, vector<8x128xf32>
    tpu.vector_store %arg6[%c0_29, %c0_30], %92 {strides = array<i32>} : memref<8x128xf32, #tpu.memory_space<vmem>>, vector<8x128xf32>,
    return
  }
  func.func @transform_0(%arg0: i32, %arg1: i32) -> (i32, i32) {
    %c0_i32 = arith.constant 0 : i32
    %c0_i32_0 = arith.constant 0 : i32
    return %arg0, %c0_i32 : i32, i32
  }
  func.func @transform_1(%arg0: i32, %arg1: i32) -> (i32, i32) {
    %c0_i32 = arith.constant 0 : i32
    %c0_i32_0 = arith.constant 0 : i32
    return %arg0, %c0_i32 : i32, i32
  }
  func.func @transform_2(%arg0: i32, %arg1: i32) -> (i32, i32) {
    %c0_i32 = arith.constant 0 : i32
    %c0_i32_0 = arith.constant 0 : i32
    return %c0_i32, %arg1 : i32, i32
  }
  func.func @transform_3(%arg0: i32, %arg1: i32) -> (i32, i32) {
    %c0_i32 = arith.constant 0 : i32
    %c0_i32_0 = arith.constant 0 : i32
    return %c0_i32, %arg1 : i32, i32
  }
  func.func @transform_4(%arg0: i32, %arg1: i32) -> (i32, i32) {
    %c0_i32 = arith.constant 0 : i32
    %c0_i32_0 = arith.constant 0 : i32
    %c0_i32_1 = arith.constant 0 : i32
    return %c0_i32, %c0_i32_0 : i32, i32
  }
}

</mosaic_0001>

<bundles_post_ra>
// kernel: tpu_custom_call.1
= control target key start
LH: loop header
LB: loop body
LE: loop exit
PB: predicated region body
PF: predicated region fallthrough
CT: control target
= control target key end

     0   :  { %s7148_s0 = inlined_call_operand.hbm [shape: f32[48,1024], index: 0, kind: input, shape index: {}]   ;;  %s7149_s1 = inlined_call_operand.hbm [shape: f32[48,1024], index: 1, kind: input, shape index: {}]   ;;  %s7150_s2 = inlined_call_operand.hbm [shape: f32[1024,768], index: 2, kind: input, shape index: {}]   ;;  %s7151_s3 = inlined_call_operand.hbm [shape: f32[1024,768], index: 3, kind: input, shape index: {}]   ;;  %s7152_s4 = inlined_call_operand.hbm [shape: f32[8,128], index: 4, kind: output, shape index: {}]  }
   0x1   :  { %7367 = sst [smem:[#allocation220_spill]] %s7148_s0 }
   0x2   :  { %7368 = sst [smem:[#allocation221_spill]] %s7150_s2 }
   0x3   :  { %9 = vsyncpa [#allocation3], 0 }
   0x4   :  { %10 = vsyncpa [#allocation6], 0 }
   0x5   :  { %11 = vsyncpa [#allocation4], 0  ;;  %s4801_s15 = smov 0   ;;  %s4803_s16 = smov 0  }
   0x6   :  { %s4805_s17 = smov 0   ;;  %s4807_s18 = smov 0  }
   0x7   :  { %s4809_s19 = smov 0   ;;  %s4811_s20 = smov 0  }
   0x8 LB: > { %7369 = sst [smem:[#allocation14_spill]] %s4751_s17  ;;  %s4830_s21 = sadd.s32 4294967295, %s4763_s20   ;;  %s4763_s20 = sphi %s4811_s20, %s17_s20   ;;  %s4759_s19 = sphi %s4809_s19, %s7808_s19   ;;  %s4755_s18 = sphi %s4807_s18, %s7807_s18   ;;  %s4751_s17 = sphi %s4805_s17, %s7803_s17   ;;  %s4747_s16 = sphi %s4803_s16, %s7806_s16   ;;  %s4743_s15 = sphi %s4801_s15, %s7805_s15  }
   0x9   : > { %7370 = sst [smem:[#allocation15_spill]] %s4763_s20  ;;  %s88_s22 = sadd.s32 1, %s4751_s17 }
   0xa   : > { %p95_p0 = scmp.ne.s32.totalorder %s4751_s17, %s4747_s16  ;;  %p96_p1 = scmp.eq.s32.totalorder %s4763_s20, 0 }
   0xb   : > { %p101_p2 = scmp.ne.s32.totalorder %s4747_s16, %s4743_s15  ;;  %p7153_p3 = scmp.eq.s32.totalorder %s4830_s21, 0 }
   0xc   : > { %p97_p4 = por %p96_p1, %p95_p0  ;;  %p3171_p5 = scmp.ge.s32.totalorder %s4763_s20, 1 }
   0xd   : > { %p4841_p6 = por %p7153_p3, %p101_p2  ;;  %p159_p7 = scmp.lt.s32.totalorder %s4763_s20, 4 }
   0xe   : > { %s4765_s25 = smov [#allocation2]   ;;  %p4401_p10 = scmp.lt.s32.totalorder %s4763_s20, 3 }
   0xf   : > { %s7371_s23 = scalar_select %p4841_p6, 1, 0 }
  0x10   : > { %p4846_p8 = pnand %p3171_p5, %p159_p7  ;;  %s175_s26 = sshll.u32 %s4765_s25, 4  ;;  %s176_s26 = int_to_ptr.vmem [resolvable:$true] %s175_s26 }
  0x11   : > { %p4859_p12 = pnand %p4401_p10, %p97_p4  ;;  %s26_s29 = sadd.s32 1, %s4759_s19 }
  0x12   : > { %s7372_s24 = scalar_select %p4846_p8, 1, 0 }
  0x13   : > { %p4385_p9 = pneg %p4846_p8  ;;  %s7375_s0 = sld [smem:[#allocation220_spill]] }
  0x14   : > { %s7374_s28 = scalar_select %p4859_p12, 1, 0 }
  0x15   : > { %p4855_p11 = pnand %p4385_p9, %p7153_p3 }
  0x17   : > { %p7158_p0 = pneg %p4855_p11 }
  0x19   : > { %s4559_s6 = scalar_lea.hbm %s7375_s0, 6144 }
  0x1a   : > { %p4560_p13 = scmp.ne.s32.totalorder %s7375_s0, %s4559_s6  ;;  %p4566_p4 = scmp.lt.u32.totalorder %s4559_s6, %s7375_s0 }
  0x1c   : > { %p4562_p1 = pnand %p7158_p0, %p4560_p13 }
  0x1e   : > { %p4563_p2 = pneg %p4562_p1 }
  0x20   : > { %p4568_p5 = pnand %p4566_p4, %p4563_p2 }
  0x22   : > { %4571 = shalt.err (!%p4568_p5)
}
  0x23   : > { %s4572_s11 = scalar_lea.vmem %s176_s26, 6144  ;;  %p4580_p3 = scmp.lt.s32.totalorder %s176_s26, %s176_s26 }
  0x24   : > { %p4573_p7 = scmp.ne.s32.totalorder %s176_s26, %s4572_s11  ;;  %p4581_p6 = scmp.lt.s32.totalorder %s4572_s11, %s4572_s11 }
  0x26   : > { %p4575_p9 = pnand %p4573_p7, %p7158_p0  ;;  %p4582_p8 = por %p4581_p6, %p4580_p3 }
  0x28   : > { %p4576_p10 = pneg %p4575_p9 }
  0x2a   : > { %p4583_p12 = pnand %p4582_p8, %p4576_p10 }
  0x2c   : > { %4586 = shalt.err (!%p4583_p12)
}
  0x2d   : > { %s7157_s12 = smov 1024   ;;  %s7159_s13 = smov 64  }
  0x2e   : > { %4388 = dma.hbm_to_vmem [thread:$0]  (!%p4855_p11), %s7375_s0, 6144, %s176_s26, [#allocation3], %s7157_s12, %s7157_s12, %s7159_s13  }
  0x2f   : > { %p27_p3 = scmp.ge.s32.totalorder %s26_s29, 3  ;;  %s206_s25 = sand.u32 1, %s4763_s20  }
  0x30   : > { %s208_s30 = sand.u32 1, %s4751_s17   ;;  %s3192_s7 = sshll.u32 %s4759_s19, 8 }
  0x31   : > { %s7810_s29 = smov (%p27_p3, %s26_s29), 0  ;;  %s4893_s5 = sshll.u32 %s208_s30, 11 }
  0x32   : > { %7376 = sst [smem:[#allocation16_spill]] %s7810_s29  ;;  %s85_s6 = ssub.s32 %s4759_s19, %s7810_s29 }
  0x33   : > { %p86_p6 = scmp.eq.s32.totalorder %s85_s6, 0  ;;  %s7377_s2 = sld [smem:[#allocation221_spill]] }
  0x34   : > { %s210_s26 = scalar_lea.vmem [#allocation7], %s4893_s5  ;;  %s4913_s15 = scalar_lea.sflag [#allocation3], %s206_s25 }
  0x35   : > { %s217_s11 = sshll.u32 %s210_s26, 4  ;;  %p7379_p12 = scmp.ne.s32.totalorder %s7374_s28, 0  ;;  %s4911_s11 = int_to_ptr.vmem [resolvable:$true] %s217_s11 }
  0x36   : > { %s4909_s14 = scalar_select %p86_p6, %s4751_s17, %s88_s22  }
  0x37   : > { %p7163_p13 = pneg %p7379_p12 }
  0x38   : > { %7378 = sst [smem:[#allocation17_spill]] %s4909_s14 }
  0x39   : > { %s4903_s10 = scalar_lea.hbm %s7377_s2, %s3192_s7  ;;  %s4592_s9 = scalar_lea.hbm %s7377_s2, 98304 }
  0x3a   : > { %s4587_s30 = scalar_lea.hbm %s4903_s10, 32768  ;;  %p4593_p4 = scmp.lt.u32.totalorder %s4903_s10, %s7377_s2 }
  0x3b   : > { %p4588_p8 = scmp.ne.s32.totalorder %s4903_s10, %s4587_s30  ;;  %p4594_p5 = scmp.lt.u32.totalorder %s4592_s9, %s4587_s30 }
  0x3c   : > { %p4596_p9 = scmp.lt.u32.totalorder %s4587_s30, %s4903_s10 }
  0x3d   : > { %p4590_p1 = pnand %p7163_p13, %p4588_p8  ;;  %p4595_p7 = por %p4594_p5, %p4593_p4 }
  0x3f   : > { %p4591_p2 = pneg %p4590_p1  ;;  %p4597_p10 = por %p4596_p9, %p4595_p7 }
  0x41   : > { %p4598_p3 = pnand %p4597_p10, %p4591_p2 }
  0x43   : > { %4601 = shalt.err (!%p4598_p3)
}
  0x44   : > { %s4602_s22 = scalar_lea.vmem %s4911_s11, 32768  ;;  %s4768_s25 = smov [#allocation7]  }
  0x45   : > { %p4603_p6 = scmp.ne.s32.totalorder %s4911_s11, %s4602_s22  ;;  %s4607_s6 = sshll.u32 %s4768_s25, 4  ;;  %s4608_s6 = int_to_ptr.vmem [resolvable:$false] %s4607_s6 }
  0x46   : > { %s4609_s12 = scalar_lea.vmem %s4608_s6, 65536  ;;  %p4610_p0 = scmp.lt.s32.totalorder %s4911_s11, %s4608_s6 }
  0x47   : > { %p4605_p8 = pnand %p4603_p6, %p7163_p13  ;;  %p4611_p4 = scmp.lt.s32.totalorder %s4609_s12, %s4602_s22 }
  0x49   : > { %p4606_p1 = pneg %p4605_p8  ;;  %p4612_p5 = por %p4611_p4, %p4610_p0 }
  0x4b   : > { %p4613_p7 = pnand %p4612_p5, %p4606_p1 }
  0x4d   : > { %4616 = shalt.err (!%p4613_p7)
}
  0x4e   : > { %s4769_s30 = smov 768   ;;  %s4770_s8 = smov 256  }
  0x4f   : > { %s4771_s9 = smov 16   ;;  %s4772_s26 = smov [#allocation5]  }
  0x50   : > { %4395 = dma.hbm_to_vmem [thread:$0]  (!%p7379_p12), %s4903_s10, 32768, %s4911_s11, %s4913_s15, %s4769_s30, %s4770_s8, %s4771_s9  }
  0x51   : > { %s192_s22 = sshll.u32 %s4772_s26, 4  ;;  %s4949_s12 = scalar_lea.hbm %s7151_s3, %s3192_s7  ;;  %s193_s22 = int_to_ptr.vmem [resolvable:$true] %s192_s22 }
  0x52   : > { %s231_s13 = scalar_lea.vmem [#allocation8], %s4893_s5  ;;  %s4617_s14 = scalar_lea.hbm %s7149_s1, 6144 }
  0x53   : > { %s238_s0 = sshll.u32 %s231_s13, 4  ;;  %p4618_p0 = scmp.ne.s32.totalorder %s7149_s1, %s4617_s14  ;;  %s4975_s0 = int_to_ptr.vmem [resolvable:$true] %s238_s0 }
  0x54   : > { %p7380_p2 = pneg %p4855_p11  ;;  %p4624_p3 = scmp.lt.u32.totalorder %s4617_s14, %s7149_s1 }
  0x56   : > { %p4620_p9 = pnand %p4618_p0, %p7380_p2 }
  0x58   : > { %p4621_p10 = pneg %p4620_p9 }
  0x5a   : > { %p4626_p6 = pnand %p4624_p3, %p4621_p10 }
  0x5c   : > { %4629 = shalt.err (!%p4626_p6)
}
  0x5d   : > { %s4630_s5 = scalar_lea.vmem %s193_s22, 6144  ;;  %p7381_p1 = pmov %p7380_p2 }
  0x5e   : > { %p4631_p8 = scmp.ne.s32.totalorder %s193_s22, %s4630_s5  ;;  %p4638_p7 = scmp.lt.s32.totalorder %s193_s22, %s193_s22 }
  0x5f   : > { %p4639_p13 = scmp.lt.s32.totalorder %s4630_s5, %s4630_s5 }
  0x60   : > { %p4633_p4 = pnand %p4631_p8, %p7381_p1 }
  0x61   : > { %p4640_p12 = por %p4639_p13, %p4638_p7 }
  0x62   : > { %p4634_p5 = pneg %p4633_p4 }
  0x64   : > { %p4641_p0 = pnand %p4640_p12, %p4634_p5 }
  0x66   : > { %4644 = shalt.err (!%p4641_p0)
}
  0x67   : > { %s7382_s2 = smov 64   ;;  %s7383_s17 = smov 1024  }
  0x68   : > { %4391 = dma.hbm_to_vmem [thread:$0]  (!%p4855_p11), %s7149_s1, 6144, %s193_s22, [#allocation6], %s7383_s17, %s7383_s17, %s7382_s2  }
  0x69   : > { %s4645_s13 = scalar_lea.hbm %s4949_s12, 32768  ;;  %p7384_p12 = scmp.ne.s32.totalorder %s7374_s28, 0 }
  0x6a   : > { %p4646_p13 = scmp.ne.s32.totalorder %s4949_s12, %s4645_s13  ;;  %s4650_s14 = scalar_lea.hbm %s7151_s3, 98304 }
  0x6b   : > { %p7385_p2 = pneg %p7384_p12  ;;  %p4651_p3 = scmp.lt.u32.totalorder %s4949_s12, %s7151_s3 }
  0x6c   : > { %p4652_p6 = scmp.lt.u32.totalorder %s4650_s14, %s4645_s13  ;;  %p4654_p1 = scmp.lt.u32.totalorder %s4645_s13, %s4949_s12 }
  0x6d   : > { %p4648_p9 = pnand %p4646_p13, %p7385_p2 }
  0x6e   : > { %p4653_p8 = por %p4652_p6, %p4651_p3 }
  0x6f   : > { %p4649_p10 = pneg %p4648_p9 }
  0x70   : > { %p4655_p11 = por %p4654_p1, %p4653_p8 }
  0x72   : > { %p4656_p4 = pnand %p4655_p11, %p4649_p10 }
  0x74   : > { %4659 = shalt.err (!%p4656_p4)
}
  0x75   : > { %s4660_s22 = scalar_lea.vmem %s4975_s0, 32768  ;;  %p7386_p7 = pmov %p7385_p2 }
  0x76   : > { %p4661_p5 = scmp.ne.s32.totalorder %s4975_s0, %s4660_s22  ;;  %s4773_s6 = smov [#allocation8]  }
  0x77   : > { %s4665_s10 = sshll.u32 %s4773_s6, 4  ;;  %s4666_s10 = int_to_ptr.vmem [resolvable:$false] %s4665_s10 }
  0x78   : > { %p4663_p0 = pnand %p4661_p5, %p7386_p7  ;;  %s4667_s11 = scalar_lea.vmem %s4666_s10, 65536 }
  0x79   : > { %p4668_p2 = scmp.lt.s32.totalorder %s4975_s0, %s4666_s10  ;;  %p4669_p9 = scmp.lt.s32.totalorder %s4667_s11, %s4660_s22 }
  0x7a   : > { %p4664_p13 = pneg %p4663_p0 }
  0x7b   : > { %p4670_p3 = por %p4669_p9, %p4668_p2 }
  0x7d   : > { %p4671_p6 = pnand %p4670_p3, %p4664_p13 }
  0x7f   : > { %4674 = shalt.err (!%p4671_p6)
}
  0x80   : > { %4398 = dma.hbm_to_vmem [thread:$0]  (!%p7384_p12), %s4949_s12, 32768, %s4975_s0, %s4913_s15, %s4769_s30, %s4770_s8, %s4771_s9  }
  0x81   : > { %p7387_p10 = scmp.ne.s32.totalorder %s7372_s24, 0 }
  0x83   : > { %250 = sbr.rel (%p7387_p10) target bundleno = 1202 (0x4b2), region = 36 }
  0x8a   : > { %p7388_p8 = scmp.eq.s32.totalorder %s4830_s21, 0 }
  0x8c   : > { %4726 = dma.done.wait (%p7388_p8), [#allocation3], 6144   ;;  %p7389_p1 = pmov %p7388_p8 }
  0x8e   : > { %4728 = vsyncadd (%p7389_p1), [#allocation3], 4294961152  ;;  %p7390_p11 = pmov %p7389_p1 }
  0x8f   : > { %p7391_p4 = pmov %p7389_p1 }
  0x90   : > { %4730 = dma.done.wait (%p7390_p11), [#allocation6], 6144  }
  0x91   : > { %4732 = vsyncadd (%p7391_p4), [#allocation6], 4294961152  ;;  %s260_s28 = sand.u32 1, %s4830_s21   ;;  %s262_s0 = sand.u32 1, %s4747_s16  }
  0x92   : > { %s3184_s15 = sshll.u32 %s262_s0, 11  ;;  %s261_s24 = scalar_lea.sflag [#allocation3], %s260_s28 }
  0x93   : > { %s5016_s30 = scalar_lea.vmem [#allocation7], %s3184_s15  ;;  %p7392_p12 = scmp.ne.s32.totalorder %s7371_s23, 0 }
  0x95   : > { %4734 = dma.done.wait (%p7392_p12), %s261_s24, 65536  }
  0x96   : > { %4736 = vsyncadd (%p7392_p12), %s261_s24, 4294901760  ;;  %p303_p5 = scmp.eq.s32.totalorder %s4755_s18, 0  ;;  %s5023_s8 = scalar_lea.vmem [#allocation8], %s3184_s15 }
  0x97   : > { %v4774_v0 = vmov (%p303_p5), 0.0  }
  0x98   : > { %307 = sbr.rel (!%p303_p5) target bundleno = 159 (0x9f), region = 56  ;;  %308 = vst [vmem:[#allocation9] sm:$0xff] (%p303_p5), %v4774_v0 }
  0x9f PF: > { %v406_v1 = vld [vmem:[%s5016_s30 + $0x8] sm:$0xff]  ;;  %v408_v2 = vld [vmem:[%s5016_s30 + $0x18] sm:$0xff]  ;;  %v405_v6 = vld [vmem:[%s5016_s30] sm:$0xff]  ;;  %s3187_s23 = sshll.u32 %s4755_s18, 8  ;;  %s4775_s5 = smov [#allocation9]  }
  0xa0   : > { %v662_v3 = vld [vmem:[%s5023_s8 + $0x8] sm:$0xff]  ;;  %v5028_v4 = vpack.c.bf16 %v408_v2, %v406_v1  ;;  %v664_v5 = vld [vmem:[%s5023_s8 + $0x18] sm:$0xff]  ;;  %v407_v7 = vld [vmem:[%s5016_s30 + $0x10] sm:$0xff]  ;;  %s3068_s2 = sshll.u32 %s4775_s5, 4  ;;  %p4404_p7 = scmp.eq.s32.totalorder %s4830_s21, 2  ;;  %s3069_s2 = int_to_ptr.vmem [resolvable:$true] %s3068_s2 }
  0xa1   : > { %v5033_v8 = vpack.c.bf16 %v664_v5, %v662_v3  ;;  %v5035_v9 = vpack.c.bf16 %v407_v7, %v405_v6  ;;  %v661_v10 = vld [vmem:[%s5023_s8] sm:$0xff]  ;;  %v663_v11 = vld [vmem:[%s5023_s8 + $0x10] sm:$0xff]  ;;  %v410_v12 = vld [vmem:[%s5016_s30 + $0x28] sm:$0xff]  ;;  %s4675_s17 = scalar_lea.vmem %s3069_s2, 128  ;;  %p4682_p9 = scmp.lt.s32.totalorder %s3069_s2, %s3069_s2 }
  0xa2   : > { %3196 = vmatprep.subr.bf16.mxu0 %v5028_v4  ;;  %v5041_v13 = vpack.c.bf16 %v663_v11, %v661_v10  ;;  %v412_v14 = vld [vmem:[%s5016_s30 + $0x38] sm:$0xff]  ;;  %v666_v15 = vld [vmem:[%s5023_s8 + $0x28] sm:$0xff]  ;;  %v409_v19 = vld [vmem:[%s5016_s30 + $0x20] sm:$0xff]  ;;  %p4676_p0 = scmp.ne.s32.totalorder %s3069_s2, %s4675_s17  ;;  %p4683_p3 = scmp.lt.s32.totalorder %s4675_s17, %s4675_s17 }
  0xa3   : > { %v668_v16 = vld [vmem:[%s5023_s8 + $0x38] sm:$0xff]  ;;  %3452 = vmatprep.subr.bf16.mxu1 %v5033_v8  ;;  %3198 = vmatpush1.bf16.msra.mxu0 %v5035_v9  ;;  %v5048_v17 = vpack.c.bf16 %v412_v14, %v410_v12  ;;  %v411_v20 = vld [vmem:[%s5016_s30 + $0x30] sm:$0xff]  ;;  %v665_v21 = vld [vmem:[%s5023_s8 + $0x20] sm:$0xff] }
  0xa4   : > { %v5050_v18 = vpack.c.bf16 %v668_v16, %v666_v15  ;;  %3454 = vmatpush1.bf16.msra.mxu1 %v5041_v13  ;;  %v5056_v22 = vpack.c.bf16 %v411_v20, %v409_v19  ;;  %v667_v23 = vld [vmem:[%s5023_s8 + $0x30] sm:$0xff]  ;;  %v414_v24 = vld [vmem:[%s5016_s30 + $0x48] sm:$0xff]  ;;  %v416_v25 = vld [vmem:[%s5016_s30 + $0x58] sm:$0xff]  ;;  %p4677_p13 = pnand %p4676_p0, %p4404_p7  ;;  %p4684_p6 = por %p4683_p3, %p4682_p9 }
  0xa5   : > { %3200 = vmatprep.subr.bf16.mxu0 %v5048_v17  ;;  %v5063_v26 = vpack.c.bf16 %v667_v23, %v665_v21  ;;  %v5065_v27 = vpack.c.bf16 %v416_v25, %v414_v24  ;;  %v670_v28 = vld [vmem:[%s5023_s8 + $0x48] sm:$0xff]  ;;  %v672_v29 = vld [vmem:[%s5023_s8 + $0x58] sm:$0xff]  ;;  %v413_v30 = vld [vmem:[%s5016_s30 + $0x40] sm:$0xff] }
  0xa6   : > { %3456 = vmatprep.subr.bf16.mxu1 %v5050_v18  ;;  %v5070_v31 = vpack.c.bf16 %v672_v29, %v670_v28  ;;  %v415_v32 = vld [vmem:[%s5016_s30 + $0x50] sm:$0xff]  ;;  %v669_v33 = vld [vmem:[%s5023_s8 + $0x40] sm:$0xff]  ;;  %v418_v36 = vld [vmem:[%s5016_s30 + $0x68] sm:$0xff]  ;;  %p4678_p2 = pneg %p4677_p13 }
  0xa7   : > { %v671_v34 = vld [vmem:[%s5023_s8 + $0x50] sm:$0xff]  ;;  %3202 = vmatpush1.bf16.msra.mxu0 %v5056_v22  ;;  %v5076_v35 = vpack.c.bf16 %v415_v32, %v413_v30  ;;  %v420_v37 = vld [vmem:[%s5016_s30 + $0x78] sm:$0xff]  ;;  %v674_v38 = vld [vmem:[%s5023_s8 + $0x68] sm:$0xff] }
  0xa8   : > { %3458 = vmatpush1.bf16.msra.mxu1 %v5063_v26  ;;  %3204 = vmatprep.subr.bf16.mxu0 %v5065_v27  ;;  %v5083_v39 = vpack.c.bf16 %v671_v34, %v669_v33  ;;  %v5085_v40 = vpack.c.bf16 %v420_v37, %v418_v36  ;;  %v676_v41 = vld [vmem:[%s5023_s8 + $0x78] sm:$0xff]  ;;  %v417_v42 = vld [vmem:[%s5016_s30 + $0x60] sm:$0xff]  ;;  %v419_v43 = vld [vmem:[%s5016_s30 + $0x70] sm:$0xff]  ;;  %p4685_p10 = pnand %p4684_p6, %p4678_p2 }
  0xa9   : > { %3460 = vmatprep.subr.bf16.mxu1 %v5070_v31  ;;  %v5091_v44 = vpack.c.bf16 %v676_v41, %v674_v38  ;;  %v673_v45 = vld [vmem:[%s5023_s8 + $0x60] sm:$0xff]  ;;  %v675_v46 = vld [vmem:[%s5023_s8 + $0x70] sm:$0xff]  ;;  %v422_v47 = vld [vmem:[%s5016_s30 + $0x88] sm:$0xff]  ;;  %v5100_v51 = vpack.c.bf16 %v419_v43, %v417_v42 }
  0xaa   : > { %v424_v48 = vld [vmem:[%s5016_s30 + $0x98] sm:$0xff]  ;;  %v678_v49 = vld [vmem:[%s5023_s8 + $0x88] sm:$0xff]  ;;  %v5104_v52 = vpack.c.bf16 %v675_v46, %v673_v45  ;;  %v421_v54 = vld [vmem:[%s5016_s30 + $0x80] sm:$0xff] }
  0xab   : > { %v680_v50 = vld [vmem:[%s5023_s8 + $0x98] sm:$0xff]  ;;  %3206 = vmatpush1.bf16.msra.mxu0 %v5076_v35  ;;  %v5106_v53 = vpack.c.bf16 %v424_v48, %v422_v47  ;;  %v423_v55 = vld [vmem:[%s5016_s30 + $0x90] sm:$0xff]  ;;  %v677_v56 = vld [vmem:[%s5023_s8 + $0x80] sm:$0xff] }
  0xac   : > { %3462 = vmatpush1.bf16.msra.mxu1 %v5083_v39  ;;  %3208 = vmatprep.subr.bf16.mxu0 %v5085_v40  ;;  %v5112_v57 = vpack.c.bf16 %v680_v50, %v678_v49  ;;  %v679_v58 = vld [vmem:[%s5023_s8 + $0x90] sm:$0xff]  ;;  %v426_v59 = vld [vmem:[%s5016_s30 + $0xa8] sm:$0xff]  ;;  %v428_v60 = vld [vmem:[%s5016_s30 + $0xb8] sm:$0xff]  ;;  %v5120_v63 = vpack.c.bf16 %v423_v55, %v421_v54 }
  0xad   : > { %3464 = vmatprep.subr.bf16.mxu1 %v5091_v44  ;;  %v682_v61 = vld [vmem:[%s5023_s8 + $0xa8] sm:$0xff]  ;;  %v684_v62 = vld [vmem:[%s5023_s8 + $0xb8] sm:$0xff]  ;;  %v5124_v0 = vpack.c.bf16 %v679_v58, %v677_v56  ;;  %v5126_v1 = vpack.c.bf16 %v428_v60, %v426_v59  ;;  %v425_v2 = vld [vmem:[%s5016_s30 + $0xa0] sm:$0xff] }
  0xae   : > { %v427_v3 = vld [vmem:[%s5016_s30 + $0xb0] sm:$0xff]  ;;  %v681_v5 = vld [vmem:[%s5023_s8 + $0xa0] sm:$0xff]  ;;  %v5132_v6 = vpack.c.bf16 %v684_v62, %v682_v61  ;;  %v430_v10 = vld [vmem:[%s5016_s30 + $0xc8] sm:$0xff] }
  0xaf   : > { %3210 = vmatpush1.bf16.msra.mxu0 %v5100_v51  ;;  %v683_v7 = vld [vmem:[%s5023_s8 + $0xb0] sm:$0xff]  ;;  %v432_v11 = vld [vmem:[%s5016_s30 + $0xd8] sm:$0xff]  ;;  %v686_v12 = vld [vmem:[%s5023_s8 + $0xc8] sm:$0xff]  ;;  %v5140_v15 = vpack.c.bf16 %v427_v3, %v425_v2 }
  0xb0   : > { %3466 = vmatpush1.bf16.msra.mxu1 %v5104_v52  ;;  %3212 = vmatprep.subr.bf16.mxu0 %v5106_v53  ;;  %v688_v14 = vld [vmem:[%s5023_s8 + $0xd8] sm:$0xff]  ;;  %v5144_v16 = vpack.c.bf16 %v683_v7, %v681_v5  ;;  %v5146_v19 = vpack.c.bf16 %v432_v11, %v430_v10  ;;  %v429_v20 = vld [vmem:[%s5016_s30 + $0xc0] sm:$0xff]  ;;  %v431_v21 = vld [vmem:[%s5016_s30 + $0xd0] sm:$0xff] }
  0xb1   : > { %3468 = vmatprep.subr.bf16.mxu1 %v5112_v57  ;;  %v685_v23 = vld [vmem:[%s5023_s8 + $0xc0] sm:$0xff]  ;;  %v5152_v24 = vpack.c.bf16 %v688_v14, %v686_v12  ;;  %v687_v25 = vld [vmem:[%s5023_s8 + $0xd0] sm:$0xff]  ;;  %v434_v28 = vld [vmem:[%s5016_s30 + $0xe8] sm:$0xff]  ;;  %v5160_v33 = vpack.c.bf16 %v431_v21, %v429_v20 }
  0xb2   : > { %v436_v29 = vld [vmem:[%s5016_s30 + $0xf8] sm:$0xff]  ;;  %v690_v30 = vld [vmem:[%s5023_s8 + $0xe8] sm:$0xff]  ;;  %v5164_v34 = vpack.c.bf16 %v687_v25, %v685_v23  ;;  %v433_v37 = vld [vmem:[%s5016_s30 + $0xe0] sm:$0xff] }
  0xb3   : > { %3214 = vmatpush1.bf16.msra.mxu0 %v5120_v63  ;;  %v692_v32 = vld [vmem:[%s5023_s8 + $0xf8] sm:$0xff]  ;;  %v5166_v36 = vpack.c.bf16 %v436_v29, %v434_v28  ;;  %v435_v38 = vld [vmem:[%s5016_s30 + $0xf0] sm:$0xff]  ;;  %v689_v41 = vld [vmem:[%s5023_s8 + $0xe0] sm:$0xff] }
  0xb4   : > { %3470 = vmatpush1.bf16.msra.mxu1 %v5124_v0  ;;  %3216 = vmatprep.subr.bf16.mxu0 %v5126_v1  ;;  %v5172_v42 = vpack.c.bf16 %v692_v32, %v690_v30  ;;  %v691_v43 = vld [vmem:[%s5023_s8 + $0xf0] sm:$0xff]  ;;  %v438_v45 = vld [vmem:[%s5016_s30 + $0x108] sm:$0xff]  ;;  %v440_v46 = vld [vmem:[%s5016_s30 + $0x118] sm:$0xff]  ;;  %v5180_v49 = vpack.c.bf16 %v435_v38, %v433_v37 }
  0xb5   : > { %3472 = vmatprep.subr.bf16.mxu1 %v5132_v6  ;;  %v694_v47 = vld [vmem:[%s5023_s8 + $0x108] sm:$0xff]  ;;  %v696_v48 = vld [vmem:[%s5023_s8 + $0x118] sm:$0xff]  ;;  %v5184_v50 = vpack.c.bf16 %v691_v43, %v689_v41  ;;  %v5186_v54 = vpack.c.bf16 %v440_v46, %v438_v45  ;;  %v437_v55 = vld [vmem:[%s5016_s30 + $0x100] sm:$0xff] }
  0xb6   : > { %v439_v56 = vld [vmem:[%s5016_s30 + $0x110] sm:$0xff]  ;;  %v693_v58 = vld [vmem:[%s5023_s8 + $0x100] sm:$0xff]  ;;  %v5192_v59 = vpack.c.bf16 %v696_v48, %v694_v47  ;;  %v442_v61 = vld [vmem:[%s5016_s30 + $0x128] sm:$0xff] }
  0xb7   : > { %3218 = vmatpush1.bf16.msra.mxu0 %v5140_v15  ;;  %v695_v60 = vld [vmem:[%s5023_s8 + $0x110] sm:$0xff]  ;;  %v444_v62 = vld [vmem:[%s5016_s30 + $0x138] sm:$0xff]  ;;  %v698_v2 = vld [vmem:[%s5023_s8 + $0x128] sm:$0xff]  ;;  %v5200_v5 = vpack.c.bf16 %v439_v56, %v437_v55 }
  0xb8   : > { %3474 = vmatpush1.bf16.msra.mxu1 %v5144_v16  ;;  %3220 = vmatprep.subr.bf16.mxu0 %v5146_v19  ;;  %v700_v3 = vld [vmem:[%s5023_s8 + $0x138] sm:$0xff]  ;;  %v5204_v7 = vpack.c.bf16 %v695_v60, %v693_v58  ;;  %v5206_v10 = vpack.c.bf16 %v444_v62, %v442_v61  ;;  %v441_v11 = vld [vmem:[%s5016_s30 + $0x120] sm:$0xff]  ;;  %v443_v12 = vld [vmem:[%s5016_s30 + $0x130] sm:$0xff] }
  0xb9   : > { %3476 = vmatprep.subr.bf16.mxu1 %v5152_v24  ;;  %v697_v14 = vld [vmem:[%s5023_s8 + $0x120] sm:$0xff]  ;;  %v5212_v20 = vpack.c.bf16 %v700_v3, %v698_v2  ;;  %v699_v21 = vld [vmem:[%s5023_s8 + $0x130] sm:$0xff]  ;;  %v446_v23 = vld [vmem:[%s5016_s30 + $0x148] sm:$0xff]  ;;  %v5220_v30 = vpack.c.bf16 %v443_v12, %v441_v11 }
  0xba   : > { %v448_v25 = vld [vmem:[%s5016_s30 + $0x158] sm:$0xff]  ;;  %v702_v28 = vld [vmem:[%s5023_s8 + $0x148] sm:$0xff]  ;;  %v5224_v32 = vpack.c.bf16 %v699_v21, %v697_v14  ;;  %v445_v38 = vld [vmem:[%s5016_s30 + $0x140] sm:$0xff] }
  0xbb   : > { %3222 = vmatpush1.bf16.msra.mxu0 %v5160_v33  ;;  %v704_v29 = vld [vmem:[%s5023_s8 + $0x158] sm:$0xff]  ;;  %v5226_v37 = vpack.c.bf16 %v448_v25, %v446_v23  ;;  %v447_v41 = vld [vmem:[%s5016_s30 + $0x150] sm:$0xff]  ;;  %v701_v43 = vld [vmem:[%s5023_s8 + $0x140] sm:$0xff] }
  0xbc   : > { %3478 = vmatpush1.bf16.msra.mxu1 %v5164_v34  ;;  %3224 = vmatprep.subr.bf16.mxu0 %v5166_v36  ;;  %v5232_v45 = vpack.c.bf16 %v704_v29, %v702_v28  ;;  %v703_v46 = vld [vmem:[%s5023_s8 + $0x150] sm:$0xff]  ;;  %v450_v47 = vld [vmem:[%s5016_s30 + $0x168] sm:$0xff]  ;;  %v452_v48 = vld [vmem:[%s5016_s30 + $0x178] sm:$0xff]  ;;  %v5240_v58 = vpack.c.bf16 %v447_v41, %v445_v38 }
  0xbd   : > { %3480 = vmatprep.subr.bf16.mxu1 %v5172_v42  ;;  %v706_v55 = vld [vmem:[%s5023_s8 + $0x168] sm:$0xff]  ;;  %v708_v56 = vld [vmem:[%s5023_s8 + $0x178] sm:$0xff]  ;;  %v449_v60 = vld [vmem:[%s5016_s30 + $0x160] sm:$0xff]  ;;  %v5245_v61 = vpack.c.bf16 %v703_v46, %v701_v43  ;;  %v5247_v62 = vpack.c.bf16 %v452_v48, %v450_v47 }
  0xbe   : > { %7393 = vst [vmem:[#allocation18_spill] sm:$0xff] %v5240_v58  ;;  %v451_v2 = vld [vmem:[%s5016_s30 + $0x170] sm:$0xff]  ;;  %v705_v3 = vld [vmem:[%s5023_s8 + $0x160] sm:$0xff]  ;;  %v5253_v12 = vpack.c.bf16 %v708_v56, %v706_v55  ;;  %v454_v14 = vld [vmem:[%s5016_s30 + $0x188] sm:$0xff] }
  0xbf   : > { %3226 = vmatpush1.bf16.msra.mxu0 %v5180_v49  ;;  %7394 = vst [vmem:[#allocation19_spill] sm:$0xff] %v5245_v61  ;;  %7395 = vst [vmem:[#allocation20_spill] sm:$0xff] %v5247_v62  ;;  %v707_v11 = vld [vmem:[%s5023_s8 + $0x170] sm:$0xff]  ;;  %v456_v21 = vld [vmem:[%s5016_s30 + $0x198] sm:$0xff]  ;;  %v5260_v29 = vpack.c.bf16 %v451_v2, %v449_v60 }
  0xc0   : > { %3482 = vmatpush1.bf16.msra.mxu1 %v5184_v50  ;;  %3228 = vmatprep.subr.bf16.mxu0 %v5186_v54  ;;  %7396 = vst [vmem:[#allocation21_spill] sm:$0xff] %v5253_v12  ;;  %v310_v23 = vld [vmem:[#allocation2 + $0x8] sm:$0xff]  ;;  %v712_v28 = vld [vmem:[%s5023_s8 + $0x198] sm:$0xff]  ;;  %v5264_v38 = vpack.c.bf16 %v707_v11, %v705_v3  ;;  %v5266_v41 = vpack.c.bf16 %v456_v21, %v454_v14  ;;  %v453_v43 = vld [vmem:[%s5016_s30 + $0x180] sm:$0xff] }
  0xc1   : > { %3484 = vmatprep.subr.bf16.mxu1 %v5192_v59  ;;  %v710_v25 = vld [vmem:[%s5023_s8 + $0x188] sm:$0xff]  ;;  %981 = vmatprep.mubr.f32.mxu0 %v310_v23  ;;  %7397 = vst [vmem:[#allocation22_spill] sm:$0xff] %v5260_v29  ;;  %v455_v46 = vld [vmem:[%s5016_s30 + $0x190] sm:$0xff]  ;;  %v709_v47 = vld [vmem:[%s5023_s8 + $0x180] sm:$0xff] }
  0xc2   : > { %1385 = vmatprep.mubr.f32.mxu1 %v310_v23  ;;  %7398 = vst [vmem:[#allocation23_spill] sm:$0xff] %v5264_v38  ;;  %7399 = vst [vmem:[#allocation24_spill] sm:$0xff] %v5266_v41  ;;  %v5272_v48 = vpack.c.bf16 %v712_v28, %v710_v25  ;;  %v711_v55 = vld [vmem:[%s5023_s8 + $0x190] sm:$0xff]  ;;  %v458_v56 = vld [vmem:[%s5016_s30 + $0x1a8] sm:$0xff]  ;;  %v5280_v11 = vpack.c.bf16 %v455_v46, %v453_v43 }
  0xc3   : > { %3230 = vmatpush1.bf16.msra.mxu0 %v5200_v5  ;;  %v460_v60 = vld [vmem:[%s5016_s30 + $0x1b8] sm:$0xff]  ;;  %v714_v2 = vld [vmem:[%s5023_s8 + $0x1a8] sm:$0xff]  ;;  %v5284_v14 = vpack.c.bf16 %v711_v55, %v709_v47  ;;  %v457_v23 = vld [vmem:[%s5016_s30 + $0x1a0] sm:$0xff] }
  0xc4   : > { %3486 = vmatpush1.bf16.msra.mxu1 %v5204_v7  ;;  %3232 = vmatprep.subr.bf16.mxu0 %v5206_v10  ;;  %7400 = vst [vmem:[#allocation25_spill] sm:$0xff] %v5272_v48  ;;  %v716_v3 = vld [vmem:[%s5023_s8 + $0x1b8] sm:$0xff]  ;;  %7401 = vst [vmem:[#allocation26_spill] sm:$0xff] %v5280_v11  ;;  %v5286_v21 = vpack.c.bf16 %v460_v60, %v458_v56  ;;  %v459_v25 = vld [vmem:[%s5016_s30 + $0x1b0] sm:$0xff] }
  0xc5   : > { %3488 = vmatprep.subr.bf16.mxu1 %v5212_v20  ;;  %7402 = vst [vmem:[#allocation27_spill] sm:$0xff] %v5284_v14  ;;  %v713_v28 = vld [vmem:[%s5023_s8 + $0x1a0] sm:$0xff]  ;;  %v715_v43 = vld [vmem:[%s5023_s8 + $0x1b0] sm:$0xff]  ;;  %v462_v46 = vld [vmem:[%s5016_s30 + $0x1c8] sm:$0xff]  ;;  %v5300_v56 = vpack.c.bf16 %v459_v25, %v457_v23 }
  0xc6   : > { %7403 = vst [vmem:[#allocation28_spill] sm:$0xff] %v5286_v21  ;;  %v718_v47 = vld [vmem:[%s5023_s8 + $0x1c8] sm:$0xff]  ;;  %v720_v55 = vld [vmem:[%s5023_s8 + $0x1d8] sm:$0xff]  ;;  %v5304_v60 = vpack.c.bf16 %v715_v43, %v713_v28  ;;  %v719_v23 = vld [vmem:[%s5023_s8 + $0x1d0] sm:$0xff] }
  0xc7   : > { %3234 = vmatpush1.bf16.msra.mxu0 %v5220_v30  ;;  %7405 = vst [vmem:[#allocation30_spill] sm:$0xff] %v5300_v56  ;;  %v466_v25 = vld [vmem:[%s5016_s30 + $0x1e8] sm:$0xff] }
  0xc8   : > { %3490 = vmatpush1.bf16.msra.mxu1 %v5224_v32  ;;  %3236 = vmatprep.subr.bf16.mxu0 %v5226_v37  ;;  %7406 = vst [vmem:[#allocation31_spill] sm:$0xff] %v5304_v60  ;;  %v722_v28 = vld [vmem:[%s5023_s8 + $0x1e8] sm:$0xff] }
  0xc9   : > { %3492 = vmatprep.subr.bf16.mxu1 %v5232_v45 }
  0xcb   : > { %3238 = vmatpush1.bf16.msra.mxu0 %v5240_v58  ;;  %v496_v58 = vld [vmem:[%s5016_s30 + $0x2d8] sm:$0xff] }
  0xcc   : > { %3494 = vmatpush1.bf16.msra.mxu1 %v5245_v61  ;;  %3240 = vmatprep.subr.bf16.mxu0 %v5247_v62  ;;  %v480_v62 = vld [vmem:[%s5016_s30 + $0x258] sm:$0xff]  ;;  %v742_v61 = vld [vmem:[%s5023_s8 + $0x288] sm:$0xff] }
  0xcd   : > { %3496 = vmatprep.subr.bf16.mxu1 %v5253_v12  ;;  %v5292_v12 = vpack.c.bf16 %v716_v3, %v714_v2  ;;  %v461_v3 = vld [vmem:[%s5016_s30 + $0x1c0] sm:$0xff] }
  0xcf   : > { %3242 = vmatpush1.bf16.msra.mxu0 %v5260_v29  ;;  %7404 = vst [vmem:[#allocation29_spill] sm:$0xff] %v5292_v12  ;;  %v5312_v29 = vpack.c.bf16 %v720_v55, %v718_v47  ;;  %v465_v55 = vld [vmem:[%s5016_s30 + $0x1e0] sm:$0xff] }
  0xd0   : > { %3498 = vmatpush1.bf16.msra.mxu1 %v5264_v38  ;;  %3244 = vmatprep.subr.bf16.mxu0 %v5266_v41  ;;  %v464_v38 = vld [vmem:[%s5016_s30 + $0x1d8] sm:$0xff]  ;;  %v717_v41 = vld [vmem:[%s5023_s8 + $0x1c0] sm:$0xff] }
  0xd1   : > { %3500 = vmatprep.subr.bf16.mxu1 %v5272_v48  ;;  %v5306_v2 = vpack.c.bf16 %v464_v38, %v462_v46  ;;  %v463_v48 = vld [vmem:[%s5016_s30 + $0x1d0] sm:$0xff]  ;;  %7408 = vst [vmem:[#allocation33_spill] sm:$0xff] %v5312_v29  ;;  %v724_v38 = vld [vmem:[%s5023_s8 + $0x1f8] sm:$0xff]  ;;  %v5324_v46 = vpack.c.bf16 %v719_v23, %v717_v41  ;;  %v726_v41 = vld [vmem:[%s5023_s8 + $0x208] sm:$0xff] }
  0xd2   : > { %v5320_v43 = vpack.c.bf16 %v463_v48, %v461_v3  ;;  %v723_v48 = vld [vmem:[%s5023_s8 + $0x1f0] sm:$0xff]  ;;  %v470_v3 = vld [vmem:[%s5016_s30 + $0x208] sm:$0xff] }
  0xd3   : > { %3246 = vmatpush1.bf16.msra.mxu0 %v5280_v11  ;;  %7407 = vst [vmem:[#allocation32_spill] sm:$0xff] %v5306_v2  ;;  %7410 = vst [vmem:[#allocation35_spill] sm:$0xff] %v5324_v46  ;;  %v5332_v11 = vpack.c.bf16 %v724_v38, %v722_v28  ;;  %v469_v38 = vld [vmem:[%s5016_s30 + $0x200] sm:$0xff] }
  0xd4   : > { %3502 = vmatpush1.bf16.msra.mxu1 %v5284_v14  ;;  %3248 = vmatprep.subr.bf16.mxu0 %v5286_v21  ;;  %v468_v14 = vld [vmem:[%s5016_s30 + $0x1f8] sm:$0xff]  ;;  %7409 = vst [vmem:[#allocation34_spill] sm:$0xff] %v5320_v43  ;;  %v721_v21 = vld [vmem:[%s5023_s8 + $0x1e0] sm:$0xff] }
  0xd5   : > { %3504 = vmatprep.subr.bf16.mxu1 %v5292_v12  ;;  %v5326_v47 = vpack.c.bf16 %v468_v14, %v466_v25  ;;  %v467_v12 = vld [vmem:[%s5016_s30 + $0x1f0] sm:$0xff]  ;;  %7412 = vst [vmem:[#allocation37_spill] sm:$0xff] %v5332_v11  ;;  %v728_v14 = vld [vmem:[%s5023_s8 + $0x218] sm:$0xff]  ;;  %v5344_v25 = vpack.c.bf16 %v723_v48, %v721_v21 }
  0xd6   : > { %v5340_v23 = vpack.c.bf16 %v467_v12, %v465_v55  ;;  %v727_v12 = vld [vmem:[%s5023_s8 + $0x210] sm:$0xff]  ;;  %v474_v55 = vld [vmem:[%s5016_s30 + $0x228] sm:$0xff]  ;;  %v732_v21 = vld [vmem:[%s5023_s8 + $0x238] sm:$0xff] }
  0xd7   : > { %3250 = vmatpush1.bf16.msra.mxu0 %v5300_v56  ;;  %7411 = vst [vmem:[#allocation36_spill] sm:$0xff] %v5326_v47  ;;  %7414 = vst [vmem:[#allocation39_spill] sm:$0xff] %v5344_v25  ;;  %v5352_v56 = vpack.c.bf16 %v728_v14, %v726_v41  ;;  %v473_v14 = vld [vmem:[%s5016_s30 + $0x220] sm:$0xff] }
  0xd8   : > { %3506 = vmatpush1.bf16.msra.mxu1 %v5304_v60  ;;  %3252 = vmatprep.subr.bf16.mxu0 %v5306_v2  ;;  %v472_v60 = vld [vmem:[%s5016_s30 + $0x218] sm:$0xff]  ;;  %7413 = vst [vmem:[#allocation38_spill] sm:$0xff] %v5340_v23  ;;  %v725_v2 = vld [vmem:[%s5023_s8 + $0x200] sm:$0xff] }
  0xd9   : > { %3508 = vmatprep.subr.bf16.mxu1 %v5312_v29  ;;  %v5346_v28 = vpack.c.bf16 %v472_v60, %v470_v3  ;;  %v471_v29 = vld [vmem:[%s5016_s30 + $0x210] sm:$0xff]  ;;  %7416 = vst [vmem:[#allocation41_spill] sm:$0xff] %v5352_v56  ;;  %v309_v60 = vld [vmem:[#allocation2] sm:$0xff]  ;;  %v5364_v3 = vpack.c.bf16 %v727_v12, %v725_v2  ;;  %v734_v2 = vld [vmem:[%s5023_s8 + $0x248] sm:$0xff] }
  0xda   : > { %v5360_v48 = vpack.c.bf16 %v471_v29, %v469_v38  ;;  %v731_v29 = vld [vmem:[%s5023_s8 + $0x230] sm:$0xff]  ;;  %v478_v38 = vld [vmem:[%s5016_s30 + $0x248] sm:$0xff] }
  0xdb   : > { %3254 = vmatpush1.bf16.msra.mxu0 %v5320_v43  ;;  %7415 = vst [vmem:[#allocation40_spill] sm:$0xff] %v5346_v28  ;;  %7418 = vst [vmem:[#allocation43_spill] sm:$0xff] %v5364_v3  ;;  %v729_v43 = vld [vmem:[%s5023_s8 + $0x220] sm:$0xff] }
  0xdc   : > { %3510 = vmatpush1.bf16.msra.mxu1 %v5324_v46  ;;  %3256 = vmatprep.subr.bf16.mxu0 %v5326_v47  ;;  %v476_v46 = vld [vmem:[%s5016_s30 + $0x238] sm:$0xff]  ;;  %v730_v47 = vld [vmem:[%s5023_s8 + $0x228] sm:$0xff]  ;;  %7417 = vst [vmem:[#allocation42_spill] sm:$0xff] %v5360_v48 }
  0xdd   : > { %3512 = vmatprep.subr.bf16.mxu1 %v5332_v11  ;;  %v5366_v41 = vpack.c.bf16 %v476_v46, %v474_v55  ;;  %v475_v11 = vld [vmem:[%s5016_s30 + $0x230] sm:$0xff]  ;;  %v736_v46 = vld [vmem:[%s5023_s8 + $0x258] sm:$0xff]  ;;  %v5386_v55 = vpack.c.bf16 %v480_v62, %v478_v38  ;;  %v318_v38 = vld [vmem:[#allocation2 + $0x48] sm:$0xff] }
  0xde   : > { %v5380_v12 = vpack.c.bf16 %v475_v11, %v473_v14  ;;  %v735_v11 = vld [vmem:[%s5023_s8 + $0x250] sm:$0xff]  ;;  %v484_v14 = vld [vmem:[%s5016_s30 + $0x278] sm:$0xff] }
  0xdf   : > { %3258 = vmatpush1.bf16.msra.mxu0 %v5340_v23  ;;  %7419 = vst [vmem:[#allocation44_spill] sm:$0xff] %v5366_v41  ;;  %v5372_v23 = vpack.c.bf16 %v732_v21, %v730_v47  ;;  %v5384_v47 = vpack.c.bf16 %v731_v29, %v729_v43  ;;  %7423 = vst [vmem:[#allocation48_spill] sm:$0xff] %v5386_v55  ;;  %v477_v21 = vld [vmem:[%s5016_s30 + $0x240] sm:$0xff]  ;;  %v740_v43 = vld [vmem:[%s5023_s8 + $0x278] sm:$0xff] }
  0xe0   : > { %3514 = vmatpush1.bf16.msra.mxu1 %v5344_v25  ;;  %3260 = vmatprep.subr.bf16.mxu0 %v5346_v28  ;;  %7421 = vst [vmem:[#allocation46_spill] sm:$0xff] %v5380_v12  ;;  %v733_v28 = vld [vmem:[%s5023_s8 + $0x240] sm:$0xff]  ;;  %v739_v25 = vld [vmem:[%s5023_s8 + $0x270] sm:$0xff] }
  0xe1   : > { %3516 = vmatprep.subr.bf16.mxu1 %v5352_v56  ;;  %7420 = vst [vmem:[#allocation45_spill] sm:$0xff] %v5372_v23  ;;  %7422 = vst [vmem:[#allocation47_spill] sm:$0xff] %v5384_v47  ;;  %v479_v56 = vld [vmem:[%s5016_s30 + $0x250] sm:$0xff]  ;;  %v481_v29 = vld [vmem:[%s5016_s30 + $0x260] sm:$0xff] }
  0xe2   : > { %982 = vmatmul.mubr.f32.vlgmr.msra.gmra.mrb[0].mxu0 %v309_v60  ;;  %v5400_v62 = vpack.c.bf16 %v479_v56, %v477_v21  ;;  %v486_v21 = vld [vmem:[%s5016_s30 + $0x288] sm:$0xff] }
  0xe3   : > { %3262 = vmatpush1.bf16.msra.mxu0 %v5360_v48  ;;  %1386 = vmatmul.mubr.f32.vlgmr.msra.gmra.mrb[0].mxu1 %v309_v60  ;;  %v5392_v48 = vpack.c.bf16 %v736_v46, %v734_v2  ;;  %v482_v60 = vld [vmem:[%s5016_s30 + $0x268] sm:$0xff]  ;;  %v5405_v2 = vpack.c.bf16 %v735_v11, %v733_v28  ;;  %v485_v11 = vld [vmem:[%s5016_s30 + $0x280] sm:$0xff] }
  0xe4   : > { %3518 = vmatpush1.bf16.msra.mxu1 %v5364_v3  ;;  %3264 = vmatprep.subr.bf16.mxu0 %v5366_v41  ;;  %v738_v3 = vld [vmem:[%s5023_s8 + $0x268] sm:$0xff]  ;;  %7425 = vst [vmem:[#allocation50_spill] sm:$0xff] %v5400_v62  ;;  %v5407_v46 = vpack.c.bf16 %v484_v14, %v482_v60  ;;  %v737_v41 = vld [vmem:[%s5023_s8 + $0x260] sm:$0xff] }
  0xe5   : > { %3520 = vmatprep.subr.bf16.mxu1 %v5372_v23  ;;  %7424 = vst [vmem:[#allocation49_spill] sm:$0xff] %v5392_v48  ;;  %7426 = vst [vmem:[#allocation51_spill] sm:$0xff] %v5405_v2  ;;  %v483_v23 = vld [vmem:[%s5016_s30 + $0x270] sm:$0xff]  ;;  %v5413_v56 = vpack.c.bf16 %v740_v43, %v738_v3  ;;  %987 = vmatprep.mubr.f32.mxu0 %v318_v38  ;;  %v326_v3 = vld [vmem:[#allocation2 + $0x88] sm:$0xff]  ;;  %v5425_v60 = vpack.c.bf16 %v739_v25, %v737_v41 }
  0xe6   : > { %7427 = vst [vmem:[#allocation52_spill] sm:$0xff] %v5407_v46  ;;  %1391 = vmatprep.mubr.f32.mxu1 %v318_v38  ;;  %v5420_v28 = vpack.c.bf16 %v483_v23, %v481_v29  ;;  %v487_v43 = vld [vmem:[%s5016_s30 + $0x290] sm:$0xff]  ;;  %v741_v38 = vld [vmem:[%s5023_s8 + $0x280] sm:$0xff]  ;;  %v334_v25 = vld [vmem:[#allocation2 + $0xc8] sm:$0xff] }
  0xe7   : > { %3266 = vmatpush1.bf16.msra.mxu0 %v5380_v12  ;;  %7428 = vst [vmem:[#allocation53_spill] sm:$0xff] %v5413_v56  ;;  %v488_v12 = vld [vmem:[%s5016_s30 + $0x298] sm:$0xff]  ;;  %v743_v29 = vld [vmem:[%s5023_s8 + $0x290] sm:$0xff]  ;;  %v5440_v41 = vpack.c.bf16 %v487_v43, %v485_v11  ;;  %v494_v43 = vld [vmem:[%s5016_s30 + $0x2c8] sm:$0xff] }
  0xe8   : > { %3522 = vmatpush1.bf16.msra.mxu1 %v5384_v47  ;;  %3268 = vmatprep.subr.bf16.mxu0 %v5386_v55  ;;  %v317_v47 = vld [vmem:[#allocation2 + $0x40] sm:$0xff]  ;;  %v744_v55 = vld [vmem:[%s5023_s8 + $0x298] sm:$0xff]  ;;  %7429 = vst [vmem:[#allocation54_spill] sm:$0xff] %v5420_v28  ;;  %v5427_v14 = vpack.c.bf16 %v488_v12, %v486_v21  ;;  %v5445_v12 = vpack.c.bf16 %v743_v29, %v741_v38  ;;  %v491_v21 = vld [vmem:[%s5016_s30 + $0x2b0] sm:$0xff] }
  0xe9   : > { %3524 = vmatprep.subr.bf16.mxu1 %v5392_v48  ;;  %988 = vmatmul.mubr.f32.gmra.mrb[2].mxu0 %v317_v47  ;;  %v5432_v23 = vpack.c.bf16 %v744_v55, %v742_v61  ;;  %v492_v48 = vld [vmem:[%s5016_s30 + $0x2b8] sm:$0xff]  ;;  %7432 = vst [vmem:[#allocation57_spill] sm:$0xff] %v5440_v41  ;;  %v489_v61 = vld [vmem:[%s5016_s30 + $0x2a0] sm:$0xff]  ;;  %v747_v11 = vld [vmem:[%s5023_s8 + $0x2b0] sm:$0xff]  ;;  %v5466_v29 = vpack.c.bf16 %v496_v58, %v494_v43 }
  0xea   : > { %1392 = vmatmul.mubr.f32.gmra.mrb[2].mxu1 %v317_v47  ;;  %7430 = vst [vmem:[#allocation55_spill] sm:$0xff] %v5427_v14  ;;  %v490_v47 = vld [vmem:[%s5016_s30 + $0x2a8] sm:$0xff]  ;;  %993 = vmatprep.mubr.f32.mxu0 %v326_v3  ;;  %7433 = vst [vmem:[#allocation58_spill] sm:$0xff] %v5445_v12  ;;  %v5460_v38 = vpack.c.bf16 %v491_v21, %v489_v61  ;;  %v751_v61 = vld [vmem:[%s5023_s8 + $0x2d0] sm:$0xff] }
  0xeb   : > { %3270 = vmatpush1.bf16.msra.mxu0 %v5400_v62  ;;  %v325_v62 = vld [vmem:[#allocation2 + $0x80] sm:$0xff]  ;;  %7431 = vst [vmem:[#allocation56_spill] sm:$0xff] %v5432_v23  ;;  %1397 = vmatprep.mubr.f32.mxu1 %v326_v3  ;;  %v5447_v55 = vpack.c.bf16 %v492_v48, %v490_v47  ;;  %v342_v48 = vld [vmem:[#allocation2 + $0x108] sm:$0xff]  ;;  %7438 = vst [vmem:[#allocation63_spill] sm:$0xff] %v5466_v29 }
  0xec   : > { %3526 = vmatpush1.bf16.msra.mxu1 %v5405_v2  ;;  %3272 = vmatprep.subr.bf16.mxu0 %v5407_v46  ;;  %v746_v2 = vld [vmem:[%s5023_s8 + $0x2a8] sm:$0xff]  ;;  %v748_v46 = vld [vmem:[%s5023_s8 + $0x2b8] sm:$0xff]  ;;  %v745_v3 = vld [vmem:[%s5023_s8 + $0x2a0] sm:$0xff]  ;;  %7436 = vst [vmem:[#allocation61_spill] sm:$0xff] %v5460_v38 }
  0xed   : > { %3528 = vmatprep.subr.bf16.mxu1 %v5413_v56  ;;  %994 = vmatmul.mubr.f32.gmra.mrb[4].mxu0 %v325_v62  ;;  %7434 = vst [vmem:[#allocation59_spill] sm:$0xff] %v5447_v55  ;;  %v333_v56 = vld [vmem:[#allocation2 + $0xc0] sm:$0xff]  ;;  %v498_v21 = vld [vmem:[%s5016_s30 + $0x2e8] sm:$0xff] }
  0xee   : > { %1398 = vmatmul.mubr.f32.gmra.mrb[4].mxu1 %v325_v62  ;;  %999 = vmatprep.mubr.f32.mxu0 %v334_v25  ;;  %v750_v62 = vld [vmem:[%s5023_s8 + $0x2c8] sm:$0xff]  ;;  %v493_v47 = vld [vmem:[%s5016_s30 + $0x2c0] sm:$0xff] }
  0xef   : > { %3274 = vmatpush1.bf16.msra.mxu0 %v5420_v28  ;;  %v5452_v28 = vpack.c.bf16 %v748_v46, %v746_v2  ;;  %1403 = vmatprep.mubr.f32.mxu1 %v334_v25  ;;  %v341_v2 = vld [vmem:[#allocation2 + $0x100] sm:$0xff]  ;;  %v5464_v46 = vpack.c.bf16 %v747_v11, %v745_v3  ;;  %v495_v25 = vld [vmem:[%s5016_s30 + $0x2d0] sm:$0xff]  ;;  %v350_v58 = vld [vmem:[#allocation2 + $0x148] sm:$0xff] }
  0xf0   : > { %3530 = vmatpush1.bf16.msra.mxu1 %v5425_v60  ;;  %3276 = vmatprep.subr.bf16.mxu0 %v5427_v14  ;;  %v752_v14 = vld [vmem:[%s5023_s8 + $0x2d8] sm:$0xff]  ;;  %v5480_v3 = vpack.c.bf16 %v495_v25, %v493_v47  ;;  %v755_v47 = vld [vmem:[%s5023_s8 + $0x2f0] sm:$0xff] }
  0xf1   : > { %3532 = vmatprep.subr.bf16.mxu1 %v5432_v23  ;;  %7435 = vst [vmem:[#allocation60_spill] sm:$0xff] %v5452_v28  ;;  %1000 = vmatmul.mubr.f32.gmra.mrb[6].mxu0 %v333_v56  ;;  %7437 = vst [vmem:[#allocation62_spill] sm:$0xff] %v5464_v46  ;;  %v749_v23 = vld [vmem:[%s5023_s8 + $0x2c0] sm:$0xff]  ;;  %v504_v25 = vld [vmem:[%s5016_s30 + $0x318] sm:$0xff] }
  0xf2   : > { %1404 = vmatmul.mubr.f32.gmra.mrb[6].mxu1 %v333_v56  ;;  %v500_v56 = vld [vmem:[%s5016_s30 + $0x2f8] sm:$0xff]  ;;  %1005 = vmatprep.mubr.f32.mxu0 %v342_v48  ;;  %7440 = vst [vmem:[#allocation65_spill] sm:$0xff] %v5480_v3  ;;  %v5484_v11 = vpack.c.bf16 %v751_v61, %v749_v23 }
  0xf3   : > { %3278 = vmatpush1.bf16.msra.mxu0 %v5440_v41  ;;  %v5472_v41 = vpack.c.bf16 %v752_v14, %v750_v62  ;;  %1409 = vmatprep.mubr.f32.mxu1 %v342_v48  ;;  %v349_v14 = vld [vmem:[#allocation2 + $0x140] sm:$0xff]  ;;  %v5486_v43 = vpack.c.bf16 %v500_v56, %v498_v21  ;;  %v499_v48 = vld [vmem:[%s5016_s30 + $0x2f0] sm:$0xff]  ;;  %v312_v23 = vld [vmem:[#allocation2 + $0x18] sm:$0xff] }
  0xf4   : > { %3534 = vmatpush1.bf16.msra.mxu1 %v5445_v12  ;;  %3280 = vmatprep.subr.bf16.mxu0 %v5447_v55  ;;  %v754_v12 = vld [vmem:[%s5023_s8 + $0x2e8] sm:$0xff]  ;;  %v756_v55 = vld [vmem:[%s5023_s8 + $0x2f8] sm:$0xff]  ;;  %7441 = vst [vmem:[#allocation66_spill] sm:$0xff] %v5484_v11  ;;  %v497_v62 = vld [vmem:[%s5016_s30 + $0x2e0] sm:$0xff] }
  0xf5   : > { %3536 = vmatprep.subr.bf16.mxu1 %v5452_v28  ;;  %7439 = vst [vmem:[#allocation64_spill] sm:$0xff] %v5472_v41  ;;  %1006 = vmatmul.mubr.f32.gmra.mrb[8].mxu0 %v341_v2  ;;  %7442 = vst [vmem:[#allocation67_spill] sm:$0xff] %v5486_v43  ;;  %v753_v28 = vld [vmem:[%s5023_s8 + $0x2e0] sm:$0xff]  ;;  %v503_v56 = vld [vmem:[%s5016_s30 + $0x310] sm:$0xff] }
  0xf6   : > { %1410 = vmatmul.mubr.f32.gmra.mrb[8].mxu1 %v341_v2  ;;  %v502_v2 = vld [vmem:[%s5016_s30 + $0x308] sm:$0xff]  ;;  %1011 = vmatprep.mubr.f32.mxu0 %v350_v58  ;;  %v501_v21 = vld [vmem:[%s5016_s30 + $0x300] sm:$0xff] }
  0xf7   : > { %3282 = vmatpush1.bf16.msra.mxu0 %v5460_v38  ;;  %v5492_v38 = vpack.c.bf16 %v756_v55, %v754_v12  ;;  %1415 = vmatprep.mubr.f32.mxu1 %v350_v58  ;;  %v5500_v12 = vpack.c.bf16 %v499_v48, %v497_v62  ;;  %v5504_v55 = vpack.c.bf16 %v755_v47, %v753_v28  ;;  %v757_v58 = vld [vmem:[%s5023_s8 + $0x300] sm:$0xff]  ;;  %v759_v62 = vld [vmem:[%s5023_s8 + $0x310] sm:$0xff]  ;;  %v508_v48 = vld [vmem:[%s5016_s30 + $0x338] sm:$0xff] }
  0xf8   : > { %3538 = vmatpush1.bf16.msra.mxu1 %v5464_v46  ;;  %3284 = vmatprep.subr.bf16.mxu0 %v5466_v29  ;;  %v758_v46 = vld [vmem:[%s5023_s8 + $0x308] sm:$0xff]  ;;  %v760_v29 = vld [vmem:[%s5023_s8 + $0x318] sm:$0xff]  ;;  %v5506_v61 = vpack.c.bf16 %v504_v25, %v502_v2  ;;  %v5520_v2 = vpack.c.bf16 %v503_v56, %v501_v21  ;;  %v505_v25 = vld [vmem:[%s5016_s30 + $0x320] sm:$0xff] }
  0xf9   : > { %3540 = vmatprep.subr.bf16.mxu1 %v5472_v41  ;;  %7443 = vst [vmem:[#allocation68_spill] sm:$0xff] %v5492_v38  ;;  %1012 = vmatmul.mubr.f32.gmra.mrb[10].mxu0 %v349_v14  ;;  %7444 = vst [vmem:[#allocation69_spill] sm:$0xff] %v5500_v12  ;;  %v762_v28 = vld [vmem:[%s5023_s8 + $0x328] sm:$0xff]  ;;  %v764_v47 = vld [vmem:[%s5023_s8 + $0x338] sm:$0xff] }
  0xfa   : > { %1416 = vmatmul.mubr.f32.gmra.mrb[10].mxu1 %v349_v14  ;;  %7445 = vst [vmem:[#allocation70_spill] sm:$0xff] %v5504_v55  ;;  %7446 = vst [vmem:[#allocation71_spill] sm:$0xff] %v5506_v61  ;;  %v506_v14 = vld [vmem:[%s5016_s30 + $0x328] sm:$0xff]  ;;  %1082 = vmatprep.mubr.f32.mxu0 %v312_v23  ;;  %v763_v21 = vld [vmem:[%s5023_s8 + $0x330] sm:$0xff] }
  0xfb   : > { %3286 = vmatpush1.bf16.msra.mxu0 %v5480_v3  ;;  %v5512_v3 = vpack.c.bf16 %v760_v29, %v758_v46  ;;  %1486 = vmatprep.mubr.f32.mxu1 %v312_v23  ;;  %7448 = vst [vmem:[#allocation73_spill] sm:$0xff] %v5520_v2  ;;  %v5524_v46 = vpack.c.bf16 %v759_v62, %v757_v58  ;;  %v510_v56 = vld [vmem:[%s5016_s30 + $0x348] sm:$0xff]  ;;  %v768_v62 = vld [vmem:[%s5023_s8 + $0x358] sm:$0xff]  ;;  %v797_v41 = vld [vmem:[%s5023_s8 + $0x440] sm:$0xff] }
  0xfc   : > { %3542 = vmatpush1.bf16.msra.mxu1 %v5484_v11  ;;  %3288 = vmatprep.subr.bf16.mxu0 %v5486_v43  ;;  %v5526_v29 = vpack.c.bf16 %v508_v48, %v506_v14  ;;  %v761_v43 = vld [vmem:[%s5023_s8 + $0x320] sm:$0xff]  ;;  %v5532_v23 = vpack.c.bf16 %v764_v47, %v762_v28  ;;  %v766_v58 = vld [vmem:[%s5023_s8 + $0x348] sm:$0xff] }
  0xfd   : > { %3544 = vmatprep.subr.bf16.mxu1 %v5492_v38  ;;  %7447 = vst [vmem:[#allocation72_spill] sm:$0xff] %v5512_v3  ;;  %7449 = vst [vmem:[#allocation74_spill] sm:$0xff] %v5524_v46  ;;  %v507_v38 = vld [vmem:[%s5016_s30 + $0x330] sm:$0xff]  ;;  %v5544_v48 = vpack.c.bf16 %v763_v21, %v761_v43  ;;  %v509_v47 = vld [vmem:[%s5016_s30 + $0x340] sm:$0xff] }
  0xfe   : > { %7450 = vst [vmem:[#allocation75_spill] sm:$0xff] %v5526_v29  ;;  %7451 = vst [vmem:[#allocation76_spill] sm:$0xff] %v5532_v23  ;;  %v5540_v14 = vpack.c.bf16 %v507_v38, %v505_v25  ;;  %v767_v38 = vld [vmem:[%s5023_s8 + $0x350] sm:$0xff]  ;;  %v514_v25 = vld [vmem:[%s5016_s30 + $0x368] sm:$0xff] }
  0xff   : > { %3290 = vmatpush1.bf16.msra.mxu0 %v5500_v12  ;;  %7453 = vst [vmem:[#allocation78_spill] sm:$0xff] %v5544_v48  ;;  %v5552_v12 = vpack.c.bf16 %v768_v62, %v766_v58  ;;  %v770_v43 = vld [vmem:[%s5023_s8 + $0x368] sm:$0xff]  ;;  %v513_v62 = vld [vmem:[%s5016_s30 + $0x360] sm:$0xff] }
 0x100   : > { %3546 = vmatpush1.bf16.msra.mxu1 %v5504_v55  ;;  %3292 = vmatprep.subr.bf16.mxu0 %v5506_v61  ;;  %v512_v55 = vld [vmem:[%s5016_s30 + $0x358] sm:$0xff]  ;;  %7452 = vst [vmem:[#allocation77_spill] sm:$0xff] %v5540_v14  ;;  %v765_v61 = vld [vmem:[%s5023_s8 + $0x340] sm:$0xff] }
 0x101   : > { %3548 = vmatprep.subr.bf16.mxu1 %v5512_v3  ;;  %v5546_v28 = vpack.c.bf16 %v512_v55, %v510_v56  ;;  %v511_v3 = vld [vmem:[%s5016_s30 + $0x350] sm:$0xff]  ;;  %7455 = vst [vmem:[#allocation80_spill] sm:$0xff] %v5552_v12  ;;  %v772_v55 = vld [vmem:[%s5023_s8 + $0x378] sm:$0xff]  ;;  %v5564_v56 = vpack.c.bf16 %v767_v38, %v765_v61  ;;  %v774_v61 = vld [vmem:[%s5023_s8 + $0x388] sm:$0xff] }
 0x102   : > { %v5560_v21 = vpack.c.bf16 %v511_v3, %v509_v47  ;;  %v771_v3 = vld [vmem:[%s5023_s8 + $0x370] sm:$0xff]  ;;  %v518_v47 = vld [vmem:[%s5016_s30 + $0x388] sm:$0xff] }
 0x103   : > { %3294 = vmatpush1.bf16.msra.mxu0 %v5520_v2  ;;  %7454 = vst [vmem:[#allocation79_spill] sm:$0xff] %v5546_v28  ;;  %7457 = vst [vmem:[#allocation82_spill] sm:$0xff] %v5564_v56  ;;  %v5572_v2 = vpack.c.bf16 %v772_v55, %v770_v43  ;;  %v517_v55 = vld [vmem:[%s5016_s30 + $0x380] sm:$0xff] }
 0x104   : > { %3550 = vmatpush1.bf16.msra.mxu1 %v5524_v46  ;;  %3296 = vmatprep.subr.bf16.mxu0 %v5526_v29  ;;  %v516_v46 = vld [vmem:[%s5016_s30 + $0x378] sm:$0xff]  ;;  %7456 = vst [vmem:[#allocation81_spill] sm:$0xff] %v5560_v21  ;;  %v769_v29 = vld [vmem:[%s5023_s8 + $0x360] sm:$0xff] }
 0x105   : > { %3552 = vmatprep.subr.bf16.mxu1 %v5532_v23  ;;  %v5566_v58 = vpack.c.bf16 %v516_v46, %v514_v25  ;;  %v515_v23 = vld [vmem:[%s5016_s30 + $0x370] sm:$0xff]  ;;  %7459 = vst [vmem:[#allocation84_spill] sm:$0xff] %v5572_v2  ;;  %v776_v46 = vld [vmem:[%s5023_s8 + $0x398] sm:$0xff]  ;;  %v5584_v25 = vpack.c.bf16 %v771_v3, %v769_v29  ;;  %v778_v29 = vld [vmem:[%s5023_s8 + $0x3a8] sm:$0xff] }
 0x106   : > { %v5580_v38 = vpack.c.bf16 %v515_v23, %v513_v62  ;;  %v775_v23 = vld [vmem:[%s5023_s8 + $0x390] sm:$0xff]  ;;  %v522_v62 = vld [vmem:[%s5016_s30 + $0x3a8] sm:$0xff] }
 0x107   : > { %3298 = vmatpush1.bf16.msra.mxu0 %v5540_v14  ;;  %7458 = vst [vmem:[#allocation83_spill] sm:$0xff] %v5566_v58  ;;  %7461 = vst [vmem:[#allocation86_spill] sm:$0xff] %v5584_v25  ;;  %v5592_v14 = vpack.c.bf16 %v776_v46, %v774_v61  ;;  %v521_v46 = vld [vmem:[%s5016_s30 + $0x3a0] sm:$0xff] }
 0x108   : > { %3554 = vmatpush1.bf16.msra.mxu1 %v5544_v48  ;;  %3300 = vmatprep.subr.bf16.mxu0 %v5546_v28  ;;  %v520_v48 = vld [vmem:[%s5016_s30 + $0x398] sm:$0xff]  ;;  %7460 = vst [vmem:[#allocation85_spill] sm:$0xff] %v5580_v38  ;;  %v773_v28 = vld [vmem:[%s5023_s8 + $0x380] sm:$0xff] }
 0x109   : > { %3556 = vmatprep.subr.bf16.mxu1 %v5552_v12  ;;  %v5586_v43 = vpack.c.bf16 %v520_v48, %v518_v47  ;;  %v519_v12 = vld [vmem:[%s5016_s30 + $0x390] sm:$0xff]  ;;  %7463 = vst [vmem:[#allocation88_spill] sm:$0xff] %v5592_v14  ;;  %v780_v48 = vld [vmem:[%s5023_s8 + $0x3b8] sm:$0xff]  ;;  %v5604_v47 = vpack.c.bf16 %v775_v23, %v773_v28  ;;  %v782_v28 = vld [vmem:[%s5023_s8 + $0x3c8] sm:$0xff] }
 0x10a   : > { %v5600_v3 = vpack.c.bf16 %v519_v12, %v517_v55  ;;  %v779_v12 = vld [vmem:[%s5023_s8 + $0x3b0] sm:$0xff]  ;;  %v526_v55 = vld [vmem:[%s5016_s30 + $0x3c8] sm:$0xff] }
 0x10b   : > { %3302 = vmatpush1.bf16.msra.mxu0 %v5560_v21  ;;  %7462 = vst [vmem:[#allocation87_spill] sm:$0xff] %v5586_v43  ;;  %7465 = vst [vmem:[#allocation90_spill] sm:$0xff] %v5604_v47  ;;  %v5612_v21 = vpack.c.bf16 %v780_v48, %v778_v29  ;;  %v525_v48 = vld [vmem:[%s5016_s30 + $0x3c0] sm:$0xff] }
 0x10c   : > { %3558 = vmatpush1.bf16.msra.mxu1 %v5564_v56  ;;  %3304 = vmatprep.subr.bf16.mxu0 %v5566_v58  ;;  %v524_v56 = vld [vmem:[%s5016_s30 + $0x3b8] sm:$0xff]  ;;  %7464 = vst [vmem:[#allocation89_spill] sm:$0xff] %v5600_v3  ;;  %v777_v58 = vld [vmem:[%s5023_s8 + $0x3a0] sm:$0xff] }
 0x10d   : > { %3560 = vmatprep.subr.bf16.mxu1 %v5572_v2  ;;  %v5606_v61 = vpack.c.bf16 %v524_v56, %v522_v62  ;;  %v523_v2 = vld [vmem:[%s5016_s30 + $0x3b0] sm:$0xff]  ;;  %7467 = vst [vmem:[#allocation92_spill] sm:$0xff] %v5612_v21  ;;  %v784_v56 = vld [vmem:[%s5023_s8 + $0x3d8] sm:$0xff]  ;;  %v5624_v62 = vpack.c.bf16 %v779_v12, %v777_v58  ;;  %v786_v58 = vld [vmem:[%s5023_s8 + $0x3e8] sm:$0xff] }
 0x10e   : > { %v5620_v23 = vpack.c.bf16 %v523_v2, %v521_v46  ;;  %v783_v2 = vld [vmem:[%s5023_s8 + $0x3d0] sm:$0xff]  ;;  %v530_v46 = vld [vmem:[%s5016_s30 + $0x3e8] sm:$0xff] }
 0x10f   : > { %3306 = vmatpush1.bf16.msra.mxu0 %v5580_v38  ;;  %7466 = vst [vmem:[#allocation91_spill] sm:$0xff] %v5606_v61  ;;  %7469 = vst [vmem:[#allocation94_spill] sm:$0xff] %v5624_v62  ;;  %v5632_v38 = vpack.c.bf16 %v784_v56, %v782_v28  ;;  %v529_v56 = vld [vmem:[%s5016_s30 + $0x3e0] sm:$0xff] }
 0x110   : > { %3562 = vmatpush1.bf16.msra.mxu1 %v5584_v25  ;;  %3308 = vmatprep.subr.bf16.mxu0 %v5586_v43  ;;  %v528_v25 = vld [vmem:[%s5016_s30 + $0x3d8] sm:$0xff]  ;;  %7468 = vst [vmem:[#allocation93_spill] sm:$0xff] %v5620_v23  ;;  %v781_v43 = vld [vmem:[%s5023_s8 + $0x3c0] sm:$0xff] }
 0x111   : > { %3564 = vmatprep.subr.bf16.mxu1 %v5592_v14  ;;  %v5626_v29 = vpack.c.bf16 %v528_v25, %v526_v55  ;;  %v527_v14 = vld [vmem:[%s5016_s30 + $0x3d0] sm:$0xff]  ;;  %7471 = vst [vmem:[#allocation96_spill] sm:$0xff] %v5632_v38  ;;  %v788_v25 = vld [vmem:[%s5023_s8 + $0x3f8] sm:$0xff]  ;;  %v5644_v55 = vpack.c.bf16 %v783_v2, %v781_v43  ;;  %v790_v43 = vld [vmem:[%s5023_s8 + $0x408] sm:$0xff] }
 0x112   : > { %v5640_v12 = vpack.c.bf16 %v527_v14, %v525_v48  ;;  %v787_v14 = vld [vmem:[%s5023_s8 + $0x3f0] sm:$0xff]  ;;  %v534_v48 = vld [vmem:[%s5016_s30 + $0x408] sm:$0xff] }
 0x113   : > { %3310 = vmatpush1.bf16.msra.mxu0 %v5600_v3  ;;  %7470 = vst [vmem:[#allocation95_spill] sm:$0xff] %v5626_v29  ;;  %7473 = vst [vmem:[#allocation98_spill] sm:$0xff] %v5644_v55  ;;  %v5652_v3 = vpack.c.bf16 %v788_v25, %v786_v58  ;;  %v533_v25 = vld [vmem:[%s5016_s30 + $0x400] sm:$0xff] }
 0x114   : > { %3566 = vmatpush1.bf16.msra.mxu1 %v5604_v47  ;;  %3312 = vmatprep.subr.bf16.mxu0 %v5606_v61  ;;  %v532_v47 = vld [vmem:[%s5016_s30 + $0x3f8] sm:$0xff]  ;;  %7472 = vst [vmem:[#allocation97_spill] sm:$0xff] %v5640_v12  ;;  %v785_v61 = vld [vmem:[%s5023_s8 + $0x3e0] sm:$0xff] }
 0x115   : > { %3568 = vmatprep.subr.bf16.mxu1 %v5612_v21  ;;  %v5646_v28 = vpack.c.bf16 %v532_v47, %v530_v46  ;;  %v531_v21 = vld [vmem:[%s5016_s30 + $0x3f0] sm:$0xff]  ;;  %7475 = vst [vmem:[#allocation100_spill] sm:$0xff] %v5652_v3  ;;  %v792_v47 = vld [vmem:[%s5023_s8 + $0x418] sm:$0xff]  ;;  %v5664_v46 = vpack.c.bf16 %v787_v14, %v785_v61 }
 0x116   : > { %v5660_v2 = vpack.c.bf16 %v531_v21, %v529_v56  ;;  %v791_v21 = vld [vmem:[%s5023_s8 + $0x410] sm:$0xff]  ;;  %v538_v56 = vld [vmem:[%s5016_s30 + $0x428] sm:$0xff]  ;;  %v796_v61 = vld [vmem:[%s5023_s8 + $0x438] sm:$0xff] }
 0x117   : > { %3314 = vmatpush1.bf16.msra.mxu0 %v5620_v23  ;;  %7474 = vst [vmem:[#allocation99_spill] sm:$0xff] %v5646_v28  ;;  %7477 = vst [vmem:[#allocation102_spill] sm:$0xff] %v5664_v46  ;;  %v5672_v23 = vpack.c.bf16 %v792_v47, %v790_v43  ;;  %v537_v47 = vld [vmem:[%s5016_s30 + $0x420] sm:$0xff] }
 0x118   : > { %3570 = vmatpush1.bf16.msra.mxu1 %v5624_v62  ;;  %3316 = vmatprep.subr.bf16.mxu0 %v5626_v29  ;;  %v536_v62 = vld [vmem:[%s5016_s30 + $0x418] sm:$0xff]  ;;  %7476 = vst [vmem:[#allocation101_spill] sm:$0xff] %v5660_v2  ;;  %v789_v29 = vld [vmem:[%s5023_s8 + $0x400] sm:$0xff] }
 0x119   : > { %3572 = vmatprep.subr.bf16.mxu1 %v5632_v38  ;;  %v5666_v58 = vpack.c.bf16 %v536_v62, %v534_v48  ;;  %v535_v38 = vld [vmem:[%s5016_s30 + $0x410] sm:$0xff]  ;;  %7479 = vst [vmem:[#allocation104_spill] sm:$0xff] %v5672_v23  ;;  %v5684_v48 = vpack.c.bf16 %v791_v21, %v789_v29  ;;  %v800_v29 = vld [vmem:[%s5023_s8 + $0x458] sm:$0xff] }
 0x11a   : > { %v311_v62 = vld [vmem:[#allocation2 + $0x10] sm:$0xff]  ;;  %v5680_v14 = vpack.c.bf16 %v535_v38, %v533_v25  ;;  %v542_v38 = vld [vmem:[%s5016_s30 + $0x448] sm:$0xff]  ;;  %v544_v25 = vld [vmem:[%s5016_s30 + $0x458] sm:$0xff] }
 0x11b   : > { %3318 = vmatpush1.bf16.msra.mxu0 %v5640_v12  ;;  %7478 = vst [vmem:[#allocation103_spill] sm:$0xff] %v5666_v58  ;;  %7481 = vst [vmem:[#allocation106_spill] sm:$0xff] %v5684_v48  ;;  %v793_v12 = vld [vmem:[%s5023_s8 + $0x420] sm:$0xff] }
 0x11c   : > { %3574 = vmatpush1.bf16.msra.mxu1 %v5644_v55  ;;  %3320 = vmatprep.subr.bf16.mxu0 %v5646_v28  ;;  %v540_v55 = vld [vmem:[%s5016_s30 + $0x438] sm:$0xff]  ;;  %v794_v28 = vld [vmem:[%s5023_s8 + $0x428] sm:$0xff]  ;;  %7480 = vst [vmem:[#allocation105_spill] sm:$0xff] %v5680_v14 }
 0x11d   : > { %3576 = vmatprep.subr.bf16.mxu1 %v5652_v3  ;;  %v5686_v43 = vpack.c.bf16 %v540_v55, %v538_v56  ;;  %v539_v3 = vld [vmem:[%s5016_s30 + $0x430] sm:$0xff]  ;;  %v5692_v11 = vpack.c.bf16 %v796_v61, %v794_v28  ;;  %v320_v55 = vld [vmem:[#allocation2 + $0x58] sm:$0xff]  ;;  %v5706_v61 = vpack.c.bf16 %v544_v25, %v542_v38 }
 0x11e   : > { %v5700_v21 = vpack.c.bf16 %v539_v3, %v537_v47  ;;  %v319_v28 = vld [vmem:[#allocation2 + $0x50] sm:$0xff]  ;;  %v546_v3 = vld [vmem:[%s5016_s30 + $0x468] sm:$0xff]  ;;  %v548_v47 = vld [vmem:[%s5016_s30 + $0x478] sm:$0xff] }
 0x11f   : > { %3322 = vmatpush1.bf16.msra.mxu0 %v5660_v2  ;;  %7482 = vst [vmem:[#allocation107_spill] sm:$0xff] %v5686_v43  ;;  %7483 = vst [vmem:[#allocation108_spill] sm:$0xff] %v5692_v11  ;;  %v795_v2 = vld [vmem:[%s5023_s8 + $0x430] sm:$0xff]  ;;  %v5726_v25 = vpack.c.bf16 %v548_v47, %v546_v3  ;;  %v549_v47 = vld [vmem:[%s5016_s30 + $0x480] sm:$0xff] }
 0x120   : > { %3578 = vmatpush1.bf16.msra.mxu1 %v5664_v46  ;;  %3324 = vmatprep.subr.bf16.mxu0 %v5666_v58  ;;  %v798_v46 = vld [vmem:[%s5023_s8 + $0x448] sm:$0xff]  ;;  %7484 = vst [vmem:[#allocation109_spill] sm:$0xff] %v5700_v21  ;;  %v5704_v56 = vpack.c.bf16 %v795_v2, %v793_v12  ;;  %7486 = vst [vmem:[#allocation111_spill] sm:$0xff] %v5706_v61  ;;  %v543_v58 = vld [vmem:[%s5016_s30 + $0x450] sm:$0xff] }
 0x121   : > { %3580 = vmatprep.subr.bf16.mxu1 %v5672_v23  ;;  %v541_v23 = vld [vmem:[%s5016_s30 + $0x440] sm:$0xff]  ;;  %v328_v12 = vld [vmem:[#allocation2 + $0x98] sm:$0xff]  ;;  %7490 = vst [vmem:[#allocation115_spill] sm:$0xff] %v5726_v25 }
 0x122   : > { %1083 = vmatmul.mubr.f32.vlgmr.msra.gmra.mrb[0].mxu0 %v311_v62  ;;  %7485 = vst [vmem:[#allocation110_spill] sm:$0xff] %v5704_v56  ;;  %v5720_v2 = vpack.c.bf16 %v543_v58, %v541_v23  ;;  %v803_v23 = vld [vmem:[%s5023_s8 + $0x470] sm:$0xff]  ;;  %v550_v58 = vld [vmem:[%s5016_s30 + $0x488] sm:$0xff] }
 0x123   : > { %3326 = vmatpush1.bf16.msra.mxu0 %v5680_v14  ;;  %1487 = vmatmul.mubr.f32.vlgmr.msra.gmra.mrb[0].mxu1 %v311_v62  ;;  %v5712_v14 = vpack.c.bf16 %v800_v29, %v798_v46  ;;  %v799_v62 = vld [vmem:[%s5023_s8 + $0x450] sm:$0xff]  ;;  %v545_v29 = vld [vmem:[%s5016_s30 + $0x460] sm:$0xff] }
 0x124   : > { %3582 = vmatpush1.bf16.msra.mxu1 %v5684_v48  ;;  %3328 = vmatprep.subr.bf16.mxu0 %v5686_v43  ;;  %v802_v48 = vld [vmem:[%s5023_s8 + $0x468] sm:$0xff]  ;;  %v804_v43 = vld [vmem:[%s5023_s8 + $0x478] sm:$0xff]  ;;  %7488 = vst [vmem:[#allocation113_spill] sm:$0xff] %v5720_v2  ;;  %v327_v46 = vld [vmem:[#allocation2 + $0x90] sm:$0xff]  ;;  %v5724_v38 = vpack.c.bf16 %v799_v62, %v797_v41 }
 0x125   : > { %3584 = vmatprep.subr.bf16.mxu1 %v5692_v11  ;;  %7487 = vst [vmem:[#allocation112_spill] sm:$0xff] %v5712_v14  ;;  %1088 = vmatprep.mubr.f32.mxu0 %v320_v55  ;;  %v801_v11 = vld [vmem:[%s5023_s8 + $0x460] sm:$0xff]  ;;  %v336_v41 = vld [vmem:[#allocation2 + $0xd8] sm:$0xff] }
 0x126   : > { %1492 = vmatprep.mubr.f32.mxu1 %v320_v55  ;;  %1089 = vmatmul.mubr.f32.gmra.mrb[2].mxu0 %v319_v28  ;;  %7489 = vst [vmem:[#allocation114_spill] sm:$0xff] %v5724_v38  ;;  %v547_v55 = vld [vmem:[%s5016_s30 + $0x470] sm:$0xff] }
 0x127   : > { %3330 = vmatpush1.bf16.msra.mxu0 %v5700_v21  ;;  %1493 = vmatmul.mubr.f32.gmra.mrb[2].mxu1 %v319_v28  ;;  %v5732_v21 = vpack.c.bf16 %v804_v43, %v802_v48  ;;  %v552_v28 = vld [vmem:[%s5016_s30 + $0x498] sm:$0xff]  ;;  %v5740_v62 = vpack.c.bf16 %v547_v55, %v545_v29  ;;  %v335_v48 = vld [vmem:[#allocation2 + $0xd0] sm:$0xff]  ;;  %v5744_v43 = vpack.c.bf16 %v803_v23, %v801_v11  ;;  %v554_v55 = vld [vmem:[%s5016_s30 + $0x4a8] sm:$0xff] }
 0x128   : > { %3586 = vmatpush1.bf16.msra.mxu1 %v5704_v56  ;;  %3332 = vmatprep.subr.bf16.mxu0 %v5706_v61  ;;  %v806_v56 = vld [vmem:[%s5023_s8 + $0x488] sm:$0xff]  ;;  %v808_v61 = vld [vmem:[%s5023_s8 + $0x498] sm:$0xff]  ;;  %v5746_v3 = vpack.c.bf16 %v552_v28, %v550_v58  ;;  %v807_v29 = vld [vmem:[%s5023_s8 + $0x490] sm:$0xff] }
 0x129   : > { %3588 = vmatprep.subr.bf16.mxu1 %v5712_v14  ;;  %7491 = vst [vmem:[#allocation116_spill] sm:$0xff] %v5732_v21  ;;  %1094 = vmatprep.mubr.f32.mxu0 %v328_v12  ;;  %7492 = vst [vmem:[#allocation117_spill] sm:$0xff] %v5740_v62  ;;  %v805_v14 = vld [vmem:[%s5023_s8 + $0x480] sm:$0xff]  ;;  %v344_v11 = vld [vmem:[#allocation2 + $0x118] sm:$0xff] }
 0x12a   : > { %1498 = vmatprep.mubr.f32.mxu1 %v328_v12  ;;  %1095 = vmatmul.mubr.f32.gmra.mrb[4].mxu0 %v327_v46  ;;  %7493 = vst [vmem:[#allocation118_spill] sm:$0xff] %v5744_v43  ;;  %7494 = vst [vmem:[#allocation119_spill] sm:$0xff] %v5746_v3  ;;  %v551_v12 = vld [vmem:[%s5016_s30 + $0x490] sm:$0xff]  ;;  %v553_v28 = vld [vmem:[%s5016_s30 + $0x4a0] sm:$0xff] }
 0x12b   : > { %3334 = vmatpush1.bf16.msra.mxu0 %v5720_v2  ;;  %1499 = vmatmul.mubr.f32.gmra.mrb[4].mxu1 %v327_v46  ;;  %v5752_v2 = vpack.c.bf16 %v808_v61, %v806_v56  ;;  %v556_v46 = vld [vmem:[%s5016_s30 + $0x4b8] sm:$0xff]  ;;  %v5760_v23 = vpack.c.bf16 %v551_v12, %v549_v47  ;;  %v343_v56 = vld [vmem:[#allocation2 + $0x110] sm:$0xff]  ;;  %v5764_v61 = vpack.c.bf16 %v807_v29, %v805_v14  ;;  %v558_v12 = vld [vmem:[%s5016_s30 + $0x4c8] sm:$0xff] }
 0x12c   : > { %3590 = vmatpush1.bf16.msra.mxu1 %v5724_v38  ;;  %3336 = vmatprep.subr.bf16.mxu0 %v5726_v25  ;;  %v810_v38 = vld [vmem:[%s5023_s8 + $0x4a8] sm:$0xff]  ;;  %v812_v25 = vld [vmem:[%s5023_s8 + $0x4b8] sm:$0xff]  ;;  %v5766_v58 = vpack.c.bf16 %v556_v46, %v554_v55  ;;  %v811_v47 = vld [vmem:[%s5023_s8 + $0x4b0] sm:$0xff] }
 0x12d   : > { %3592 = vmatprep.subr.bf16.mxu1 %v5732_v21  ;;  %7495 = vst [vmem:[#allocation120_spill] sm:$0xff] %v5752_v2  ;;  %1100 = vmatprep.mubr.f32.mxu0 %v336_v41  ;;  %7496 = vst [vmem:[#allocation121_spill] sm:$0xff] %v5760_v23  ;;  %v809_v21 = vld [vmem:[%s5023_s8 + $0x4a0] sm:$0xff]  ;;  %v352_v14 = vld [vmem:[#allocation2 + $0x158] sm:$0xff] }
 0x12e   : > { %1504 = vmatprep.mubr.f32.mxu1 %v336_v41  ;;  %1101 = vmatmul.mubr.f32.gmra.mrb[6].mxu0 %v335_v48  ;;  %7497 = vst [vmem:[#allocation122_spill] sm:$0xff] %v5764_v61  ;;  %7498 = vst [vmem:[#allocation123_spill] sm:$0xff] %v5766_v58  ;;  %v555_v41 = vld [vmem:[%s5016_s30 + $0x4b0] sm:$0xff]  ;;  %v557_v46 = vld [vmem:[%s5016_s30 + $0x4c0] sm:$0xff] }
 0x12f   : > { %3338 = vmatpush1.bf16.msra.mxu0 %v5740_v62  ;;  %1505 = vmatmul.mubr.f32.gmra.mrb[6].mxu1 %v335_v48  ;;  %v5772_v62 = vpack.c.bf16 %v812_v25, %v810_v38  ;;  %v560_v48 = vld [vmem:[%s5016_s30 + $0x4d8] sm:$0xff]  ;;  %v5780_v29 = vpack.c.bf16 %v555_v41, %v553_v28  ;;  %v351_v38 = vld [vmem:[#allocation2 + $0x150] sm:$0xff]  ;;  %v5784_v25 = vpack.c.bf16 %v811_v47, %v809_v21  ;;  %v314_v21 = vld [vmem:[#allocation2 + $0x28] sm:$0xff] }
 0x130   : > { %3594 = vmatpush1.bf16.msra.mxu1 %v5744_v43  ;;  %3340 = vmatprep.subr.bf16.mxu0 %v5746_v3  ;;  %v814_v43 = vld [vmem:[%s5023_s8 + $0x4c8] sm:$0xff]  ;;  %v816_v3 = vld [vmem:[%s5023_s8 + $0x4d8] sm:$0xff]  ;;  %v5786_v55 = vpack.c.bf16 %v560_v48, %v558_v12  ;;  %v815_v28 = vld [vmem:[%s5023_s8 + $0x4d0] sm:$0xff] }
 0x131   : > { %3596 = vmatprep.subr.bf16.mxu1 %v5752_v2  ;;  %7499 = vst [vmem:[#allocation124_spill] sm:$0xff] %v5772_v62  ;;  %1106 = vmatprep.mubr.f32.mxu0 %v344_v11  ;;  %7500 = vst [vmem:[#allocation125_spill] sm:$0xff] %v5780_v29  ;;  %v813_v2 = vld [vmem:[%s5023_s8 + $0x4c0] sm:$0xff]  ;;  %v564_v41 = vld [vmem:[%s5016_s30 + $0x4f8] sm:$0xff] }
 0x132   : > { %1510 = vmatprep.mubr.f32.mxu1 %v344_v11  ;;  %1107 = vmatmul.mubr.f32.gmra.mrb[8].mxu0 %v343_v56  ;;  %7501 = vst [vmem:[#allocation126_spill] sm:$0xff] %v5784_v25  ;;  %7502 = vst [vmem:[#allocation127_spill] sm:$0xff] %v5786_v55  ;;  %v559_v11 = vld [vmem:[%s5016_s30 + $0x4d0] sm:$0xff]  ;;  %v561_v12 = vld [vmem:[%s5016_s30 + $0x4e0] sm:$0xff] }
 0x133   : > { %3342 = vmatpush1.bf16.msra.mxu0 %v5760_v23  ;;  %1511 = vmatmul.mubr.f32.gmra.mrb[8].mxu1 %v343_v56  ;;  %v5792_v23 = vpack.c.bf16 %v816_v3, %v814_v43  ;;  %v562_v56 = vld [vmem:[%s5016_s30 + $0x4e8] sm:$0xff]  ;;  %v5800_v43 = vpack.c.bf16 %v559_v11, %v557_v46  ;;  %v5804_v3 = vpack.c.bf16 %v815_v28, %v813_v2  ;;  %v563_v48 = vld [vmem:[%s5016_s30 + $0x4f0] sm:$0xff]  ;;  %v568_v11 = vld [vmem:[%s5016_s30 + $0x518] sm:$0xff] }
 0x134   : > { %3598 = vmatpush1.bf16.msra.mxu1 %v5764_v61  ;;  %3344 = vmatprep.subr.bf16.mxu0 %v5766_v58  ;;  %v818_v61 = vld [vmem:[%s5023_s8 + $0x4e8] sm:$0xff]  ;;  %v820_v58 = vld [vmem:[%s5023_s8 + $0x4f8] sm:$0xff]  ;;  %v5806_v47 = vpack.c.bf16 %v564_v41, %v562_v56  ;;  %v819_v46 = vld [vmem:[%s5023_s8 + $0x4f0] sm:$0xff]  ;;  %v5820_v56 = vpack.c.bf16 %v563_v48, %v561_v12 }
 0x135   : > { %3600 = vmatprep.subr.bf16.mxu1 %v5772_v62  ;;  %7503 = vst [vmem:[#allocation128_spill] sm:$0xff] %v5792_v23  ;;  %1112 = vmatprep.mubr.f32.mxu0 %v352_v14  ;;  %7504 = vst [vmem:[#allocation129_spill] sm:$0xff] %v5800_v43  ;;  %v822_v2 = vld [vmem:[%s5023_s8 + $0x508] sm:$0xff]  ;;  %v824_v28 = vld [vmem:[%s5023_s8 + $0x518] sm:$0xff] }
 0x136   : > { %1516 = vmatprep.mubr.f32.mxu1 %v352_v14  ;;  %1113 = vmatmul.mubr.f32.gmra.mrb[10].mxu0 %v351_v38  ;;  %7505 = vst [vmem:[#allocation130_spill] sm:$0xff] %v5804_v3  ;;  %7506 = vst [vmem:[#allocation131_spill] sm:$0xff] %v5806_v47  ;;  %v817_v14 = vld [vmem:[%s5023_s8 + $0x4e0] sm:$0xff]  ;;  %v823_v12 = vld [vmem:[%s5023_s8 + $0x510] sm:$0xff] }
 0x137   : > { %3346 = vmatpush1.bf16.msra.mxu0 %v5780_v29  ;;  %1517 = vmatmul.mubr.f32.gmra.mrb[10].mxu1 %v351_v38  ;;  %v5812_v29 = vpack.c.bf16 %v820_v58, %v818_v61  ;;  %v566_v38 = vld [vmem:[%s5016_s30 + $0x508] sm:$0xff]  ;;  %7508 = vst [vmem:[#allocation133_spill] sm:$0xff] %v5820_v56  ;;  %v5824_v61 = vpack.c.bf16 %v819_v46, %v817_v14  ;;  %v565_v41 = vld [vmem:[%s5016_s30 + $0x500] sm:$0xff]  ;;  %v828_v46 = vld [vmem:[%s5023_s8 + $0x538] sm:$0xff] }
 0x138   : > { %3602 = vmatpush1.bf16.msra.mxu1 %v5784_v25  ;;  %3348 = vmatprep.subr.bf16.mxu0 %v5786_v55  ;;  %v5826_v58 = vpack.c.bf16 %v568_v11, %v566_v38  ;;  %v821_v55 = vld [vmem:[%s5023_s8 + $0x500] sm:$0xff]  ;;  %v570_v48 = vld [vmem:[%s5016_s30 + $0x528] sm:$0xff] }
 0x139   : > { %3604 = vmatprep.subr.bf16.mxu1 %v5792_v23  ;;  %7507 = vst [vmem:[#allocation132_spill] sm:$0xff] %v5812_v29  ;;  %1183 = vmatprep.mubr.f32.mxu0 %v314_v21  ;;  %7509 = vst [vmem:[#allocation134_spill] sm:$0xff] %v5824_v61  ;;  %v567_v23 = vld [vmem:[%s5016_s30 + $0x510] sm:$0xff]  ;;  %v826_v14 = vld [vmem:[%s5023_s8 + $0x528] sm:$0xff]  ;;  %v5844_v11 = vpack.c.bf16 %v823_v12, %v821_v55 }
 0x13a   : > { %1587 = vmatprep.mubr.f32.mxu1 %v314_v21  ;;  %7510 = vst [vmem:[#allocation135_spill] sm:$0xff] %v5826_v58  ;;  %v5832_v21 = vpack.c.bf16 %v824_v28, %v822_v2  ;;  %v5840_v38 = vpack.c.bf16 %v567_v23, %v565_v41  ;;  %v569_v28 = vld [vmem:[%s5016_s30 + $0x520] sm:$0xff]  ;;  %v827_v23 = vld [vmem:[%s5023_s8 + $0x530] sm:$0xff]  ;;  %v574_v41 = vld [vmem:[%s5016_s30 + $0x548] sm:$0xff] }
 0x13b   : > { %3350 = vmatpush1.bf16.msra.mxu0 %v5800_v43  ;;  %7513 = vst [vmem:[#allocation138_spill] sm:$0xff] %v5844_v11  ;;  %v5852_v43 = vpack.c.bf16 %v828_v46, %v826_v14  ;;  %v830_v55 = vld [vmem:[%s5023_s8 + $0x548] sm:$0xff]  ;;  %v573_v46 = vld [vmem:[%s5016_s30 + $0x540] sm:$0xff] }
 0x13c   : > { %3606 = vmatpush1.bf16.msra.mxu1 %v5804_v3  ;;  %3352 = vmatprep.subr.bf16.mxu0 %v5806_v47  ;;  %7511 = vst [vmem:[#allocation136_spill] sm:$0xff] %v5832_v21  ;;  %v572_v3 = vld [vmem:[%s5016_s30 + $0x538] sm:$0xff]  ;;  %7512 = vst [vmem:[#allocation137_spill] sm:$0xff] %v5840_v38  ;;  %v825_v47 = vld [vmem:[%s5023_s8 + $0x520] sm:$0xff] }
 0x13d   : > { %3608 = vmatprep.subr.bf16.mxu1 %v5812_v29  ;;  %v5846_v2 = vpack.c.bf16 %v572_v3, %v570_v48  ;;  %v571_v29 = vld [vmem:[%s5016_s30 + $0x530] sm:$0xff]  ;;  %7515 = vst [vmem:[#allocation140_spill] sm:$0xff] %v5852_v43  ;;  %v832_v3 = vld [vmem:[%s5023_s8 + $0x558] sm:$0xff]  ;;  %v5864_v48 = vpack.c.bf16 %v827_v23, %v825_v47  ;;  %v834_v47 = vld [vmem:[%s5023_s8 + $0x568] sm:$0xff] }
 0x13e   : > { %v5860_v12 = vpack.c.bf16 %v571_v29, %v569_v28  ;;  %v831_v29 = vld [vmem:[%s5023_s8 + $0x550] sm:$0xff]  ;;  %v578_v28 = vld [vmem:[%s5016_s30 + $0x568] sm:$0xff]  ;;  %v861_v62 = vld [vmem:[%s5023_s8 + $0x640] sm:$0xff] }
 0x13f   : > { %3354 = vmatpush1.bf16.msra.mxu0 %v5820_v56  ;;  %7514 = vst [vmem:[#allocation139_spill] sm:$0xff] %v5846_v2  ;;  %7517 = vst [vmem:[#allocation142_spill] sm:$0xff] %v5864_v48  ;;  %v5872_v56 = vpack.c.bf16 %v832_v3, %v830_v55  ;;  %v577_v3 = vld [vmem:[%s5016_s30 + $0x560] sm:$0xff] }
 0x140   : > { %3610 = vmatpush1.bf16.msra.mxu1 %v5824_v61  ;;  %3356 = vmatprep.subr.bf16.mxu0 %v5826_v58  ;;  %v576_v61 = vld [vmem:[%s5016_s30 + $0x558] sm:$0xff]  ;;  %7516 = vst [vmem:[#allocation141_spill] sm:$0xff] %v5860_v12  ;;  %v829_v58 = vld [vmem:[%s5023_s8 + $0x540] sm:$0xff] }
 0x141   : > { %3612 = vmatprep.subr.bf16.mxu1 %v5832_v21  ;;  %v5866_v14 = vpack.c.bf16 %v576_v61, %v574_v41  ;;  %v575_v21 = vld [vmem:[%s5016_s30 + $0x550] sm:$0xff]  ;;  %7519 = vst [vmem:[#allocation144_spill] sm:$0xff] %v5872_v56  ;;  %v836_v61 = vld [vmem:[%s5023_s8 + $0x578] sm:$0xff]  ;;  %v5884_v41 = vpack.c.bf16 %v831_v29, %v829_v58  ;;  %v838_v58 = vld [vmem:[%s5023_s8 + $0x588] sm:$0xff] }
 0x142   : > { %v5880_v23 = vpack.c.bf16 %v575_v21, %v573_v46  ;;  %v835_v21 = vld [vmem:[%s5023_s8 + $0x570] sm:$0xff]  ;;  %v582_v46 = vld [vmem:[%s5016_s30 + $0x588] sm:$0xff] }
 0x143   : > { %3358 = vmatpush1.bf16.msra.mxu0 %v5840_v38  ;;  %7518 = vst [vmem:[#allocation143_spill] sm:$0xff] %v5866_v14  ;;  %7521 = vst [vmem:[#allocation146_spill] sm:$0xff] %v5884_v41  ;;  %v5892_v38 = vpack.c.bf16 %v836_v61, %v834_v47  ;;  %v581_v61 = vld [vmem:[%s5016_s30 + $0x580] sm:$0xff] }
 0x144   : > { %3614 = vmatpush1.bf16.msra.mxu1 %v5844_v11  ;;  %3360 = vmatprep.subr.bf16.mxu0 %v5846_v2  ;;  %v580_v11 = vld [vmem:[%s5016_s30 + $0x578] sm:$0xff]  ;;  %7520 = vst [vmem:[#allocation145_spill] sm:$0xff] %v5880_v23  ;;  %v833_v2 = vld [vmem:[%s5023_s8 + $0x560] sm:$0xff] }
 0x145   : > { %3616 = vmatprep.subr.bf16.mxu1 %v5852_v43  ;;  %v5886_v55 = vpack.c.bf16 %v580_v11, %v578_v28  ;;  %v579_v43 = vld [vmem:[%s5016_s30 + $0x570] sm:$0xff]  ;;  %7523 = vst [vmem:[#allocation148_spill] sm:$0xff] %v5892_v38  ;;  %v840_v11 = vld [vmem:[%s5023_s8 + $0x598] sm:$0xff]  ;;  %v5904_v28 = vpack.c.bf16 %v835_v21, %v833_v2  ;;  %v842_v2 = vld [vmem:[%s5023_s8 + $0x5a8] sm:$0xff] }
 0x146   : > { %v5900_v29 = vpack.c.bf16 %v579_v43, %v577_v3  ;;  %v839_v43 = vld [vmem:[%s5023_s8 + $0x590] sm:$0xff]  ;;  %v586_v3 = vld [vmem:[%s5016_s30 + $0x5a8] sm:$0xff] }
 0x147   : > { %3362 = vmatpush1.bf16.msra.mxu0 %v5860_v12  ;;  %7522 = vst [vmem:[#allocation147_spill] sm:$0xff] %v5886_v55  ;;  %7525 = vst [vmem:[#allocation150_spill] sm:$0xff] %v5904_v28  ;;  %v5912_v12 = vpack.c.bf16 %v840_v11, %v838_v58  ;;  %v585_v11 = vld [vmem:[%s5016_s30 + $0x5a0] sm:$0xff] }
 0x148   : > { %3618 = vmatpush1.bf16.msra.mxu1 %v5864_v48  ;;  %3364 = vmatprep.subr.bf16.mxu0 %v5866_v14  ;;  %v584_v48 = vld [vmem:[%s5016_s30 + $0x598] sm:$0xff]  ;;  %7524 = vst [vmem:[#allocation149_spill] sm:$0xff] %v5900_v29  ;;  %v837_v14 = vld [vmem:[%s5023_s8 + $0x580] sm:$0xff] }
 0x149   : > { %3620 = vmatprep.subr.bf16.mxu1 %v5872_v56  ;;  %v5906_v47 = vpack.c.bf16 %v584_v48, %v582_v46  ;;  %v583_v56 = vld [vmem:[%s5016_s30 + $0x590] sm:$0xff]  ;;  %7527 = vst [vmem:[#allocation152_spill] sm:$0xff] %v5912_v12  ;;  %v844_v48 = vld [vmem:[%s5023_s8 + $0x5b8] sm:$0xff]  ;;  %v5924_v46 = vpack.c.bf16 %v839_v43, %v837_v14  ;;  %v846_v14 = vld [vmem:[%s5023_s8 + $0x5c8] sm:$0xff] }
 0x14a   : > { %v5920_v21 = vpack.c.bf16 %v583_v56, %v581_v61  ;;  %v843_v56 = vld [vmem:[%s5023_s8 + $0x5b0] sm:$0xff]  ;;  %v590_v61 = vld [vmem:[%s5016_s30 + $0x5c8] sm:$0xff] }
 0x14b   : > { %3366 = vmatpush1.bf16.msra.mxu0 %v5880_v23  ;;  %7526 = vst [vmem:[#allocation151_spill] sm:$0xff] %v5906_v47  ;;  %7529 = vst [vmem:[#allocation154_spill] sm:$0xff] %v5924_v46  ;;  %v5932_v23 = vpack.c.bf16 %v844_v48, %v842_v2  ;;  %v589_v48 = vld [vmem:[%s5016_s30 + $0x5c0] sm:$0xff] }
 0x14c   : > { %3622 = vmatpush1.bf16.msra.mxu1 %v5884_v41  ;;  %3368 = vmatprep.subr.bf16.mxu0 %v5886_v55  ;;  %v588_v41 = vld [vmem:[%s5016_s30 + $0x5b8] sm:$0xff]  ;;  %7528 = vst [vmem:[#allocation153_spill] sm:$0xff] %v5920_v21  ;;  %v841_v55 = vld [vmem:[%s5023_s8 + $0x5a0] sm:$0xff] }
 0x14d   : > { %3624 = vmatprep.subr.bf16.mxu1 %v5892_v38  ;;  %v5926_v58 = vpack.c.bf16 %v588_v41, %v586_v3  ;;  %v587_v38 = vld [vmem:[%s5016_s30 + $0x5b0] sm:$0xff]  ;;  %7531 = vst [vmem:[#allocation156_spill] sm:$0xff] %v5932_v23  ;;  %v848_v41 = vld [vmem:[%s5023_s8 + $0x5d8] sm:$0xff]  ;;  %v5944_v3 = vpack.c.bf16 %v843_v56, %v841_v55  ;;  %v850_v55 = vld [vmem:[%s5023_s8 + $0x5e8] sm:$0xff] }
 0x14e   : > { %v5940_v43 = vpack.c.bf16 %v587_v38, %v585_v11  ;;  %v847_v38 = vld [vmem:[%s5023_s8 + $0x5d0] sm:$0xff]  ;;  %v594_v11 = vld [vmem:[%s5016_s30 + $0x5e8] sm:$0xff] }
 0x14f   : > { %3370 = vmatpush1.bf16.msra.mxu0 %v5900_v29  ;;  %7530 = vst [vmem:[#allocation155_spill] sm:$0xff] %v5926_v58  ;;  %7533 = vst [vmem:[#allocation158_spill] sm:$0xff] %v5944_v3  ;;  %v5952_v29 = vpack.c.bf16 %v848_v41, %v846_v14  ;;  %v593_v41 = vld [vmem:[%s5016_s30 + $0x5e0] sm:$0xff] }
 0x150   : > { %3626 = vmatpush1.bf16.msra.mxu1 %v5904_v28  ;;  %3372 = vmatprep.subr.bf16.mxu0 %v5906_v47  ;;  %v592_v28 = vld [vmem:[%s5016_s30 + $0x5d8] sm:$0xff]  ;;  %7532 = vst [vmem:[#allocation157_spill] sm:$0xff] %v5940_v43  ;;  %v845_v47 = vld [vmem:[%s5023_s8 + $0x5c0] sm:$0xff] }
 0x151   : > { %3628 = vmatprep.subr.bf16.mxu1 %v5912_v12  ;;  %v5946_v2 = vpack.c.bf16 %v592_v28, %v590_v61  ;;  %v591_v12 = vld [vmem:[%s5016_s30 + $0x5d0] sm:$0xff]  ;;  %7535 = vst [vmem:[#allocation160_spill] sm:$0xff] %v5952_v29  ;;  %v852_v28 = vld [vmem:[%s5023_s8 + $0x5f8] sm:$0xff]  ;;  %v5964_v61 = vpack.c.bf16 %v847_v38, %v845_v47  ;;  %v854_v47 = vld [vmem:[%s5023_s8 + $0x608] sm:$0xff] }
 0x152   : > { %v5960_v56 = vpack.c.bf16 %v591_v12, %v589_v48  ;;  %v851_v12 = vld [vmem:[%s5023_s8 + $0x5f0] sm:$0xff]  ;;  %v598_v48 = vld [vmem:[%s5016_s30 + $0x608] sm:$0xff] }
 0x153   : > { %3374 = vmatpush1.bf16.msra.mxu0 %v5920_v21  ;;  %7534 = vst [vmem:[#allocation159_spill] sm:$0xff] %v5946_v2  ;;  %7537 = vst [vmem:[#allocation162_spill] sm:$0xff] %v5964_v61  ;;  %v5972_v21 = vpack.c.bf16 %v852_v28, %v850_v55  ;;  %v597_v28 = vld [vmem:[%s5016_s30 + $0x600] sm:$0xff] }
 0x154   : > { %3630 = vmatpush1.bf16.msra.mxu1 %v5924_v46  ;;  %3376 = vmatprep.subr.bf16.mxu0 %v5926_v58  ;;  %v596_v46 = vld [vmem:[%s5016_s30 + $0x5f8] sm:$0xff]  ;;  %7536 = vst [vmem:[#allocation161_spill] sm:$0xff] %v5960_v56  ;;  %v849_v58 = vld [vmem:[%s5023_s8 + $0x5e0] sm:$0xff] }
 0x155   : > { %3632 = vmatprep.subr.bf16.mxu1 %v5932_v23  ;;  %v5966_v14 = vpack.c.bf16 %v596_v46, %v594_v11  ;;  %v595_v23 = vld [vmem:[%s5016_s30 + $0x5f0] sm:$0xff]  ;;  %7539 = vst [vmem:[#allocation164_spill] sm:$0xff] %v5972_v21  ;;  %v856_v46 = vld [vmem:[%s5023_s8 + $0x618] sm:$0xff]  ;;  %v5984_v11 = vpack.c.bf16 %v851_v12, %v849_v58 }
 0x156   : > { %v5980_v38 = vpack.c.bf16 %v595_v23, %v593_v41  ;;  %v855_v23 = vld [vmem:[%s5023_s8 + $0x610] sm:$0xff]  ;;  %v602_v41 = vld [vmem:[%s5016_s30 + $0x628] sm:$0xff]  ;;  %v860_v58 = vld [vmem:[%s5023_s8 + $0x638] sm:$0xff] }
 0x157   : > { %3378 = vmatpush1.bf16.msra.mxu0 %v5940_v43  ;;  %7538 = vst [vmem:[#allocation163_spill] sm:$0xff] %v5966_v14  ;;  %7541 = vst [vmem:[#allocation166_spill] sm:$0xff] %v5984_v11  ;;  %v5992_v43 = vpack.c.bf16 %v856_v46, %v854_v47  ;;  %v601_v46 = vld [vmem:[%s5016_s30 + $0x620] sm:$0xff] }
 0x158   : > { %3634 = vmatpush1.bf16.msra.mxu1 %v5944_v3  ;;  %3380 = vmatprep.subr.bf16.mxu0 %v5946_v2  ;;  %v600_v3 = vld [vmem:[%s5016_s30 + $0x618] sm:$0xff]  ;;  %7540 = vst [vmem:[#allocation165_spill] sm:$0xff] %v5980_v38  ;;  %v853_v2 = vld [vmem:[%s5023_s8 + $0x600] sm:$0xff] }
 0x159   : > { %3636 = vmatprep.subr.bf16.mxu1 %v5952_v29  ;;  %v5986_v55 = vpack.c.bf16 %v600_v3, %v598_v48  ;;  %v599_v29 = vld [vmem:[%s5016_s30 + $0x610] sm:$0xff]  ;;  %7543 = vst [vmem:[#allocation168_spill] sm:$0xff] %v5992_v43  ;;  %v313_v3 = vld [vmem:[#allocation2 + $0x20] sm:$0xff]  ;;  %v6004_v48 = vpack.c.bf16 %v855_v23, %v853_v2  ;;  %v864_v2 = vld [vmem:[%s5023_s8 + $0x658] sm:$0xff] }
 0x15a   : > { %v6000_v12 = vpack.c.bf16 %v599_v29, %v597_v28  ;;  %v606_v29 = vld [vmem:[%s5016_s30 + $0x648] sm:$0xff]  ;;  %v608_v28 = vld [vmem:[%s5016_s30 + $0x658] sm:$0xff] }
 0x15b   : > { %3382 = vmatpush1.bf16.msra.mxu0 %v5960_v56  ;;  %7542 = vst [vmem:[#allocation167_spill] sm:$0xff] %v5986_v55  ;;  %7545 = vst [vmem:[#allocation170_spill] sm:$0xff] %v6004_v48  ;;  %v857_v56 = vld [vmem:[%s5023_s8 + $0x620] sm:$0xff] }
 0x15c   : > { %3638 = vmatpush1.bf16.msra.mxu1 %v5964_v61  ;;  %3384 = vmatprep.subr.bf16.mxu0 %v5966_v14  ;;  %v604_v61 = vld [vmem:[%s5016_s30 + $0x638] sm:$0xff]  ;;  %v858_v14 = vld [vmem:[%s5023_s8 + $0x628] sm:$0xff]  ;;  %7544 = vst [vmem:[#allocation169_spill] sm:$0xff] %v6000_v12 }
 0x15d   : > { %3640 = vmatprep.subr.bf16.mxu1 %v5972_v21  ;;  %v6006_v47 = vpack.c.bf16 %v604_v61, %v602_v41  ;;  %v603_v21 = vld [vmem:[%s5016_s30 + $0x630] sm:$0xff]  ;;  %v6012_v25 = vpack.c.bf16 %v860_v58, %v858_v14  ;;  %v322_v61 = vld [vmem:[#allocation2 + $0x68] sm:$0xff]  ;;  %v321_v14 = vld [vmem:[#allocation2 + $0x60] sm:$0xff]  ;;  %v6026_v58 = vpack.c.bf16 %v608_v28, %v606_v29 }
 0x15e   : > { %v6020_v23 = vpack.c.bf16 %v603_v21, %v601_v46  ;;  %v610_v21 = vld [vmem:[%s5016_s30 + $0x668] sm:$0xff]  ;;  %v612_v46 = vld [vmem:[%s5016_s30 + $0x678] sm:$0xff] }
 0x15f   : > { %3386 = vmatpush1.bf16.msra.mxu0 %v5980_v38  ;;  %7546 = vst [vmem:[#allocation171_spill] sm:$0xff] %v6006_v47  ;;  %7547 = vst [vmem:[#allocation172_spill] sm:$0xff] %v6012_v25  ;;  %v859_v38 = vld [vmem:[%s5023_s8 + $0x630] sm:$0xff]  ;;  %v6046_v28 = vpack.c.bf16 %v612_v46, %v610_v21  ;;  %v613_v46 = vld [vmem:[%s5016_s30 + $0x680] sm:$0xff] }
 0x160   : > { %3642 = vmatpush1.bf16.msra.mxu1 %v5984_v11  ;;  %3388 = vmatprep.subr.bf16.mxu0 %v5986_v55  ;;  %v862_v11 = vld [vmem:[%s5023_s8 + $0x648] sm:$0xff]  ;;  %7548 = vst [vmem:[#allocation173_spill] sm:$0xff] %v6020_v23  ;;  %v6024_v41 = vpack.c.bf16 %v859_v38, %v857_v56  ;;  %7550 = vst [vmem:[#allocation175_spill] sm:$0xff] %v6026_v58  ;;  %v607_v55 = vld [vmem:[%s5016_s30 + $0x650] sm:$0xff] }
 0x161   : > { %3644 = vmatprep.subr.bf16.mxu1 %v5992_v43  ;;  %v605_v43 = vld [vmem:[%s5016_s30 + $0x640] sm:$0xff]  ;;  %v330_v56 = vld [vmem:[#allocation2 + $0xa8] sm:$0xff]  ;;  %7554 = vst [vmem:[#allocation179_spill] sm:$0xff] %v6046_v28 }
 0x162   : > { %1184 = vmatmul.mubr.f32.vlgmr.msra.gmra.mrb[0].mxu0 %v313_v3  ;;  %7549 = vst [vmem:[#allocation174_spill] sm:$0xff] %v6024_v41  ;;  %v6040_v38 = vpack.c.bf16 %v607_v55, %v605_v43  ;;  %v867_v43 = vld [vmem:[%s5023_s8 + $0x670] sm:$0xff]  ;;  %v614_v55 = vld [vmem:[%s5016_s30 + $0x688] sm:$0xff] }
 0x163   : > { %3390 = vmatpush1.bf16.msra.mxu0 %v6000_v12  ;;  %1588 = vmatmul.mubr.f32.vlgmr.msra.gmra.mrb[0].mxu1 %v313_v3  ;;  %v6032_v12 = vpack.c.bf16 %v864_v2, %v862_v11  ;;  %v863_v3 = vld [vmem:[%s5023_s8 + $0x650] sm:$0xff]  ;;  %v329_v11 = vld [vmem:[#allocation2 + $0xa0] sm:$0xff] }
 0x164   : > { %3646 = vmatpush1.bf16.msra.mxu1 %v6004_v48  ;;  %3392 = vmatprep.subr.bf16.mxu0 %v6006_v47  ;;  %v866_v48 = vld [vmem:[%s5023_s8 + $0x668] sm:$0xff]  ;;  %v868_v47 = vld [vmem:[%s5023_s8 + $0x678] sm:$0xff]  ;;  %7552 = vst [vmem:[#allocation177_spill] sm:$0xff] %v6040_v38  ;;  %v6044_v29 = vpack.c.bf16 %v863_v3, %v861_v62  ;;  %v609_v2 = vld [vmem:[%s5016_s30 + $0x660] sm:$0xff] }
 0x165   : > { %3648 = vmatprep.subr.bf16.mxu1 %v6012_v25  ;;  %7551 = vst [vmem:[#allocation176_spill] sm:$0xff] %v6032_v12  ;;  %1189 = vmatprep.mubr.f32.mxu0 %v322_v61  ;;  %v865_v25 = vld [vmem:[%s5023_s8 + $0x660] sm:$0xff]  ;;  %v338_v62 = vld [vmem:[#allocation2 + $0xe8] sm:$0xff] }
 0x166   : > { %1593 = vmatprep.mubr.f32.mxu1 %v322_v61  ;;  %1190 = vmatmul.mubr.f32.gmra.mrb[2].mxu0 %v321_v14  ;;  %7553 = vst [vmem:[#allocation178_spill] sm:$0xff] %v6044_v29  ;;  %v611_v61 = vld [vmem:[%s5016_s30 + $0x670] sm:$0xff] }
 0x167   : > { %3394 = vmatpush1.bf16.msra.mxu0 %v6020_v23  ;;  %1594 = vmatmul.mubr.f32.gmra.mrb[2].mxu1 %v321_v14  ;;  %v6052_v23 = vpack.c.bf16 %v868_v47, %v866_v48  ;;  %v616_v14 = vld [vmem:[%s5016_s30 + $0x698] sm:$0xff]  ;;  %v6060_v3 = vpack.c.bf16 %v611_v61, %v609_v2  ;;  %v337_v48 = vld [vmem:[#allocation2 + $0xe0] sm:$0xff]  ;;  %v6064_v47 = vpack.c.bf16 %v867_v43, %v865_v25  ;;  %v871_v2 = vld [vmem:[%s5023_s8 + $0x690] sm:$0xff] }
 0x168   : > { %3650 = vmatpush1.bf16.msra.mxu1 %v6024_v41  ;;  %3396 = vmatprep.subr.bf16.mxu0 %v6026_v58  ;;  %v870_v41 = vld [vmem:[%s5023_s8 + $0x688] sm:$0xff]  ;;  %v872_v58 = vld [vmem:[%s5023_s8 + $0x698] sm:$0xff]  ;;  %v6066_v21 = vpack.c.bf16 %v616_v14, %v614_v55  ;;  %v617_v14 = vld [vmem:[%s5016_s30 + $0x6a0] sm:$0xff] }
 0x169   : > { %3652 = vmatprep.subr.bf16.mxu1 %v6032_v12  ;;  %7555 = vst [vmem:[#allocation180_spill] sm:$0xff] %v6052_v23  ;;  %1195 = vmatprep.mubr.f32.mxu0 %v330_v56  ;;  %7556 = vst [vmem:[#allocation181_spill] sm:$0xff] %v6060_v3  ;;  %v869_v12 = vld [vmem:[%s5023_s8 + $0x680] sm:$0xff]  ;;  %v618_v61 = vld [vmem:[%s5016_s30 + $0x6a8] sm:$0xff] }
 0x16a   : > { %1599 = vmatprep.mubr.f32.mxu1 %v330_v56  ;;  %1196 = vmatmul.mubr.f32.gmra.mrb[4].mxu0 %v329_v11  ;;  %7557 = vst [vmem:[#allocation182_spill] sm:$0xff] %v6064_v47  ;;  %7558 = vst [vmem:[#allocation183_spill] sm:$0xff] %v6066_v21  ;;  %v615_v56 = vld [vmem:[%s5016_s30 + $0x690] sm:$0xff]  ;;  %v346_v25 = vld [vmem:[#allocation2 + $0x128] sm:$0xff] }
 0x16b   : > { %3398 = vmatpush1.bf16.msra.mxu0 %v6040_v38  ;;  %1600 = vmatmul.mubr.f32.gmra.mrb[4].mxu1 %v329_v11  ;;  %v6072_v38 = vpack.c.bf16 %v872_v58, %v870_v41  ;;  %v620_v11 = vld [vmem:[%s5016_s30 + $0x6b8] sm:$0xff]  ;;  %v6080_v43 = vpack.c.bf16 %v615_v56, %v613_v46  ;;  %v345_v41 = vld [vmem:[#allocation2 + $0x120] sm:$0xff]  ;;  %v6084_v58 = vpack.c.bf16 %v871_v2, %v869_v12  ;;  %v875_v46 = vld [vmem:[%s5023_s8 + $0x6b0] sm:$0xff] }
 0x16c   : > { %3654 = vmatpush1.bf16.msra.mxu1 %v6044_v29  ;;  %3400 = vmatprep.subr.bf16.mxu0 %v6046_v28  ;;  %v874_v29 = vld [vmem:[%s5023_s8 + $0x6a8] sm:$0xff]  ;;  %v876_v28 = vld [vmem:[%s5023_s8 + $0x6b8] sm:$0xff]  ;;  %v6086_v55 = vpack.c.bf16 %v620_v11, %v618_v61  ;;  %v621_v11 = vld [vmem:[%s5016_s30 + $0x6c0] sm:$0xff] }
 0x16d   : > { %3656 = vmatprep.subr.bf16.mxu1 %v6052_v23  ;;  %7559 = vst [vmem:[#allocation184_spill] sm:$0xff] %v6072_v38  ;;  %1201 = vmatprep.mubr.f32.mxu0 %v338_v62  ;;  %7560 = vst [vmem:[#allocation185_spill] sm:$0xff] %v6080_v43  ;;  %v873_v23 = vld [vmem:[%s5023_s8 + $0x6a0] sm:$0xff]  ;;  %v622_v56 = vld [vmem:[%s5016_s30 + $0x6c8] sm:$0xff] }
 0x16e   : > { %1605 = vmatprep.mubr.f32.mxu1 %v338_v62  ;;  %1202 = vmatmul.mubr.f32.gmra.mrb[6].mxu0 %v337_v48  ;;  %7561 = vst [vmem:[#allocation186_spill] sm:$0xff] %v6084_v58  ;;  %7562 = vst [vmem:[#allocation187_spill] sm:$0xff] %v6086_v55  ;;  %v619_v62 = vld [vmem:[%s5016_s30 + $0x6b0] sm:$0xff]  ;;  %v354_v12 = vld [vmem:[#allocation2 + $0x168] sm:$0xff] }
 0x16f   : > { %3402 = vmatpush1.bf16.msra.mxu0 %v6060_v3  ;;  %1606 = vmatmul.mubr.f32.gmra.mrb[6].mxu1 %v337_v48  ;;  %v6092_v3 = vpack.c.bf16 %v876_v28, %v874_v29  ;;  %v624_v48 = vld [vmem:[%s5016_s30 + $0x6d8] sm:$0xff]  ;;  %v6100_v2 = vpack.c.bf16 %v619_v62, %v617_v14  ;;  %v353_v29 = vld [vmem:[#allocation2 + $0x160] sm:$0xff]  ;;  %v6104_v28 = vpack.c.bf16 %v875_v46, %v873_v23  ;;  %v879_v14 = vld [vmem:[%s5023_s8 + $0x6d0] sm:$0xff] }
 0x170   : > { %3658 = vmatpush1.bf16.msra.mxu1 %v6064_v47  ;;  %3404 = vmatprep.subr.bf16.mxu0 %v6066_v21  ;;  %v878_v47 = vld [vmem:[%s5023_s8 + $0x6c8] sm:$0xff]  ;;  %v880_v21 = vld [vmem:[%s5023_s8 + $0x6d8] sm:$0xff]  ;;  %v6106_v61 = vpack.c.bf16 %v624_v48, %v622_v56  ;;  %v625_v56 = vld [vmem:[%s5016_s30 + $0x6e0] sm:$0xff] }
 0x171   : > { %3660 = vmatprep.subr.bf16.mxu1 %v6072_v38  ;;  %1207 = vmatprep.mubr.f32.mxu0 %v346_v25  ;;  %7563 = vst [vmem:[#allocation188_spill] sm:$0xff] %v6100_v2  ;;  %7564 = vst [vmem:[#allocation189_spill] sm:$0xff] %v6104_v28  ;;  %v877_v38 = vld [vmem:[%s5023_s8 + $0x6c0] sm:$0xff]  ;;  %v628_v62 = vld [vmem:[%s5016_s30 + $0x6f8] sm:$0xff] }
 0x172   : > { %1611 = vmatprep.mubr.f32.mxu1 %v346_v25  ;;  %1208 = vmatmul.mubr.f32.gmra.mrb[8].mxu0 %v345_v41  ;;  %7565 = vst [vmem:[#allocation190_spill] sm:$0xff] %v6106_v61  ;;  %v623_v25 = vld [vmem:[%s5016_s30 + $0x6d0] sm:$0xff]  ;;  %v316_v23 = vld [vmem:[#allocation2 + $0x38] sm:$0xff] }
 0x173   : > { %3406 = vmatpush1.bf16.msra.mxu0 %v6080_v43  ;;  %1612 = vmatmul.mubr.f32.gmra.mrb[8].mxu1 %v345_v41  ;;  %v6112_v43 = vpack.c.bf16 %v880_v21, %v878_v47  ;;  %v626_v41 = vld [vmem:[%s5016_s30 + $0x6e8] sm:$0xff]  ;;  %v6120_v47 = vpack.c.bf16 %v623_v25, %v621_v11  ;;  %v6124_v21 = vpack.c.bf16 %v879_v14, %v877_v38  ;;  %v627_v48 = vld [vmem:[%s5016_s30 + $0x6f0] sm:$0xff]  ;;  %v632_v25 = vld [vmem:[%s5016_s30 + $0x718] sm:$0xff] }
 0x174   : > { %3662 = vmatpush1.bf16.msra.mxu1 %v6084_v58  ;;  %3408 = vmatprep.subr.bf16.mxu0 %v6086_v55  ;;  %v882_v58 = vld [vmem:[%s5023_s8 + $0x6e8] sm:$0xff]  ;;  %v884_v55 = vld [vmem:[%s5023_s8 + $0x6f8] sm:$0xff]  ;;  %v6126_v46 = vpack.c.bf16 %v628_v62, %v626_v41  ;;  %v883_v11 = vld [vmem:[%s5023_s8 + $0x6f0] sm:$0xff]  ;;  %v6140_v41 = vpack.c.bf16 %v627_v48, %v625_v56 }
 0x175   : > { %3664 = vmatprep.subr.bf16.mxu1 %v6092_v3  ;;  %7566 = vst [vmem:[#allocation191_spill] sm:$0xff] %v6112_v43  ;;  %1213 = vmatprep.mubr.f32.mxu0 %v354_v12  ;;  %7567 = vst [vmem:[#allocation192_spill] sm:$0xff] %v6120_v47  ;;  %v886_v38 = vld [vmem:[%s5023_s8 + $0x708] sm:$0xff]  ;;  %v888_v14 = vld [vmem:[%s5023_s8 + $0x718] sm:$0xff] }
 0x176   : > { %1617 = vmatprep.mubr.f32.mxu1 %v354_v12  ;;  %1214 = vmatmul.mubr.f32.gmra.mrb[10].mxu0 %v353_v29  ;;  %7568 = vst [vmem:[#allocation193_spill] sm:$0xff] %v6124_v21  ;;  %7569 = vst [vmem:[#allocation194_spill] sm:$0xff] %v6126_v46  ;;  %v881_v12 = vld [vmem:[%s5023_s8 + $0x6e0] sm:$0xff]  ;;  %v887_v56 = vld [vmem:[%s5023_s8 + $0x710] sm:$0xff] }
 0x177   : > { %3410 = vmatpush1.bf16.msra.mxu0 %v6100_v2  ;;  %1618 = vmatmul.mubr.f32.gmra.mrb[10].mxu1 %v353_v29  ;;  %v6132_v2 = vpack.c.bf16 %v884_v55, %v882_v58  ;;  %v630_v29 = vld [vmem:[%s5016_s30 + $0x708] sm:$0xff]  ;;  %7571 = vst [vmem:[#allocation196_spill] sm:$0xff] %v6140_v41  ;;  %v6144_v58 = vpack.c.bf16 %v883_v11, %v881_v12  ;;  %v629_v62 = vld [vmem:[%s5016_s30 + $0x700] sm:$0xff]  ;;  %v892_v11 = vld [vmem:[%s5023_s8 + $0x738] sm:$0xff] }
 0x178   : > { %3666 = vmatpush1.bf16.msra.mxu1 %v6104_v28  ;;  %3412 = vmatprep.subr.bf16.mxu0 %v6106_v61  ;;  %v6146_v55 = vpack.c.bf16 %v632_v25, %v630_v29  ;;  %v885_v61 = vld [vmem:[%s5023_s8 + $0x700] sm:$0xff]  ;;  %v634_v48 = vld [vmem:[%s5016_s30 + $0x728] sm:$0xff]  ;;  %v915_v28 = vld [vmem:[%s5023_s8 + $0x7f0] sm:$0xff] }
 0x179   : > { %3668 = vmatprep.subr.bf16.mxu1 %v6112_v43  ;;  %7570 = vst [vmem:[#allocation195_spill] sm:$0xff] %v6132_v2  ;;  %1284 = vmatprep.mubr.f32.mxu0 %v316_v23  ;;  %7572 = vst [vmem:[#allocation197_spill] sm:$0xff] %v6144_v58  ;;  %v631_v43 = vld [vmem:[%s5016_s30 + $0x710] sm:$0xff]  ;;  %v890_v12 = vld [vmem:[%s5023_s8 + $0x728] sm:$0xff]  ;;  %v6164_v25 = vpack.c.bf16 %v887_v56, %v885_v61 }
 0x17a   : > { %1688 = vmatprep.mubr.f32.mxu1 %v316_v23  ;;  %7573 = vst [vmem:[#allocation198_spill] sm:$0xff] %v6146_v55  ;;  %v6152_v23 = vpack.c.bf16 %v888_v14, %v886_v38  ;;  %v6160_v29 = vpack.c.bf16 %v631_v43, %v629_v62  ;;  %v633_v14 = vld [vmem:[%s5016_s30 + $0x720] sm:$0xff]  ;;  %v891_v43 = vld [vmem:[%s5023_s8 + $0x730] sm:$0xff]  ;;  %v638_v62 = vld [vmem:[%s5016_s30 + $0x748] sm:$0xff] }
 0x17b   : > { %3414 = vmatpush1.bf16.msra.mxu0 %v6120_v47  ;;  %7576 = vst [vmem:[#allocation201_spill] sm:$0xff] %v6164_v25  ;;  %v6172_v47 = vpack.c.bf16 %v892_v11, %v890_v12  ;;  %v894_v61 = vld [vmem:[%s5023_s8 + $0x748] sm:$0xff]  ;;  %v637_v11 = vld [vmem:[%s5016_s30 + $0x740] sm:$0xff] }
 0x17c   : > { %3670 = vmatpush1.bf16.msra.mxu1 %v6124_v21  ;;  %3416 = vmatprep.subr.bf16.mxu0 %v6126_v46  ;;  %7574 = vst [vmem:[#allocation199_spill] sm:$0xff] %v6152_v23  ;;  %v636_v21 = vld [vmem:[%s5016_s30 + $0x738] sm:$0xff]  ;;  %7575 = vst [vmem:[#allocation200_spill] sm:$0xff] %v6160_v29  ;;  %v889_v46 = vld [vmem:[%s5023_s8 + $0x720] sm:$0xff] }
 0x17d   : > { %3672 = vmatprep.subr.bf16.mxu1 %v6132_v2  ;;  %v6166_v38 = vpack.c.bf16 %v636_v21, %v634_v48  ;;  %v635_v2 = vld [vmem:[%s5016_s30 + $0x730] sm:$0xff]  ;;  %7578 = vst [vmem:[#allocation203_spill] sm:$0xff] %v6172_v47  ;;  %v896_v21 = vld [vmem:[%s5023_s8 + $0x758] sm:$0xff]  ;;  %v6184_v48 = vpack.c.bf16 %v891_v43, %v889_v46  ;;  %v898_v46 = vld [vmem:[%s5023_s8 + $0x768] sm:$0xff] }
 0x17e   : > { %v6180_v56 = vpack.c.bf16 %v635_v2, %v633_v14  ;;  %v895_v2 = vld [vmem:[%s5023_s8 + $0x750] sm:$0xff]  ;;  %v642_v14 = vld [vmem:[%s5016_s30 + $0x768] sm:$0xff] }
 0x17f   : > { %3418 = vmatpush1.bf16.msra.mxu0 %v6140_v41  ;;  %7577 = vst [vmem:[#allocation202_spill] sm:$0xff] %v6166_v38  ;;  %7580 = vst [vmem:[#allocation205_spill] sm:$0xff] %v6184_v48  ;;  %v6192_v41 = vpack.c.bf16 %v896_v21, %v894_v61  ;;  %v641_v21 = vld [vmem:[%s5016_s30 + $0x760] sm:$0xff] }
 0x180   : > { %3674 = vmatpush1.bf16.msra.mxu1 %v6144_v58  ;;  %3420 = vmatprep.subr.bf16.mxu0 %v6146_v55  ;;  %v640_v58 = vld [vmem:[%s5016_s30 + $0x758] sm:$0xff]  ;;  %7579 = vst [vmem:[#allocation204_spill] sm:$0xff] %v6180_v56  ;;  %v893_v55 = vld [vmem:[%s5023_s8 + $0x740] sm:$0xff] }
 0x181   : > { %3676 = vmatprep.subr.bf16.mxu1 %v6152_v23  ;;  %v6186_v12 = vpack.c.bf16 %v640_v58, %v638_v62  ;;  %v639_v23 = vld [vmem:[%s5016_s30 + $0x750] sm:$0xff]  ;;  %7582 = vst [vmem:[#allocation207_spill] sm:$0xff] %v6192_v41  ;;  %v900_v58 = vld [vmem:[%s5023_s8 + $0x778] sm:$0xff]  ;;  %v6204_v62 = vpack.c.bf16 %v895_v2, %v893_v55  ;;  %v902_v55 = vld [vmem:[%s5023_s8 + $0x788] sm:$0xff] }
 0x182   : > { %v6200_v43 = vpack.c.bf16 %v639_v23, %v637_v11  ;;  %v899_v23 = vld [vmem:[%s5023_s8 + $0x770] sm:$0xff]  ;;  %v646_v11 = vld [vmem:[%s5016_s30 + $0x788] sm:$0xff] }
 0x183   : > { %3422 = vmatpush1.bf16.msra.mxu0 %v6160_v29  ;;  %7581 = vst [vmem:[#allocation206_spill] sm:$0xff] %v6186_v12  ;;  %7584 = vst [vmem:[#allocation209_spill] sm:$0xff] %v6204_v62  ;;  %v6212_v29 = vpack.c.bf16 %v900_v58, %v898_v46  ;;  %v645_v58 = vld [vmem:[%s5016_s30 + $0x780] sm:$0xff] }
 0x184   : > { %3678 = vmatpush1.bf16.msra.mxu1 %v6164_v25  ;;  %3424 = vmatprep.subr.bf16.mxu0 %v6166_v38  ;;  %v644_v25 = vld [vmem:[%s5016_s30 + $0x778] sm:$0xff]  ;;  %7583 = vst [vmem:[#allocation208_spill] sm:$0xff] %v6200_v43  ;;  %v897_v38 = vld [vmem:[%s5023_s8 + $0x760] sm:$0xff] }
 0x185   : > { %3680 = vmatprep.subr.bf16.mxu1 %v6172_v47  ;;  %v6206_v61 = vpack.c.bf16 %v644_v25, %v642_v14  ;;  %v643_v47 = vld [vmem:[%s5016_s30 + $0x770] sm:$0xff]  ;;  %7586 = vst [vmem:[#allocation211_spill] sm:$0xff] %v6212_v29  ;;  %v904_v25 = vld [vmem:[%s5023_s8 + $0x798] sm:$0xff]  ;;  %v6224_v14 = vpack.c.bf16 %v899_v23, %v897_v38  ;;  %v906_v38 = vld [vmem:[%s5023_s8 + $0x7a8] sm:$0xff] }
 0x186   : > { %v6220_v2 = vpack.c.bf16 %v643_v47, %v641_v21  ;;  %v903_v47 = vld [vmem:[%s5023_s8 + $0x790] sm:$0xff]  ;;  %v650_v21 = vld [vmem:[%s5016_s30 + $0x7a8] sm:$0xff] }
 0x187   : > { %3426 = vmatpush1.bf16.msra.mxu0 %v6180_v56  ;;  %7585 = vst [vmem:[#allocation210_spill] sm:$0xff] %v6206_v61  ;;  %7588 = vst [vmem:[#allocation213_spill] sm:$0xff] %v6224_v14  ;;  %v6232_v56 = vpack.c.bf16 %v904_v25, %v902_v55  ;;  %v649_v25 = vld [vmem:[%s5016_s30 + $0x7a0] sm:$0xff] }
 0x188   : > { %3682 = vmatpush1.bf16.msra.mxu1 %v6184_v48  ;;  %3428 = vmatprep.subr.bf16.mxu0 %v6186_v12  ;;  %v648_v48 = vld [vmem:[%s5016_s30 + $0x798] sm:$0xff]  ;;  %7587 = vst [vmem:[#allocation212_spill] sm:$0xff] %v6220_v2  ;;  %v901_v12 = vld [vmem:[%s5023_s8 + $0x780] sm:$0xff] }
 0x189   : > { %3684 = vmatprep.subr.bf16.mxu1 %v6192_v41  ;;  %v6226_v46 = vpack.c.bf16 %v648_v48, %v646_v11  ;;  %v647_v41 = vld [vmem:[%s5016_s30 + $0x790] sm:$0xff]  ;;  %7590 = vst [vmem:[#allocation215_spill] sm:$0xff] %v6232_v56  ;;  %v908_v48 = vld [vmem:[%s5023_s8 + $0x7b8] sm:$0xff]  ;;  %v6244_v11 = vpack.c.bf16 %v903_v47, %v901_v12  ;;  %v910_v12 = vld [vmem:[%s5023_s8 + $0x7c8] sm:$0xff] }
 0x18a   : > { %v6240_v23 = vpack.c.bf16 %v647_v41, %v645_v58  ;;  %v907_v41 = vld [vmem:[%s5023_s8 + $0x7b0] sm:$0xff]  ;;  %v654_v58 = vld [vmem:[%s5016_s30 + $0x7c8] sm:$0xff] }
 0x18b   : > { %3430 = vmatpush1.bf16.msra.mxu0 %v6200_v43  ;;  %7589 = vst [vmem:[#allocation214_spill] sm:$0xff] %v6226_v46  ;;  %7592 = vst [vmem:[#allocation217_spill] sm:$0xff] %v6244_v11  ;;  %v6252_v43 = vpack.c.bf16 %v908_v48, %v906_v38  ;;  %v653_v48 = vld [vmem:[%s5016_s30 + $0x7c0] sm:$0xff] }
 0x18c   : > { %3686 = vmatpush1.bf16.msra.mxu1 %v6204_v62  ;;  %3432 = vmatprep.subr.bf16.mxu0 %v6206_v61  ;;  %v652_v62 = vld [vmem:[%s5016_s30 + $0x7b8] sm:$0xff]  ;;  %7591 = vst [vmem:[#allocation216_spill] sm:$0xff] %v6240_v23  ;;  %v905_v61 = vld [vmem:[%s5023_s8 + $0x7a0] sm:$0xff] }
 0x18d   : > { %3688 = vmatprep.subr.bf16.mxu1 %v6212_v29  ;;  %v6246_v55 = vpack.c.bf16 %v652_v62, %v650_v21  ;;  %v651_v29 = vld [vmem:[%s5016_s30 + $0x7b0] sm:$0xff]  ;;  %7594 = vst [vmem:[#allocation219_spill] sm:$0xff] %v6252_v43  ;;  %v912_v62 = vld [vmem:[%s5023_s8 + $0x7d8] sm:$0xff]  ;;  %v6264_v21 = vpack.c.bf16 %v907_v41, %v905_v61 }
 0x18e   : > { %v6260_v47 = vpack.c.bf16 %v651_v29, %v649_v25  ;;  %v911_v29 = vld [vmem:[%s5023_s8 + $0x7d0] sm:$0xff]  ;;  %v658_v25 = vld [vmem:[%s5016_s30 + $0x7e8] sm:$0xff] }
 0x18f   : > { %3434 = vmatpush1.bf16.msra.mxu0 %v6220_v2  ;;  %7593 = vst [vmem:[#allocation218_spill] sm:$0xff] %v6246_v55  ;;  %v6272_v2 = vpack.c.bf16 %v912_v62, %v910_v12  ;;  %v659_v12 = vld [vmem:[%s5016_s30 + $0x7f0] sm:$0xff] }
 0x190   : > { %3690 = vmatpush1.bf16.msra.mxu1 %v6224_v14  ;;  %3436 = vmatprep.subr.bf16.mxu0 %v6226_v46  ;;  %v656_v14 = vld [vmem:[%s5016_s30 + $0x7d8] sm:$0xff]  ;;  %v909_v46 = vld [vmem:[%s5023_s8 + $0x7c0] sm:$0xff] }
 0x191   : > { %3692 = vmatprep.subr.bf16.mxu1 %v6232_v56  ;;  %v6266_v38 = vpack.c.bf16 %v656_v14, %v654_v58  ;;  %v655_v56 = vld [vmem:[%s5016_s30 + $0x7d0] sm:$0xff]  ;;  %v6284_v14 = vpack.c.bf16 %v911_v29, %v909_v46  ;;  %v657_v58 = vld [vmem:[%s5016_s30 + $0x7e0] sm:$0xff] }
 0x192   : > { %v6280_v61 = vpack.c.bf16 %v655_v56, %v653_v48  ;;  %v6296_v56 = vpack.c.bf16 %v659_v12, %v657_v58  ;;  %v7625_v48 = vld [vmem:[#allocation48_spill] sm:$0xff]  ;;  %v7626_v29 = vld [vmem:[#allocation49_spill] sm:$0xff]  ;;  %v7627_v58 = vld [vmem:[#allocation50_spill] sm:$0xff] }
 0x193   : > { %3438 = vmatpush1.bf16.msra.mxu0 %v6240_v23  ;;  %v914_v23 = vld [vmem:[%s5023_s8 + $0x7e8] sm:$0xff]  ;;  %v381_v12 = vld [vmem:[#allocation5 + $0xc0] sm:$0xff] }
 0x194   : > { %3694 = vmatpush1.bf16.msra.mxu1 %v6244_v11  ;;  %3440 = vmatprep.subr.bf16.mxu0 %v6246_v55  ;;  %v660_v11 = vld [vmem:[%s5016_s30 + $0x7f8] sm:$0xff] }
 0x195   : > { %3696 = vmatprep.subr.bf16.mxu1 %v6252_v43  ;;  %v916_v55 = vld [vmem:[%s5023_s8 + $0x7f8] sm:$0xff]  ;;  %v6286_v41 = vpack.c.bf16 %v660_v11, %v658_v25  ;;  %v913_v43 = vld [vmem:[%s5023_s8 + $0x7e0] sm:$0xff]  ;;  %v315_v11 = vld [vmem:[#allocation2 + $0x30] sm:$0xff] }
 0x196   : > { %v6291_v62 = vpack.c.bf16 %v916_v55, %v914_v23  ;;  %v6300_v46 = vpack.c.bf16 %v915_v28, %v913_v43  ;;  %v324_v23 = vld [vmem:[#allocation2 + $0x78] sm:$0xff]  ;;  %v323_v55 = vld [vmem:[#allocation2 + $0x70] sm:$0xff]  ;;  %v382_v25 = vld [vmem:[#allocation5 + $0xc8] sm:$0xff] }
 0x197   : > { %3442 = vmatpush1.bf16.msra.mxu0 %v6260_v47  ;;  %v332_v28 = vld [vmem:[#allocation2 + $0xb8] sm:$0xff]  ;;  %v7624_v43 = vld [vmem:[#allocation47_spill] sm:$0xff] }
 0x198   : > { %3698 = vmatpush1.bf16.msra.mxu1 %v6264_v21  ;;  %3444 = vmatprep.subr.bf16.mxu0 %v6266_v38 }
 0x199   : > { %3700 = vmatprep.subr.bf16.mxu1 %v6272_v2 }
 0x19b   : > { %3446 = vmatpush1.bf16.msra.mxu0 %v6280_v61 }
 0x19c   : > { %3702 = vmatpush1.bf16.msra.mxu1 %v6284_v14  ;;  %3448 = vmatprep.subr.bf16.mxu0 %v6286_v41 }
 0x19d   : > { %3704 = vmatprep.subr.bf16.mxu1 %v6291_v62 }
 0x19f   : > { %3450 = vmatpush1.bf16.msra.mxu0 %v6296_v56 }
 0x1a0   : > { %3706 = vmatpush1.bf16.msra.mxu1 %v6300_v46  ;;  %3708 = vmatprep.subr.bf16.mxu0 %v5028_v4  ;;  %v331_v4 = vld [vmem:[#allocation2 + $0xb0] sm:$0xff] }
 0x1a1   : > { %3964 = vmatprep.subr.bf16.mxu1 %v5033_v8  ;;  %v340_v8 = vld [vmem:[#allocation2 + $0xf8] sm:$0xff] }
 0x1a2   : > { %1285 = vmatmul.mubr.f32.vlgmr.msra.gmra.mrb[0].mxu0 %v315_v11 }
 0x1a3   : > { %1689 = vmatmul.mubr.f32.vlgmr.msra.gmra.mrb[0].mxu1 %v315_v11  ;;  %3710 = vmatpush1.bf16.msra.mxu0 %v5035_v9  ;;  %v339_v9 = vld [vmem:[#allocation2 + $0xf0] sm:$0xff] }
 0x1a4   : > { %3966 = vmatpush1.bf16.msra.mxu1 %v5041_v13  ;;  %1290 = vmatprep.mubr.f32.mxu0 %v324_v23  ;;  %v348_v13 = vld [vmem:[#allocation2 + $0x138] sm:$0xff]  ;;  %v7628_v11 = vld [vmem:[#allocation51_spill] sm:$0xff] }
 0x1a5   : > { %1694 = vmatprep.mubr.f32.mxu1 %v324_v23  ;;  %3712 = vmatprep.subr.bf16.mxu0 %v5048_v17  ;;  %v347_v17 = vld [vmem:[#allocation2 + $0x130] sm:$0xff]  ;;  %v7629_v23 = vld [vmem:[#allocation52_spill] sm:$0xff] }
 0x1a6   : > { %1291 = vmatmul.mubr.f32.gmra.mrb[2].mxu0 %v323_v55  ;;  %3968 = vmatprep.subr.bf16.mxu1 %v5050_v18  ;;  %v356_v18 = vld [vmem:[#allocation2 + $0x178] sm:$0xff] }
 0x1a7   : > { %1695 = vmatmul.mubr.f32.gmra.mrb[2].mxu1 %v323_v55  ;;  %3714 = vmatpush1.bf16.msra.mxu0 %v5056_v22  ;;  %v355_v22 = vld [vmem:[#allocation2 + $0x170] sm:$0xff]  ;;  %v7630_v55 = vld [vmem:[#allocation53_spill] sm:$0xff] }
 0x1a8   : > { %3970 = vmatpush1.bf16.msra.mxu1 %v5063_v26  ;;  %1296 = vmatprep.mubr.f32.mxu0 %v332_v28  ;;  %v358_v26 = vld [vmem:[#allocation5 + $0x8] sm:$0xff] }
 0x1a9   : > { %1700 = vmatprep.mubr.f32.mxu1 %v332_v28  ;;  %3716 = vmatprep.subr.bf16.mxu0 %v5065_v27  ;;  %v7595_v27 = vld [vmem:[#allocation18_spill] sm:$0xff] }
 0x1aa   : > { %1297 = vmatmul.mubr.f32.gmra.mrb[4].mxu0 %v331_v4  ;;  %3972 = vmatprep.subr.bf16.mxu1 %v5070_v31  ;;  %v7596_v31 = vld [vmem:[#allocation19_spill] sm:$0xff]  ;;  %v390_v28 = vld [vmem:[#allocation5 + $0x108] sm:$0xff] }
 0x1ab   : > { %1701 = vmatmul.mubr.f32.gmra.mrb[4].mxu1 %v331_v4  ;;  %3718 = vmatpush1.bf16.msra.mxu0 %v5076_v35  ;;  %v7597_v35 = vld [vmem:[#allocation20_spill] sm:$0xff]  ;;  %v7631_v4 = vld [vmem:[#allocation54_spill] sm:$0xff] }
 0x1ac   : > { %3974 = vmatpush1.bf16.msra.mxu1 %v5083_v39  ;;  %1302 = vmatprep.mubr.f32.mxu0 %v340_v8  ;;  %v7598_v39 = vld [vmem:[#allocation21_spill] sm:$0xff] }
 0x1ad   : > { %1706 = vmatprep.mubr.f32.mxu1 %v340_v8  ;;  %3720 = vmatprep.subr.bf16.mxu0 %v5085_v40  ;;  %v7599_v40 = vld [vmem:[#allocation22_spill] sm:$0xff]  ;;  %v389_v8 = vld [vmem:[#allocation5 + $0x100] sm:$0xff] }
 0x1ae   : > { %1303 = vmatmul.mubr.f32.gmra.mrb[6].mxu0 %v339_v9  ;;  %3976 = vmatprep.subr.bf16.mxu1 %v5091_v44  ;;  %v7600_v44 = vld [vmem:[#allocation23_spill] sm:$0xff] }
 0x1af   : > { %1707 = vmatmul.mubr.f32.gmra.mrb[6].mxu1 %v339_v9  ;;  %3722 = vmatpush1.bf16.msra.mxu0 %v5100_v51  ;;  %v7601_v51 = vld [vmem:[#allocation24_spill] sm:$0xff]  ;;  %v7632_v9 = vld [vmem:[#allocation55_spill] sm:$0xff] }
 0x1b0   : > { %3978 = vmatpush1.bf16.msra.mxu1 %v5104_v52  ;;  %1308 = vmatprep.mubr.f32.mxu0 %v348_v13  ;;  %v7602_v52 = vld [vmem:[#allocation25_spill] sm:$0xff] }
 0x1b1   : > { %1712 = vmatprep.mubr.f32.mxu1 %v348_v13  ;;  %3724 = vmatprep.subr.bf16.mxu0 %v5106_v53  ;;  %v7603_v53 = vld [vmem:[#allocation26_spill] sm:$0xff]  ;;  %v7633_v13 = vld [vmem:[#allocation56_spill] sm:$0xff] }
 0x1b2   : > { %1309 = vmatmul.mubr.f32.gmra.mrb[8].mxu0 %v347_v17  ;;  %3980 = vmatprep.subr.bf16.mxu1 %v5112_v57  ;;  %v7604_v57 = vld [vmem:[#allocation27_spill] sm:$0xff] }
 0x1b3   : > { %1713 = vmatmul.mubr.f32.gmra.mrb[8].mxu1 %v347_v17  ;;  %3726 = vmatpush1.bf16.msra.mxu0 %v5120_v63  ;;  %v7605_v63 = vld [vmem:[#allocation28_spill] sm:$0xff]  ;;  %v398_v17 = vld [vmem:[#allocation5 + $0x148] sm:$0xff] }
 0x1b4   : > { %3982 = vmatpush1.bf16.msra.mxu1 %v5124_v0  ;;  %1314 = vmatprep.mubr.f32.mxu0 %v356_v18  ;;  %v7606_v0 = vld [vmem:[#allocation29_spill] sm:$0xff] }
 0x1b5   : > { %1718 = vmatprep.mubr.f32.mxu1 %v356_v18  ;;  %3728 = vmatprep.subr.bf16.mxu0 %v5126_v1  ;;  %v7607_v1 = vld [vmem:[#allocation30_spill] sm:$0xff]  ;;  %v7634_v18 = vld [vmem:[#allocation57_spill] sm:$0xff] }
 0x1b6   : > { %1315 = vmatmul.mubr.f32.gmra.mrb[10].mxu0 %v355_v22  ;;  %3984 = vmatprep.subr.bf16.mxu1 %v5132_v6  ;;  %v7608_v6 = vld [vmem:[#allocation31_spill] sm:$0xff] }
 0x1b7   : > { %1719 = vmatmul.mubr.f32.gmra.mrb[10].mxu1 %v355_v22  ;;  %3730 = vmatpush1.bf16.msra.mxu0 %v5140_v15  ;;  %v7609_v15 = vld [vmem:[#allocation32_spill] sm:$0xff]  ;;  %v397_v22 = vld [vmem:[#allocation5 + $0x140] sm:$0xff] }
 0x1b8   : > { %3986 = vmatpush1.bf16.msra.mxu1 %v5144_v16  ;;  %3732 = vmatprep.subr.bf16.mxu0 %v5146_v19  ;;  %v7610_v16 = vld [vmem:[#allocation33_spill] sm:$0xff]  ;;  %v7611_v19 = vld [vmem:[#allocation34_spill] sm:$0xff] }
 0x1b9   : > { %3988 = vmatprep.subr.bf16.mxu1 %v5152_v24  ;;  %1789 = vmatprep.mubr.f32.mxu0 %v358_v26  ;;  %v7612_v24 = vld [vmem:[#allocation35_spill] sm:$0xff] }
 0x1ba   : > { %2193 = vmatprep.mubr.f32.mxu1 %v358_v26  ;;  %v7635_v26 = vld [vmem:[#allocation58_spill] sm:$0xff] }
 0x1bb   : > { %3734 = vmatpush1.bf16.msra.mxu0 %v5160_v33  ;;  %v7613_v33 = vld [vmem:[#allocation36_spill] sm:$0xff] }
 0x1bc   : > { %3990 = vmatpush1.bf16.msra.mxu1 %v5164_v34  ;;  %3736 = vmatprep.subr.bf16.mxu0 %v5166_v36  ;;  %v7614_v34 = vld [vmem:[#allocation37_spill] sm:$0xff]  ;;  %v7615_v36 = vld [vmem:[#allocation38_spill] sm:$0xff] }
 0x1bd   : > { %3992 = vmatprep.subr.bf16.mxu1 %v5172_v42  ;;  %v357_v42 = vld [vmem:[#allocation5] sm:$0xff] }
 0x1bf   : > { %3738 = vmatpush1.bf16.msra.mxu0 %v5180_v49  ;;  %v7616_v49 = vld [vmem:[#allocation39_spill] sm:$0xff] }
 0x1c0   : > { %3994 = vmatpush1.bf16.msra.mxu1 %v5184_v50  ;;  %3740 = vmatprep.subr.bf16.mxu0 %v5186_v54  ;;  %v7617_v50 = vld [vmem:[#allocation40_spill] sm:$0xff]  ;;  %v7618_v54 = vld [vmem:[#allocation41_spill] sm:$0xff] }
 0x1c1   : > { %3996 = vmatprep.subr.bf16.mxu1 %v5192_v59  ;;  %v366_v59 = vld [vmem:[#allocation5 + $0x48] sm:$0xff] }
 0x1c3   : > { %3742 = vmatpush1.bf16.msra.mxu0 %v5200_v5  ;;  %v7619_v5 = vld [vmem:[#allocation42_spill] sm:$0xff] }
 0x1c4   : > { %3998 = vmatpush1.bf16.msra.mxu1 %v5204_v7  ;;  %3744 = vmatprep.subr.bf16.mxu0 %v5206_v10  ;;  %v365_v7 = vld [vmem:[#allocation5 + $0x40] sm:$0xff]  ;;  %v7620_v10 = vld [vmem:[#allocation43_spill] sm:$0xff] }
 0x1c5   : > { %4000 = vmatprep.subr.bf16.mxu1 %v5212_v20  ;;  %v7621_v20 = vld [vmem:[#allocation44_spill] sm:$0xff] }
 0x1c7   : > { %3746 = vmatpush1.bf16.msra.mxu0 %v5220_v30  ;;  %v7622_v30 = vld [vmem:[#allocation45_spill] sm:$0xff] }
 0x1c8   : > { %4002 = vmatpush1.bf16.msra.mxu1 %v5224_v32  ;;  %3748 = vmatprep.subr.bf16.mxu0 %v5226_v37  ;;  %v374_v32 = vld [vmem:[#allocation5 + $0x88] sm:$0xff] }
 0x1c9   : > { %4004 = vmatprep.subr.bf16.mxu1 %v5232_v45  ;;  %v7623_v37 = vld [vmem:[#allocation46_spill] sm:$0xff]  ;;  %v373_v45 = vld [vmem:[#allocation5 + $0x80] sm:$0xff] }
 0x1cb   : > { %3750 = vmatpush1.bf16.msra.mxu0 %v7595_v27  ;;  %v7636_v27 = vld [vmem:[#allocation59_spill] sm:$0xff] }
 0x1cc   : > { %4006 = vmatpush1.bf16.msra.mxu1 %v7596_v31  ;;  %3752 = vmatprep.subr.bf16.mxu0 %v7597_v35  ;;  %v7637_v31 = vld [vmem:[#allocation60_spill] sm:$0xff]  ;;  %v7638_v35 = vld [vmem:[#allocation61_spill] sm:$0xff] }
 0x1cd   : > { %4008 = vmatprep.subr.bf16.mxu1 %v7598_v39  ;;  %v7639_v39 = vld [vmem:[#allocation62_spill] sm:$0xff] }
 0x1cf   : > { %3754 = vmatpush1.bf16.msra.mxu0 %v7599_v40  ;;  %v7640_v40 = vld [vmem:[#allocation63_spill] sm:$0xff] }
 0x1d0   : > { %4010 = vmatpush1.bf16.msra.mxu1 %v7600_v44  ;;  %3756 = vmatprep.subr.bf16.mxu0 %v7601_v51  ;;  %v7641_v44 = vld [vmem:[#allocation64_spill] sm:$0xff]  ;;  %v7642_v51 = vld [vmem:[#allocation65_spill] sm:$0xff] }
 0x1d1   : > { %4012 = vmatprep.subr.bf16.mxu1 %v7602_v52  ;;  %v7643_v52 = vld [vmem:[#allocation66_spill] sm:$0xff] }
 0x1d3   : > { %3758 = vmatpush1.bf16.msra.mxu0 %v7603_v53  ;;  %v7644_v53 = vld [vmem:[#allocation67_spill] sm:$0xff] }
 0x1d4   : > { %4014 = vmatpush1.bf16.msra.mxu1 %v7604_v57  ;;  %3760 = vmatprep.subr.bf16.mxu0 %v7605_v63  ;;  %v7645_v57 = vld [vmem:[#allocation68_spill] sm:$0xff]  ;;  %v7646_v63 = vld [vmem:[#allocation69_spill] sm:$0xff] }
 0x1d5   : > { %4016 = vmatprep.subr.bf16.mxu1 %v7606_v0  ;;  %v7647_v0 = vld [vmem:[#allocation70_spill] sm:$0xff] }
 0x1d7   : > { %3762 = vmatpush1.bf16.msra.mxu0 %v7607_v1  ;;  %v7648_v1 = vld [vmem:[#allocation71_spill] sm:$0xff] }
 0x1d8   : > { %4018 = vmatpush1.bf16.msra.mxu1 %v7608_v6  ;;  %3764 = vmatprep.subr.bf16.mxu0 %v7609_v15  ;;  %v7649_v6 = vld [vmem:[#allocation72_spill] sm:$0xff]  ;;  %v7650_v15 = vld [vmem:[#allocation73_spill] sm:$0xff] }
 0x1d9   : > { %4020 = vmatprep.subr.bf16.mxu1 %v7610_v16  ;;  %v7651_v16 = vld [vmem:[#allocation74_spill] sm:$0xff] }
 0x1db   : > { %3766 = vmatpush1.bf16.msra.mxu0 %v7611_v19  ;;  %v7652_v19 = vld [vmem:[#allocation75_spill] sm:$0xff] }
 0x1dc   : > { %4022 = vmatpush1.bf16.msra.mxu1 %v7612_v24  ;;  %3768 = vmatprep.subr.bf16.mxu0 %v7613_v33  ;;  %v7653_v24 = vld [vmem:[#allocation76_spill] sm:$0xff]  ;;  %v7654_v33 = vld [vmem:[#allocation77_spill] sm:$0xff] }
 0x1dd   : > { %4024 = vmatprep.subr.bf16.mxu1 %v7614_v34  ;;  %v7655_v34 = vld [vmem:[#allocation78_spill] sm:$0xff] }
 0x1df   : > { %3770 = vmatpush1.bf16.msra.mxu0 %v7615_v36  ;;  %v7656_v36 = vld [vmem:[#allocation79_spill] sm:$0xff] }
 0x1e0   : > { %4026 = vmatpush1.bf16.msra.mxu1 %v7616_v49  ;;  %3772 = vmatprep.subr.bf16.mxu0 %v7617_v50  ;;  %v7658_v49 = vld [vmem:[#allocation81_spill] sm:$0xff]  ;;  %v7659_v50 = vld [vmem:[#allocation82_spill] sm:$0xff] }
 0x1e1   : > { %4028 = vmatprep.subr.bf16.mxu1 %v7618_v54  ;;  %v7660_v54 = vld [vmem:[#allocation83_spill] sm:$0xff] }
 0x1e2   : > { %1790 = vmatmul.mubr.f32.vlgmr.msra.gmra.mrb[12].mxu0 %v357_v42 }
 0x1e3   : > { %3774 = vmatpush1.bf16.msra.mxu0 %v7619_v5  ;;  %2194 = vmatmul.mubr.f32.vlgmr.msra.gmra.mrb[12].mxu1 %v357_v42  ;;  %v7657_v42 = vld [vmem:[#allocation80_spill] sm:$0xff]  ;;  %v7662_v5 = vld [vmem:[#allocation85_spill] sm:$0xff] }
 0x1e4   : > { %4030 = vmatpush1.bf16.msra.mxu1 %v7620_v10  ;;  %3776 = vmatprep.subr.bf16.mxu0 %v7621_v20  ;;  %v7664_v10 = vld [vmem:[#allocation87_spill] sm:$0xff]  ;;  %v7665_v20 = vld [vmem:[#allocation88_spill] sm:$0xff] }
 0x1e5   : > { %4032 = vmatprep.subr.bf16.mxu1 %v7622_v30  ;;  %1795 = vmatprep.mubr.f32.mxu0 %v366_v59  ;;  %v7666_v30 = vld [vmem:[#allocation89_spill] sm:$0xff] }
 0x1e6   : > { %2199 = vmatprep.mubr.f32.mxu1 %v366_v59  ;;  %1796 = vmatmul.mubr.f32.gmra.mrb[14].mxu0 %v365_v7  ;;  %v7661_v59 = vld [vmem:[#allocation84_spill] sm:$0xff] }
 0x1e7   : > { %3778 = vmatpush1.bf16.msra.mxu0 %v7623_v37  ;;  %2200 = vmatmul.mubr.f32.gmra.mrb[14].mxu1 %v365_v7  ;;  %v7663_v7 = vld [vmem:[#allocation86_spill] sm:$0xff]  ;;  %v7668_v37 = vld [vmem:[#allocation91_spill] sm:$0xff] }
 0x1e8   : > { %4034 = vmatpush1.bf16.msra.mxu1 %v7624_v43  ;;  %3780 = vmatprep.subr.bf16.mxu0 %v7625_v48  ;;  %v7670_v43 = vld [vmem:[#allocation93_spill] sm:$0xff]  ;;  %v7671_v48 = vld [vmem:[#allocation94_spill] sm:$0xff] }
 0x1e9   : > { %4036 = vmatprep.subr.bf16.mxu1 %v7626_v29  ;;  %1801 = vmatprep.mubr.f32.mxu0 %v374_v32  ;;  %v7672_v29 = vld [vmem:[#allocation95_spill] sm:$0xff] }
 0x1ea   : > { %2205 = vmatprep.mubr.f32.mxu1 %v374_v32  ;;  %1802 = vmatmul.mubr.f32.gmra.mrb[16].mxu0 %v373_v45  ;;  %v7667_v32 = vld [vmem:[#allocation90_spill] sm:$0xff] }
 0x1eb   : > { %3782 = vmatpush1.bf16.msra.mxu0 %v7627_v58  ;;  %2206 = vmatmul.mubr.f32.gmra.mrb[16].mxu1 %v373_v45  ;;  %v7669_v45 = vld [vmem:[#allocation92_spill] sm:$0xff]  ;;  %v7674_v58 = vld [vmem:[#allocation97_spill] sm:$0xff] }
 0x1ec   : > { %4038 = vmatpush1.bf16.msra.mxu1 %v7628_v11  ;;  %3784 = vmatprep.subr.bf16.mxu0 %v7629_v23  ;;  %v7676_v11 = vld [vmem:[#allocation99_spill] sm:$0xff]  ;;  %v7677_v23 = vld [vmem:[#allocation100_spill] sm:$0xff] }
 0x1ed   : > { %4040 = vmatprep.subr.bf16.mxu1 %v7630_v55  ;;  %1807 = vmatprep.mubr.f32.mxu0 %v382_v25  ;;  %v7678_v55 = vld [vmem:[#allocation101_spill] sm:$0xff] }
 0x1ee   : > { %2211 = vmatprep.mubr.f32.mxu1 %v382_v25  ;;  %1808 = vmatmul.mubr.f32.gmra.mrb[18].mxu0 %v381_v12  ;;  %v7673_v25 = vld [vmem:[#allocation96_spill] sm:$0xff] }
 0x1ef   : > { %3786 = vmatpush1.bf16.msra.mxu0 %v7631_v4  ;;  %2212 = vmatmul.mubr.f32.gmra.mrb[18].mxu1 %v381_v12  ;;  %v7675_v12 = vld [vmem:[#allocation98_spill] sm:$0xff] }
 0x1f0   : > { %4042 = vmatpush1.bf16.msra.mxu1 %v5425_v60  ;;  %3788 = vmatprep.subr.bf16.mxu0 %v7632_v9  ;;  %v360_v60 = vld [vmem:[#allocation5 + $0x18] sm:$0xff]  ;;  %v7679_v4 = vld [vmem:[#allocation102_spill] sm:$0xff] }
 0x1f1   : > { %4044 = vmatprep.subr.bf16.mxu1 %v7633_v13  ;;  %1813 = vmatprep.mubr.f32.mxu0 %v390_v28  ;;  %v7681_v9 = vld [vmem:[#allocation104_spill] sm:$0xff] }
 0x1f2   : > { %2217 = vmatprep.mubr.f32.mxu1 %v390_v28  ;;  %1814 = vmatmul.mubr.f32.gmra.mrb[20].mxu0 %v389_v8  ;;  %v359_v28 = vld [vmem:[#allocation5 + $0x10] sm:$0xff]  ;;  %v368_v13 = vld [vmem:[#allocation5 + $0x58] sm:$0xff] }
 0x1f3   : > { %3790 = vmatpush1.bf16.msra.mxu0 %v7634_v18  ;;  %2218 = vmatmul.mubr.f32.gmra.mrb[20].mxu1 %v389_v8  ;;  %v7680_v8 = vld [vmem:[#allocation103_spill] sm:$0xff] }
 0x1f4   : > { %4046 = vmatpush1.bf16.msra.mxu1 %v7635_v26  ;;  %3792 = vmatprep.subr.bf16.mxu0 %v7636_v27  ;;  %v367_v18 = vld [vmem:[#allocation5 + $0x50] sm:$0xff]  ;;  %v7685_v27 = vld [vmem:[#allocation108_spill] sm:$0xff] }
 0x1f5   : > { %4048 = vmatprep.subr.bf16.mxu1 %v7637_v31  ;;  %1819 = vmatprep.mubr.f32.mxu0 %v398_v17  ;;  %v7684_v26 = vld [vmem:[#allocation107_spill] sm:$0xff]  ;;  %v376_v31 = vld [vmem:[#allocation5 + $0x98] sm:$0xff] }
 0x1f6   : > { %2223 = vmatprep.mubr.f32.mxu1 %v398_v17  ;;  %1820 = vmatmul.mubr.f32.gmra.mrb[22].mxu0 %v397_v22  ;;  %v7682_v17 = vld [vmem:[#allocation105_spill] sm:$0xff] }
 0x1f7   : > { %3794 = vmatpush1.bf16.msra.mxu0 %v7638_v35  ;;  %2224 = vmatmul.mubr.f32.gmra.mrb[22].mxu1 %v397_v22  ;;  %v7683_v22 = vld [vmem:[#allocation106_spill] sm:$0xff]  ;;  %v375_v35 = vld [vmem:[#allocation5 + $0x90] sm:$0xff] }
 0x1f8   : > { %4050 = vmatpush1.bf16.msra.mxu1 %v7639_v39  ;;  %3796 = vmatprep.subr.bf16.mxu0 %v7640_v40  ;;  %v7687_v39 = vld [vmem:[#allocation110_spill] sm:$0xff]  ;;  %v7688_v40 = vld [vmem:[#allocation111_spill] sm:$0xff] }
 0x1f9   : > { %4052 = vmatprep.subr.bf16.mxu1 %v7641_v44  ;;  %1890 = vmatprep.mubr.f32.mxu0 %v360_v60  ;;  %v7689_v44 = vld [vmem:[#allocation112_spill] sm:$0xff] }
 0x1fa   : > { %2294 = vmatprep.mubr.f32.mxu1 %v360_v60  ;;  %v7686_v60 = vld [vmem:[#allocation109_spill] sm:$0xff] }
 0x1fb   : > { %3798 = vmatpush1.bf16.msra.mxu0 %v7642_v51  ;;  %v384_v51 = vld [vmem:[#allocation5 + $0xd8] sm:$0xff] }
 0x1fc   : > { %4054 = vmatpush1.bf16.msra.mxu1 %v7643_v52  ;;  %3800 = vmatprep.subr.bf16.mxu0 %v7644_v53  ;;  %v7690_v52 = vld [vmem:[#allocation113_spill] sm:$0xff]  ;;  %v383_v53 = vld [vmem:[#allocation5 + $0xd0] sm:$0xff] }
 0x1fd   : > { %4056 = vmatprep.subr.bf16.mxu1 %v7645_v57  ;;  %v7691_v57 = vld [vmem:[#allocation114_spill] sm:$0xff] }
 0x1ff   : > { %3802 = vmatpush1.bf16.msra.mxu0 %v7646_v63  ;;  %v7692_v63 = vld [vmem:[#allocation115_spill] sm:$0xff] }
 0x200   : > { %4058 = vmatpush1.bf16.msra.mxu1 %v7647_v0  ;;  %3804 = vmatprep.subr.bf16.mxu0 %v7648_v1  ;;  %v7693_v0 = vld [vmem:[#allocation116_spill] sm:$0xff] }
 0x201   : > { %4060 = vmatprep.subr.bf16.mxu1 %v7649_v6  ;;  %v392_v1 = vld [vmem:[#allocation5 + $0x118] sm:$0xff]  ;;  %v7694_v6 = vld [vmem:[#allocation117_spill] sm:$0xff] }
 0x203   : > { %3806 = vmatpush1.bf16.msra.mxu0 %v7650_v15  ;;  %v391_v15 = vld [vmem:[#allocation5 + $0x110] sm:$0xff] }
 0x204   : > { %4062 = vmatpush1.bf16.msra.mxu1 %v7651_v16  ;;  %3808 = vmatprep.subr.bf16.mxu0 %v7652_v19  ;;  %v7695_v16 = vld [vmem:[#allocation118_spill] sm:$0xff]  ;;  %v7696_v19 = vld [vmem:[#allocation119_spill] sm:$0xff] }
 0x205   : > { %4064 = vmatprep.subr.bf16.mxu1 %v7653_v24  ;;  %v7697_v24 = vld [vmem:[#allocation120_spill] sm:$0xff] }
 0x207   : > { %3810 = vmatpush1.bf16.msra.mxu0 %v7654_v33  ;;  %v400_v33 = vld [vmem:[#allocation5 + $0x158] sm:$0xff] }
 0x208   : > { %4066 = vmatpush1.bf16.msra.mxu1 %v7655_v34  ;;  %3812 = vmatprep.subr.bf16.mxu0 %v7656_v36  ;;  %v7698_v34 = vld [vmem:[#allocation121_spill] sm:$0xff]  ;;  %v399_v36 = vld [vmem:[#allocation5 + $0x150] sm:$0xff] }
 0x209   : > { %4068 = vmatprep.subr.bf16.mxu1 %v7657_v42  ;;  %v7699_v42 = vld [vmem:[#allocation122_spill] sm:$0xff] }
 0x20b   : > { %3814 = vmatpush1.bf16.msra.mxu0 %v7658_v49  ;;  %v7700_v49 = vld [vmem:[#allocation123_spill] sm:$0xff] }
 0x20c   : > { %4070 = vmatpush1.bf16.msra.mxu1 %v7659_v50  ;;  %3816 = vmatprep.subr.bf16.mxu0 %v7660_v54  ;;  %v7701_v50 = vld [vmem:[#allocation124_spill] sm:$0xff]  ;;  %v362_v54 = vld [vmem:[#allocation5 + $0x28] sm:$0xff] }
 0x20d   : > { %4072 = vmatprep.subr.bf16.mxu1 %v7661_v59  ;;  %v7702_v59 = vld [vmem:[#allocation125_spill] sm:$0xff] }
 0x20f   : > { %3818 = vmatpush1.bf16.msra.mxu0 %v7662_v5  ;;  %v7703_v5 = vld [vmem:[#allocation126_spill] sm:$0xff] }
 0x210   : > { %4074 = vmatpush1.bf16.msra.mxu1 %v7663_v7  ;;  %3820 = vmatprep.subr.bf16.mxu0 %v7664_v10  ;;  %v7704_v7 = vld [vmem:[#allocation127_spill] sm:$0xff]  ;;  %v7705_v10 = vld [vmem:[#allocation128_spill] sm:$0xff] }
 0x211   : > { %4076 = vmatprep.subr.bf16.mxu1 %v7665_v20  ;;  %v7706_v20 = vld [vmem:[#allocation129_spill] sm:$0xff] }
 0x213   : > { %3822 = vmatpush1.bf16.msra.mxu0 %v7666_v30  ;;  %v7707_v30 = vld [vmem:[#allocation130_spill] sm:$0xff] }
 0x214   : > { %4078 = vmatpush1.bf16.msra.mxu1 %v7667_v32  ;;  %3824 = vmatprep.subr.bf16.mxu0 %v7668_v37  ;;  %v7708_v32 = vld [vmem:[#allocation131_spill] sm:$0xff]  ;;  %v7709_v37 = vld [vmem:[#allocation132_spill] sm:$0xff] }
 0x215   : > { %4080 = vmatprep.subr.bf16.mxu1 %v7669_v45  ;;  %v7710_v45 = vld [vmem:[#allocation133_spill] sm:$0xff] }
 0x217   : > { %3826 = vmatpush1.bf16.msra.mxu0 %v7670_v43  ;;  %v7711_v43 = vld [vmem:[#allocation134_spill] sm:$0xff] }
 0x218   : > { %4082 = vmatpush1.bf16.msra.mxu1 %v7671_v48  ;;  %3828 = vmatprep.subr.bf16.mxu0 %v7672_v29  ;;  %v7712_v48 = vld [vmem:[#allocation135_spill] sm:$0xff]  ;;  %v7713_v29 = vld [vmem:[#allocation136_spill] sm:$0xff] }
 0x219   : > { %4084 = vmatprep.subr.bf16.mxu1 %v7673_v25  ;;  %v7714_v25 = vld [vmem:[#allocation137_spill] sm:$0xff] }
 0x21b   : > { %3830 = vmatpush1.bf16.msra.mxu0 %v7674_v58  ;;  %v7715_v58 = vld [vmem:[#allocation138_spill] sm:$0xff] }
 0x21c   : > { %4086 = vmatpush1.bf16.msra.mxu1 %v7675_v12  ;;  %3832 = vmatprep.subr.bf16.mxu0 %v7676_v11  ;;  %v7716_v12 = vld [vmem:[#allocation139_spill] sm:$0xff]  ;;  %v7717_v11 = vld [vmem:[#allocation140_spill] sm:$0xff] }
 0x21d   : > { %4088 = vmatprep.subr.bf16.mxu1 %v7677_v23  ;;  %v7718_v23 = vld [vmem:[#allocation141_spill] sm:$0xff] }
 0x21f   : > { %3834 = vmatpush1.bf16.msra.mxu0 %v7678_v55  ;;  %v7719_v55 = vld [vmem:[#allocation142_spill] sm:$0xff] }
 0x220   : > { %4090 = vmatpush1.bf16.msra.mxu1 %v7679_v4  ;;  %3836 = vmatprep.subr.bf16.mxu0 %v7680_v8  ;;  %v7721_v4 = vld [vmem:[#allocation144_spill] sm:$0xff]  ;;  %v7722_v8 = vld [vmem:[#allocation145_spill] sm:$0xff] }
 0x221   : > { %4092 = vmatprep.subr.bf16.mxu1 %v7681_v9  ;;  %v7723_v9 = vld [vmem:[#allocation146_spill] sm:$0xff] }
 0x222   : > { %1891 = vmatmul.mubr.f32.vlgmr.msra.gmra.mrb[12].mxu0 %v359_v28 }
 0x223   : > { %3838 = vmatpush1.bf16.msra.mxu0 %v7682_v17  ;;  %2295 = vmatmul.mubr.f32.vlgmr.msra.gmra.mrb[12].mxu1 %v359_v28  ;;  %v7720_v28 = vld [vmem:[#allocation143_spill] sm:$0xff]  ;;  %v7725_v17 = vld [vmem:[#allocation148_spill] sm:$0xff] }
 0x224   : > { %4094 = vmatpush1.bf16.msra.mxu1 %v7683_v22  ;;  %3840 = vmatprep.subr.bf16.mxu0 %v7684_v26  ;;  %v7727_v22 = vld [vmem:[#allocation150_spill] sm:$0xff]  ;;  %v7728_v26 = vld [vmem:[#allocation151_spill] sm:$0xff] }
 0x225   : > { %4096 = vmatprep.subr.bf16.mxu1 %v7685_v27  ;;  %1896 = vmatprep.mubr.f32.mxu0 %v368_v13  ;;  %v7729_v27 = vld [vmem:[#allocation152_spill] sm:$0xff] }
 0x226   : > { %2300 = vmatprep.mubr.f32.mxu1 %v368_v13  ;;  %1897 = vmatmul.mubr.f32.gmra.mrb[14].mxu0 %v367_v18  ;;  %v7724_v13 = vld [vmem:[#allocation147_spill] sm:$0xff] }
 0x227   : > { %3842 = vmatpush1.bf16.msra.mxu0 %v7686_v60  ;;  %2301 = vmatmul.mubr.f32.gmra.mrb[14].mxu1 %v367_v18  ;;  %v7726_v18 = vld [vmem:[#allocation149_spill] sm:$0xff]  ;;  %v7731_v60 = vld [vmem:[#allocation154_spill] sm:$0xff] }
 0x228   : > { %4098 = vmatpush1.bf16.msra.mxu1 %v7687_v39  ;;  %3844 = vmatprep.subr.bf16.mxu0 %v7688_v40  ;;  %v7733_v39 = vld [vmem:[#allocation156_spill] sm:$0xff]  ;;  %v7734_v40 = vld [vmem:[#allocation157_spill] sm:$0xff] }
 0x229   : > { %4100 = vmatprep.subr.bf16.mxu1 %v7689_v44  ;;  %1902 = vmatprep.mubr.f32.mxu0 %v376_v31  ;;  %v7735_v44 = vld [vmem:[#allocation158_spill] sm:$0xff] }
 0x22a   : > { %2306 = vmatprep.mubr.f32.mxu1 %v376_v31  ;;  %1903 = vmatmul.mubr.f32.gmra.mrb[16].mxu0 %v375_v35  ;;  %v7730_v31 = vld [vmem:[#allocation153_spill] sm:$0xff] }
 0x22b   : > { %3846 = vmatpush1.bf16.msra.mxu0 %v7690_v52  ;;  %2307 = vmatmul.mubr.f32.gmra.mrb[16].mxu1 %v375_v35  ;;  %v7732_v35 = vld [vmem:[#allocation155_spill] sm:$0xff]  ;;  %v7737_v52 = vld [vmem:[#allocation160_spill] sm:$0xff] }
 0x22c   : > { %4102 = vmatpush1.bf16.msra.mxu1 %v7691_v57  ;;  %3848 = vmatprep.subr.bf16.mxu0 %v7692_v63  ;;  %v7739_v57 = vld [vmem:[#allocation162_spill] sm:$0xff]  ;;  %v7740_v63 = vld [vmem:[#allocation163_spill] sm:$0xff] }
 0x22d   : > { %4104 = vmatprep.subr.bf16.mxu1 %v7693_v0  ;;  %1908 = vmatprep.mubr.f32.mxu0 %v384_v51  ;;  %v7741_v0 = vld [vmem:[#allocation164_spill] sm:$0xff] }
 0x22e   : > { %2312 = vmatprep.mubr.f32.mxu1 %v384_v51  ;;  %1909 = vmatmul.mubr.f32.gmra.mrb[18].mxu0 %v383_v53  ;;  %v7736_v51 = vld [vmem:[#allocation159_spill] sm:$0xff] }
 0x22f   : > { %3850 = vmatpush1.bf16.msra.mxu0 %v7694_v6  ;;  %2313 = vmatmul.mubr.f32.gmra.mrb[18].mxu1 %v383_v53  ;;  %v7738_v53 = vld [vmem:[#allocation161_spill] sm:$0xff] }
 0x230   : > { %4106 = vmatpush1.bf16.msra.mxu1 %v7695_v16  ;;  %3852 = vmatprep.subr.bf16.mxu0 %v7696_v19  ;;  %v361_v6 = vld [vmem:[#allocation5 + $0x20] sm:$0xff]  ;;  %v7744_v16 = vld [vmem:[#allocation167_spill] sm:$0xff]  ;;  %v7745_v19 = vld [vmem:[#allocation168_spill] sm:$0xff] }
 0x231   : > { %4108 = vmatprep.subr.bf16.mxu1 %v7697_v24  ;;  %1914 = vmatprep.mubr.f32.mxu0 %v392_v1  ;;  %v370_v24 = vld [vmem:[#allocation5 + $0x68] sm:$0xff] }
 0x232   : > { %2318 = vmatprep.mubr.f32.mxu1 %v392_v1  ;;  %1915 = vmatmul.mubr.f32.gmra.mrb[20].mxu0 %v391_v15  ;;  %v7742_v1 = vld [vmem:[#allocation165_spill] sm:$0xff] }
 0x233   : > { %3854 = vmatpush1.bf16.msra.mxu0 %v7698_v34  ;;  %2319 = vmatmul.mubr.f32.gmra.mrb[20].mxu1 %v391_v15  ;;  %v7743_v15 = vld [vmem:[#allocation166_spill] sm:$0xff]  ;;  %v369_v34 = vld [vmem:[#allocation5 + $0x60] sm:$0xff] }
 0x234   : > { %4110 = vmatpush1.bf16.msra.mxu1 %v7699_v42  ;;  %3856 = vmatprep.subr.bf16.mxu0 %v7700_v49  ;;  %v7748_v42 = vld [vmem:[#allocation171_spill] sm:$0xff]  ;;  %v7749_v49 = vld [vmem:[#allocation172_spill] sm:$0xff] }
 0x235   : > { %4112 = vmatprep.subr.bf16.mxu1 %v7701_v50  ;;  %1920 = vmatprep.mubr.f32.mxu0 %v400_v33  ;;  %v378_v50 = vld [vmem:[#allocation5 + $0xa8] sm:$0xff] }
 0x236   : > { %2324 = vmatprep.mubr.f32.mxu1 %v400_v33  ;;  %1921 = vmatmul.mubr.f32.gmra.mrb[22].mxu0 %v399_v36  ;;  %v7746_v33 = vld [vmem:[#allocation169_spill] sm:$0xff] }
 0x237   : > { %3858 = vmatpush1.bf16.msra.mxu0 %v7702_v59  ;;  %2325 = vmatmul.mubr.f32.gmra.mrb[22].mxu1 %v399_v36  ;;  %v7747_v36 = vld [vmem:[#allocation170_spill] sm:$0xff]  ;;  %v377_v59 = vld [vmem:[#allocation5 + $0xa0] sm:$0xff] }
 0x238   : > { %4114 = vmatpush1.bf16.msra.mxu1 %v7703_v5  ;;  %3860 = vmatprep.subr.bf16.mxu0 %v7704_v7  ;;  %v7751_v5 = vld [vmem:[#allocation174_spill] sm:$0xff]  ;;  %v7752_v7 = vld [vmem:[#allocation175_spill] sm:$0xff] }
 0x239   : > { %4116 = vmatprep.subr.bf16.mxu1 %v7705_v10  ;;  %1991 = vmatprep.mubr.f32.mxu0 %v362_v54  ;;  %v7753_v10 = vld [vmem:[#allocation176_spill] sm:$0xff] }
 0x23a   : > { %2395 = vmatprep.mubr.f32.mxu1 %v362_v54  ;;  %v7750_v54 = vld [vmem:[#allocation173_spill] sm:$0xff] }
 0x23b   : > { %3862 = vmatpush1.bf16.msra.mxu0 %v7706_v20  ;;  %v386_v20 = vld [vmem:[#allocation5 + $0xe8] sm:$0xff] }
 0x23c   : > { %4118 = vmatpush1.bf16.msra.mxu1 %v7707_v30  ;;  %3864 = vmatprep.subr.bf16.mxu0 %v7708_v32  ;;  %v7754_v30 = vld [vmem:[#allocation177_spill] sm:$0xff] }
 0x23d   : > { %4120 = vmatprep.subr.bf16.mxu1 %v7709_v37  ;;  %v385_v32 = vld [vmem:[#allocation5 + $0xe0] sm:$0xff]  ;;  %v7755_v37 = vld [vmem:[#allocation178_spill] sm:$0xff] }
 0x23f   : > { %3866 = vmatpush1.bf16.msra.mxu0 %v7710_v45  ;;  %v7756_v45 = vld [vmem:[#allocation179_spill] sm:$0xff] }
 0x240   : > { %4122 = vmatpush1.bf16.msra.mxu1 %v7711_v43  ;;  %3868 = vmatprep.subr.bf16.mxu0 %v7712_v48  ;;  %v7757_v43 = vld [vmem:[#allocation180_spill] sm:$0xff]  ;;  %v394_v48 = vld [vmem:[#allocation5 + $0x128] sm:$0xff] }
 0x241   : > { %4124 = vmatprep.subr.bf16.mxu1 %v7713_v29  ;;  %v7758_v29 = vld [vmem:[#allocation181_spill] sm:$0xff] }
 0x243   : > { %3870 = vmatpush1.bf16.msra.mxu0 %v7714_v25  ;;  %v393_v25 = vld [vmem:[#allocation5 + $0x120] sm:$0xff] }
 0x244   : > { %4126 = vmatpush1.bf16.msra.mxu1 %v7715_v58  ;;  %3872 = vmatprep.subr.bf16.mxu0 %v7716_v12  ;;  %v7759_v58 = vld [vmem:[#allocation182_spill] sm:$0xff]  ;;  %v7760_v12 = vld [vmem:[#allocation183_spill] sm:$0xff] }
 0x245   : > { %4128 = vmatprep.subr.bf16.mxu1 %v7717_v11  ;;  %v7761_v11 = vld [vmem:[#allocation184_spill] sm:$0xff] }
 0x247   : > { %3874 = vmatpush1.bf16.msra.mxu0 %v7718_v23  ;;  %v402_v23 = vld [vmem:[#allocation5 + $0x168] sm:$0xff] }
 0x248   : > { %4130 = vmatpush1.bf16.msra.mxu1 %v7719_v55  ;;  %3876 = vmatprep.subr.bf16.mxu0 %v7720_v28  ;;  %v7762_v55 = vld [vmem:[#allocation185_spill] sm:$0xff] }
 0x249   : > { %4132 = vmatprep.subr.bf16.mxu1 %v7721_v4  ;;  %v401_v28 = vld [vmem:[#allocation5 + $0x160] sm:$0xff]  ;;  %v7763_v4 = vld [vmem:[#allocation186_spill] sm:$0xff] }
 0x24b   : > { %3878 = vmatpush1.bf16.msra.mxu0 %v7722_v8  ;;  %v7764_v8 = vld [vmem:[#allocation187_spill] sm:$0xff] }
 0x24c   : > { %4134 = vmatpush1.bf16.msra.mxu1 %v7723_v9  ;;  %3880 = vmatprep.subr.bf16.mxu0 %v7724_v13 }
 0x24d   : > { %4136 = vmatprep.subr.bf16.mxu1 %v7725_v17 }
 0x24f   : > { %3882 = vmatpush1.bf16.msra.mxu0 %v7726_v18 }
 0x250   : > { %4138 = vmatpush1.bf16.msra.mxu1 %v7727_v22  ;;  %3884 = vmatprep.subr.bf16.mxu0 %v7728_v26  ;;  %v364_v22 = vld [vmem:[#allocation5 + $0x38] sm:$0xff] }
 0x251   : > { %4140 = vmatprep.subr.bf16.mxu1 %v7729_v27 }
 0x253   : > { %3886 = vmatpush1.bf16.msra.mxu0 %v7730_v31 }
 0x254   : > { %4142 = vmatpush1.bf16.msra.mxu1 %v7731_v60  ;;  %3888 = vmatprep.subr.bf16.mxu0 %v7732_v35  ;;  %v7765_v60 = vld [vmem:[#allocation188_spill] sm:$0xff] }
 0x255   : > { %4144 = vmatprep.subr.bf16.mxu1 %v7733_v39  ;;  %v7766_v39 = vld [vmem:[#allocation189_spill] sm:$0xff] }
 0x257   : > { %3890 = vmatpush1.bf16.msra.mxu0 %v7734_v40  ;;  %v7767_v40 = vld [vmem:[#allocation190_spill] sm:$0xff] }
 0x258   : > { %4146 = vmatpush1.bf16.msra.mxu1 %v7735_v44  ;;  %3892 = vmatprep.subr.bf16.mxu0 %v7736_v51  ;;  %v7768_v51 = vld [vmem:[#allocation191_spill] sm:$0xff] }
 0x259   : > { %4148 = vmatprep.subr.bf16.mxu1 %v7737_v52 }
 0x25b   : > { %3894 = vmatpush1.bf16.msra.mxu0 %v7738_v53 }
 0x25c   : > { %4150 = vmatpush1.bf16.msra.mxu1 %v7739_v57  ;;  %3896 = vmatprep.subr.bf16.mxu0 %v7740_v63 }
 0x25d   : > { %4152 = vmatprep.subr.bf16.mxu1 %v7741_v0 }
 0x25f   : > { %3898 = vmatpush1.bf16.msra.mxu0 %v7742_v1 }
 0x260   : > { %4154 = vmatpush1.bf16.msra.mxu1 %v7743_v15  ;;  %3900 = vmatprep.subr.bf16.mxu0 %v7744_v16  ;;  %v7769_v15 = vld [vmem:[#allocation192_spill] sm:$0xff] }
 0x261   : > { %4156 = vmatprep.subr.bf16.mxu1 %v7745_v19  ;;  %v7770_v19 = vld [vmem:[#allocation193_spill] sm:$0xff] }
 0x262   : > { %1992 = vmatmul.mubr.f32.vlgmr.msra.gmra.mrb[12].mxu0 %v361_v6 }
 0x263   : > { %3902 = vmatpush1.bf16.msra.mxu0 %v7746_v33  ;;  %2396 = vmatmul.mubr.f32.vlgmr.msra.gmra.mrb[12].mxu1 %v361_v6 }
 0x264   : > { %4158 = vmatpush1.bf16.msra.mxu1 %v7747_v36  ;;  %3904 = vmatprep.subr.bf16.mxu0 %v7748_v42 }
 0x265   : > { %4160 = vmatprep.subr.bf16.mxu1 %v7749_v49  ;;  %1997 = vmatprep.mubr.f32.mxu0 %v370_v24 }
 0x266   : > { %2401 = vmatprep.mubr.f32.mxu1 %v370_v24  ;;  %1998 = vmatmul.mubr.f32.gmra.mrb[14].mxu0 %v369_v34  ;;  %v7771_v24 = vld [vmem:[#allocation194_spill] sm:$0xff] }
 0x267   : > { %3906 = vmatpush1.bf16.msra.mxu0 %v7750_v54  ;;  %2402 = vmatmul.mubr.f32.gmra.mrb[14].mxu1 %v369_v34  ;;  %v7772_v34 = vld [vmem:[#allocation195_spill] sm:$0xff] }
 0x268   : > { %4162 = vmatpush1.bf16.msra.mxu1 %v7751_v5  ;;  %3908 = vmatprep.subr.bf16.mxu0 %v7752_v7  ;;  %v7773_v7 = vld [vmem:[#allocation196_spill] sm:$0xff] }
 0x269   : > { %4164 = vmatprep.subr.bf16.mxu1 %v7753_v10  ;;  %2003 = vmatprep.mubr.f32.mxu0 %v378_v50 }
 0x26a   : > { %2407 = vmatprep.mubr.f32.mxu1 %v378_v50  ;;  %2004 = vmatmul.mubr.f32.gmra.mrb[16].mxu0 %v377_v59 }
 0x26b   : > { %3910 = vmatpush1.bf16.msra.mxu0 %v7754_v30  ;;  %2408 = vmatmul.mubr.f32.gmra.mrb[16].mxu1 %v377_v59  ;;  %v7774_v30 = vld [vmem:[#allocation197_spill] sm:$0xff] }
 0x26c   : > { %4166 = vmatpush1.bf16.msra.mxu1 %v7755_v37  ;;  %3912 = vmatprep.subr.bf16.mxu0 %v7756_v45 }
 0x26d   : > { %4168 = vmatprep.subr.bf16.mxu1 %v7757_v43  ;;  %2009 = vmatprep.mubr.f32.mxu0 %v386_v20  ;;  %v7776_v43 = vld [vmem:[#allocation199_spill] sm:$0xff] }
 0x26e   : > { %2413 = vmatprep.mubr.f32.mxu1 %v386_v20  ;;  %2010 = vmatmul.mubr.f32.gmra.mrb[18].mxu0 %v385_v32 }
 0x26f   : > { %3914 = vmatpush1.bf16.msra.mxu0 %v7758_v29  ;;  %2414 = vmatmul.mubr.f32.gmra.mrb[18].mxu1 %v385_v32  ;;  %v7775_v32 = vld [vmem:[#allocation198_spill] sm:$0xff] }
 0x270   : > { %4170 = vmatpush1.bf16.msra.mxu1 %v7759_v58  ;;  %3916 = vmatprep.subr.bf16.mxu0 %v7760_v12 }
 0x271   : > { %4172 = vmatprep.subr.bf16.mxu1 %v7761_v11  ;;  %2015 = vmatprep.mubr.f32.mxu0 %v394_v48  ;;  %v7777_v11 = vld [vmem:[#allocation200_spill] sm:$0xff] }
 0x272   : > { %2419 = vmatprep.mubr.f32.mxu1 %v394_v48  ;;  %2016 = vmatmul.mubr.f32.gmra.mrb[20].mxu0 %v393_v25 }
 0x273   : > { %3918 = vmatpush1.bf16.msra.mxu0 %v7762_v55  ;;  %2420 = vmatmul.mubr.f32.gmra.mrb[20].mxu1 %v393_v25  ;;  %v7779_v55 = vld [vmem:[#allocation202_spill] sm:$0xff] }
 0x274   : > { %4174 = vmatpush1.bf16.msra.mxu1 %v7763_v4  ;;  %3920 = vmatprep.subr.bf16.mxu0 %v7764_v8 }
 0x275   : > { %v1286_v9 = vpop.f32.mrb[0].mxu0  ;;  %4176 = vmatprep.subr.bf16.mxu1 %v6092_v3  ;;  %2021 = vmatprep.mubr.f32.mxu0 %v402_v23 }
 0x276   : > { %v2533_v13 = vmul.f32 %v1286_v9, %v1286_v9  ;;  %v1690_v17 = vpop.f32.mrb[0].mxu1  ;;  %v1288_v18 = vpop.f32.mrb[1].mxu0  ;;  %2425 = vmatprep.mubr.f32.mxu1 %v402_v23  ;;  %2022 = vmatmul.mubr.f32.gmra.mrb[22].mxu0 %v401_v28  ;;  %v7778_v23 = vld [vmem:[#allocation201_spill] sm:$0xff]  ;;  %v7780_v9 = vld [vmem:[#allocation203_spill] sm:$0xff] }
 0x277   : > { %v2545_v26 = vmul.f32 %v1690_v17, %v1690_v17  ;;  %v2534_v27 = vmul.f32 %v1288_v18, %v1288_v18  ;;  %v1692_v31 = vpop.f32.mrb[1].mxu1  ;;  %3922 = vmatpush1.bf16.msra.mxu0 %v7765_v60  ;;  %2426 = vmatmul.mubr.f32.gmra.mrb[22].mxu1 %v401_v28 }
 0x278   : > { %v2546_v35 = vmul.f32 %v1692_v31, %v1692_v31  ;;  %4178 = vmatpush1.bf16.msra.mxu1 %v7766_v39  ;;  %3924 = vmatprep.subr.bf16.mxu0 %v7767_v40  ;;  %v7781_v31 = vld [vmem:[#allocation204_spill] sm:$0xff]  ;;  %v7782_v39 = vld [vmem:[#allocation205_spill] sm:$0xff]  ;;  %v7783_v40 = vld [vmem:[#allocation206_spill] sm:$0xff] }
 0x279   : > { %v6522_v44 = vadd.f32 %v2545_v26, %v2533_v13  ;;  %v1292_v3 = vpop.f32.mrb[2].mxu0  ;;  %4180 = vmatprep.subr.bf16.mxu1 %v7768_v51  ;;  %2092 = vmatprep.mubr.f32.mxu0 %v364_v22 }
 0x27a   : > { %v6525_v52 = vadd.f32 %v2546_v35, %v2534_v27  ;;  %v1696_v53 = vpop.f32.mrb[2].mxu1  ;;  %v1294_v57 = vpop.f32.mrb[3].mxu0  ;;  %2496 = vmatprep.mubr.f32.mxu1 %v364_v22  ;;  %v2535_v63 = vmul.f32 %v1292_v3, %v1292_v3 }
 0x27b   : > { %v2547_v0 = vmul.f32 %v1696_v53, %v1696_v53  ;;  %v2536_v1 = vmul.f32 %v1294_v57, %v1294_v57  ;;  %v1698_v6 = vpop.f32.mrb[3].mxu1  ;;  %3926 = vmatpush1.bf16.msra.mxu0 %v7769_v15  ;;  %v7784_v57 = vld [vmem:[#allocation207_spill] sm:$0xff] }
 0x27c   : > { %v2548_v16 = vmul.f32 %v1698_v6, %v1698_v6  ;;  %4182 = vmatpush1.bf16.msra.mxu1 %v7770_v19  ;;  %3928 = vmatprep.subr.bf16.mxu0 %v7771_v24  ;;  %v7785_v19 = vld [vmem:[#allocation208_spill] sm:$0xff] }
 0x27d   : > { %v1298_v33 = vpop.f32.mrb[4].mxu0  ;;  %4184 = vmatprep.subr.bf16.mxu1 %v7772_v34  ;;  %v6531_v49 = vadd.f32 %v2547_v0, %v2535_v63  ;;  %v7787_v34 = vld [vmem:[#allocation210_spill] sm:$0xff] }
 0x27e   : > { %v1702_v36 = vpop.f32.mrb[4].mxu1  ;;  %v1300_v42 = vpop.f32.mrb[5].mxu0  ;;  %v6533_v50 = vadd.f32 %v2548_v16, %v2536_v1  ;;  %v2537_v54 = vmul.f32 %v1298_v33, %v1298_v33  ;;  %v7786_v33 = vld [vmem:[#allocation209_spill] sm:$0xff] }
 0x27f   : > { %v2549_v59 = vmul.f32 %v1702_v36, %v1702_v36  ;;  %v1704_v5 = vpop.f32.mrb[5].mxu1  ;;  %3930 = vmatpush1.bf16.msra.mxu0 %v7773_v7  ;;  %v2538_v10 = vmul.f32 %v1300_v42, %v1300_v42  ;;  %v7789_v7 = vld [vmem:[#allocation212_spill] sm:$0xff] }
 0x280   : > { %v2550_v20 = vmul.f32 %v1704_v5, %v1704_v5  ;;  %4186 = vmatpush1.bf16.msra.mxu1 %v7774_v30  ;;  %3932 = vmatprep.subr.bf16.mxu0 %v7775_v32  ;;  %v7792_v30 = vld [vmem:[#allocation215_spill] sm:$0xff]  ;;  %v7793_v32 = vld [vmem:[#allocation216_spill] sm:$0xff] }
 0x281   : > { %v6538_v37 = vadd.f32 %v2549_v59, %v2537_v54  ;;  %v1304_v45 = vpop.f32.mrb[6].mxu0  ;;  %4188 = vmatprep.subr.bf16.mxu1 %v7776_v43  ;;  %v7788_v54 = vld [vmem:[#allocation211_spill] sm:$0xff]  ;;  %v7795_v43 = vld [vmem:[#allocation218_spill] sm:$0xff] }
 0x282   : > { %v6541_v48 = vadd.f32 %v2550_v20, %v2538_v10  ;;  %v1708_v29 = vpop.f32.mrb[6].mxu1  ;;  %v1306_v25 = vpop.f32.mrb[7].mxu0  ;;  %v2539_v58 = vmul.f32 %v1304_v45, %v1304_v45  ;;  %v7790_v10 = vld [vmem:[#allocation213_spill] sm:$0xff]  ;;  %v7791_v20 = vld [vmem:[#allocation214_spill] sm:$0xff] }
 0x283   : > { %v1710_v12 = vpop.f32.mrb[7].mxu1  ;;  %3934 = vmatpush1.bf16.msra.mxu0 %v7777_v11  ;;  %v2551_v28 = vmul.f32 %v1708_v29, %v1708_v29  ;;  %v2540_v4 = vmul.f32 %v1306_v25, %v1306_v25  ;;  %v7794_v45 = vld [vmem:[#allocation217_spill] sm:$0xff]  ;;  %v7796_v29 = vld [vmem:[#allocation219_spill] sm:$0xff]  ;;  %v6588_v11 = vmax.f32 %v6531_v49, 1e-07 }
 0x284   : > { %4190 = vmatpush1.bf16.msra.mxu1 %v7778_v23  ;;  %3936 = vmatprep.subr.bf16.mxu0 %v7779_v55  ;;  %v2552_v13 = vmul.f32 %v1710_v12, %v1710_v12  ;;  %v363_v25 = vld [vmem:[#allocation5 + $0x30] sm:$0xff]  ;;  %v2570_v12 = vmax.f32 %v6525_v52, 1e-07  ;;  %v6591_v23 = vmax.f32 %v6533_v50, 1e-07 }
 0x285   : > { %v1310_v8 = vpop.f32.mrb[8].mxu0  ;;  %4192 = vmatprep.subr.bf16.mxu1 %v7780_v9  ;;  %v6547_v26 = vadd.f32 %v2551_v28, %v2539_v58  ;;  %v2569_v58 = vmax.f32 %v6522_v44, 1e-07  ;;  %v6594_v55 = vmax.f32 %v6538_v37, 1e-07  ;;  %vm2597_vm4 = vcmp.eq.f32.partialorder %v6588_v11, inf }
 0x286   : > { %v2541_v17 = vmul.f32 %v1310_v8, %v1310_v8  ;;  %v1714_v18 = vpop.f32.mrb[8].mxu1  ;;  %v1312_v22 = vpop.f32.mrb[9].mxu0  ;;  %v6550_v60 = vadd.f32 %v2552_v13, %v2540_v4  ;;  %v6598_v28 = vmax.f32 %v6541_v48, 1e-07  ;;  %vm2590_vm1 = vcmp.eq.f32.partialorder %v2570_v12, inf }
 0x287   : > { %v1716_v27 = vpop.f32.mrb[9].mxu1  ;;  %3938 = vmatpush1.bf16.msra.mxu0 %v7781_v31  ;;  %v2553_v35 = vmul.f32 %v1714_v18, %v1714_v18  ;;  %v2542_v3 = vmul.f32 %v1312_v22, %v1312_v22  ;;  %4463 = vrsqrt.f32 %v2569_v58  ;;  %v6602_v44 = vmax.f32 %v6547_v26, 1e-07 }
 0x288   : > { %4194 = vmatpush1.bf16.msra.mxu1 %v7782_v39  ;;  %3940 = vmatprep.subr.bf16.mxu0 %v7783_v40  ;;  %v2554_v51 = vmul.f32 %v1716_v27, %v1716_v27  ;;  %4465 = vrsqrt.f32 %v2570_v12  ;;  %v6606_v52 = vmax.f32 %v6550_v60, 1e-07  ;;  %vm2583_vm0 = vcmp.eq.f32.partialorder %v2569_v58, inf }
 0x289   : > { %v1316_v53 = vpop.f32.mrb[10].mxu0  ;;  %4196 = vmatprep.subr.bf16.mxu1 %v7784_v57  ;;  %v6555_v63 = vadd.f32 %v2553_v35, %v2541_v17  ;;  %4467 = vrsqrt.f32 %v6588_v11  ;;  %v2586_v26 = vand.u32 2147483648, %v2569_v58  ;;  %vm2585_vm2 = vcmp.eq.f32.partialorder %v2569_v58, 0.0 }
 0x28a   : > { %v2543_v0 = vmul.f32 %v1316_v53, %v1316_v53  ;;  %v1720_v1 = vpop.f32.mrb[10].mxu1  ;;  %v1318_v6 = vpop.f32.mrb[11].mxu0  ;;  %v6557_v15 = vadd.f32 %v2554_v51, %v2542_v3  ;;  %4469 = vrsqrt.f32 %v6591_v23  ;;  %v2593_v60 = vand.u32 2147483648, %v2570_v12 }
 0x28b   : > { %v1722_v16 = vpop.f32.mrb[11].mxu1  ;;  %3942 = vmatpush1.bf16.msra.mxu0 %v7785_v19  ;;  %v2555_v24 = vmul.f32 %v1720_v1, %v1720_v1  ;;  %v2544_v36 = vmul.f32 %v1318_v6, %v1318_v6  ;;  %4471 = vrsqrt.f32 %v6594_v55  ;;  %v6610_v50 = vmax.f32 %v6555_v63, 1e-07 }
 0x28c   : > { %4198 = vmatpush1.bf16.msra.mxu1 %v7786_v33  ;;  %3944 = vmatprep.subr.bf16.mxu0 %v7787_v34  ;;  %v2556_v42 = vmul.f32 %v1722_v16, %v1722_v16  ;;  %4473 = vrsqrt.f32 %v6598_v28  ;;  %v6613_v48 = vmax.f32 %v6557_v15, 1e-07  ;;  %vm2592_vm3 = vcmp.eq.f32.partialorder %v2570_v12, 0.0 }
 0x28d   : > { %4200 = vmatprep.subr.bf16.mxu1 %v7788_v54  ;;  %v6563_v59 = vadd.f32 %v2555_v24, %v2543_v0  ;;  %4475 = vrsqrt.f32 %v6602_v44  ;;  %vm2599_vm5 = vcmp.eq.f32.partialorder %v6588_v11, 0.0  ;;  %v2600_v57 = vand.u32 2147483648, %v6588_v11 }
 0x28e   : > { %v6565_v5 = vadd.f32 %v2556_v42, %v2544_v36  ;;  %4477 = vrsqrt.f32 %v6606_v52  ;;  %vm2604_vm6 = vcmp.eq.f32.partialorder %v6591_v23, inf  ;;  %vm2606_vm7 = vcmp.eq.f32.partialorder %v6591_v23, 0.0 }
 0x28f   : > { %3946 = vmatpush1.bf16.msra.mxu0 %v7789_v7  ;;  %4479 = vrsqrt.f32 %v6610_v50  ;;  %v6619_v9 = vmax.f32 %v6563_v59, 1e-07  ;;  %v2607_v6 = vand.u32 2147483648, %v6591_v23  ;;  %vm2611_vm8 = vcmp.eq.f32.partialorder %v6594_v55, inf }
 0x290   : > { %4202 = vmatpush1.bf16.msra.mxu1 %v7790_v10  ;;  %3948 = vmatprep.subr.bf16.mxu0 %v7791_v20  ;;  %4481 = vrsqrt.f32 %v6613_v48  ;;  %v6623_v17 = vmax.f32 %v6565_v5, 1e-07  ;;  %v2614_v24 = vand.u32 2147483648, %v6594_v55  ;;  %vm2613_vm9 = vcmp.eq.f32.partialorder %v6594_v55, 0.0 }
 0x291   : > { %4204 = vmatprep.subr.bf16.mxu1 %v7792_v30  ;;  %v4464_v49 = vpop.eup %4463  ;;  %4483 = vrsqrt.f32 %v6619_v9  ;;  %vm2618_vm10 = vcmp.eq.f32.partialorder %v6598_v28, inf  ;;  %vm2620_vm11 = vcmp.eq.f32.partialorder %v6598_v28, 0.0  ;;  %v2621_v54 = vand.u32 2147483648, %v6598_v28 }
 0x292   : > { %v4466_v37 = vpop.eup %4465  ;;  %v2582_v4 = vmul.f32 %v4464_v49, %v2569_v58  ;;  %4485 = vrsqrt.f32 %v6623_v17  ;;  %vm2625_vm12 = vcmp.eq.f32.partialorder %v6602_v44, inf  ;;  %vm2627_vm13 = vcmp.eq.f32.partialorder %v6602_v44, 0.0 }
 0x293   : > { %3950 = vmatpush1.bf16.msra.mxu0 %v7793_v32  ;;  %v2589_v8 = vmul.f32 %v4466_v37, %v2570_v12  ;;  %v4468_v13 = vpop.eup %4467  ;;  %v2628_v30 = vand.u32 2147483648, %v6602_v44  ;;  %vm2632_vm14 = vcmp.eq.f32.partialorder %v6606_v52, inf  ;;  %vm2634_vm15 = vcmp.eq.f32.partialorder %v6606_v52, 0.0 }
 0x294   : > { %4206 = vmatpush1.bf16.msra.mxu1 %v7794_v45  ;;  %3952 = vmatprep.subr.bf16.mxu0 %v7795_v43  ;;  %v4470_v18 = vpop.eup %4469  ;;  %v2584_v22 = vsel %vm2583_vm0, %v2569_v58, %v2582_v4  ;;  %v2596_v35 = vmul.f32 %v4468_v13, %v6588_v11  ;;  %vm2639_vm0 = vcmp.eq.f32.partialorder %v6610_v50, inf }
 0x295   : > { %4208 = vmatprep.subr.bf16.mxu1 %v7796_v29  ;;  %v2591_v27 = vsel %vm2590_vm1, %v2570_v12, %v2589_v8  ;;  %v4472_v31 = vpop.eup %4471  ;;  %v6627_v40 = vsel %vm2585_vm2, %v2586_v26, %v2584_v22  ;;  %v2603_v3 = vmul.f32 %v4470_v18, %v6591_v23  ;;  %v2635_v29 = vand.u32 2147483648, %v6606_v52 }
 0x296   : > { %v4474_v39 = vpop.eup %4473  ;;  %v6631_v51 = vsel %vm2592_vm3, %v2593_v60, %v2591_v27  ;;  %v2610_v63 = vmul.f32 %v4472_v31, %v6594_v55  ;;  %4487 = vlog2.f32 %v6627_v40  ;;  %v2598_v1 = vsel %vm2597_vm4, %v6588_v11, %v2596_v35 }
 0x297   : > { %3954 = vmatpush1.bf16.msra.mxu0 %v6260_v47  ;;  %v372_v47 = vld [vmem:[#allocation5 + $0x78] sm:$0xff]  ;;  %v4476_v53 = vpop.eup %4475  ;;  %v2617_v15 = vmul.f32 %v4474_v39, %v6598_v28  ;;  %4489 = vlog2.f32 %v6631_v51  ;;  %v2605_v19 = vsel %vm2604_vm6, %v6591_v23, %v2603_v3  ;;  %v6653_v36 = vsel %vm2599_vm5, %v2600_v57, %v2598_v1 }
 0x298   : > { %4210 = vmatpush1.bf16.msra.mxu1 %v6264_v21  ;;  %3956 = vmatprep.subr.bf16.mxu0 %v6266_v38  ;;  %v371_v21 = vld [vmem:[#allocation5 + $0x70] sm:$0xff]  ;;  %v4478_v0 = vpop.eup %4477  ;;  %v2624_v34 = vmul.f32 %v4476_v53, %v6602_v44  ;;  %v2612_v42 = vsel %vm2611_vm8, %v6594_v55, %v2610_v63  ;;  %v6660_v5 = vsel %vm2606_vm7, %v2607_v6, %v2605_v19  ;;  %vm2641_vm1 = vcmp.eq.f32.partialorder %v6610_v50, 0.0 }
 0x299   : > { %4212 = vmatprep.subr.bf16.mxu1 %v6272_v2  ;;  %v380_v2 = vld [vmem:[#allocation5 + $0xb8] sm:$0xff]  ;;  %v379_v38 = vld [vmem:[#allocation5 + $0xb0] sm:$0xff]  ;;  %v4480_v16 = vpop.eup %4479  ;;  %v2631_v59 = vmul.f32 %v4478_v0, %v6606_v52  ;;  %v2619_v7 = vsel %vm2618_vm10, %v6598_v28, %v2617_v15  ;;  %v6671_v45 = vsel %vm2613_vm9, %v2614_v24, %v2612_v42  ;;  %vm2646_vm2 = vcmp.eq.f32.partialorder %v6613_v48, inf }
 0x29a   : > { %v4482_v33 = vpop.eup %4481  ;;  %v2638_v10 = vmul.f32 %v4480_v16, %v6610_v50  ;;  %v2626_v43 = vsel %vm2625_vm12, %v6602_v44, %v2624_v34  ;;  %4491 = vlog2.f32 %v6653_v36  ;;  %vm2648_vm3 = vcmp.eq.f32.partialorder %v6613_v48, 0.0 }
 0x29b   : > { %3958 = vmatpush1.bf16.msra.mxu0 %v6280_v61  ;;  %v388_v61 = vld [vmem:[#allocation5 + $0xf8] sm:$0xff]  ;;  %v4484_v20 = vpop.eup %4483  ;;  %v2645_v32 = vmul.f32 %v4482_v33, %v6613_v48  ;;  %4493 = vlog2.f32 %v6660_v5  ;;  %vm2653_vm4 = vcmp.eq.f32.partialorder %v6619_v9, inf  ;;  %vm2655_vm5 = vcmp.eq.f32.partialorder %v6619_v9, 0.0 }
 0x29c   : > { %4214 = vmatpush1.bf16.msra.mxu1 %v6284_v14  ;;  %3960 = vmatprep.subr.bf16.mxu0 %v6286_v41  ;;  %v387_v14 = vld [vmem:[#allocation5 + $0xf0] sm:$0xff]  ;;  %v396_v41 = vld [vmem:[#allocation5 + $0x138] sm:$0xff]  ;;  %4495 = vlog2.f32 %v6671_v45  ;;  %v2656_v44 = vand.u32 2147483648, %v6619_v9  ;;  %vm2660_vm6 = vcmp.eq.f32.partialorder %v6623_v17, inf  ;;  %vm2662_vm7 = vcmp.eq.f32.partialorder %v6623_v17, 0.0 }
 0x29d   : > { %4216 = vmatprep.subr.bf16.mxu1 %v6291_v62  ;;  %v395_v62 = vld [vmem:[#allocation5 + $0x130] sm:$0xff]  ;;  %v2798_v3 = vlaneseq }
 0x29f   : > { %3962 = vmatpush1.bf16.msra.mxu0 %v6296_v56  ;;  %v404_v56 = vld [vmem:[#allocation5 + $0x178] sm:$0xff] }
 0x2a0   : > { %4218 = vmatpush1.bf16.msra.mxu1 %v6300_v46  ;;  %v403_v46 = vld [vmem:[#allocation5 + $0x170] sm:$0xff] }
 0x2a2   : > { %2093 = vmatmul.mubr.f32.vlgmr.msra.gmra.mrb[12].mxu0 %v363_v25 }
 0x2a3   : > { %2497 = vmatmul.mubr.f32.vlgmr.msra.gmra.mrb[12].mxu1 %v363_v25  ;;  %2098 = vmatprep.mubr.f32.mxu0 %v372_v47  ;;  %v4486_v25 = vpop.eup %4485 }
 0x2a4   : > { %2502 = vmatprep.mubr.f32.mxu1 %v372_v47  ;;  %v6678_v47 = vsel %vm2620_vm11, %v2621_v54, %v2619_v7  ;;  %v2659_v58 = vmul.f32 %v4486_v25, %v6623_v17 }
 0x2a5   : > { %4497 = vlog2.f32 %v6678_v47 }
 0x2a6   : > { %2099 = vmatmul.mubr.f32.gmra.mrb[14].mxu0 %v371_v21  ;;  %v2661_v37 = vsel %vm2660_vm6, %v6623_v17, %v2659_v58 }
 0x2a7   : > { %2503 = vmatmul.mubr.f32.gmra.mrb[14].mxu1 %v371_v21  ;;  %2104 = vmatprep.mubr.f32.mxu0 %v380_v2  ;;  %v2633_v21 = vsel %vm2632_vm14, %v6606_v52, %v2631_v59 }
 0x2a8   : > { %2508 = vmatprep.mubr.f32.mxu1 %v380_v2  ;;  %v2640_v2 = vsel %vm2639_vm0, %v6610_v50, %v2638_v10  ;;  %v6738_v10 = vand.u32 127, %v2798_v3 }
 0x2aa   : > { %2105 = vmatmul.mubr.f32.gmra.mrb[16].mxu0 %v379_v38 }
 0x2ab   : > { %2509 = vmatmul.mubr.f32.gmra.mrb[16].mxu1 %v379_v38  ;;  %2110 = vmatprep.mubr.f32.mxu0 %v388_v61  ;;  %v2652_v38 = vmul.f32 %v4484_v20, %v6619_v9 }
 0x2ac   : > { %2514 = vmatprep.mubr.f32.mxu1 %v388_v61  ;;  %v6689_v61 = vsel %vm2627_vm13, %v2628_v30, %v2626_v43 }
 0x2ad   : > { %v2654_v55 = vsel %vm2653_vm4, %v6619_v9, %v2652_v38  ;;  %4499 = vlog2.f32 %v6689_v61 }
 0x2ae   : > { %2111 = vmatmul.mubr.f32.gmra.mrb[18].mxu0 %v387_v14  ;;  %v6717_v18 = vsel %vm2655_vm5, %v2656_v44, %v2654_v55  ;;  %v2816_v44 = vstv %s3187_s23 }
 0x2af   : > { %2515 = vmatmul.mubr.f32.gmra.mrb[18].mxu1 %v387_v14  ;;  %2116 = vmatprep.mubr.f32.mxu0 %v396_v41  ;;  %v2642_v14 = vand.u32 2147483648, %v6610_v50 }
 0x2b0   : > { %2520 = vmatprep.mubr.f32.mxu1 %v396_v41  ;;  %v2647_v41 = vsel %vm2646_vm2, %v6613_v48, %v2645_v32 }
 0x2b1   : > { %v6701_v11 = vsel %vm2641_vm1, %v2642_v14, %v2640_v2 }
 0x2b2   : > { %2117 = vmatmul.mubr.f32.gmra.mrb[20].mxu0 %v395_v62 }
 0x2b3   : > { %2521 = vmatmul.mubr.f32.gmra.mrb[20].mxu1 %v395_v62  ;;  %2122 = vmatprep.mubr.f32.mxu0 %v404_v56  ;;  %v4488_v62 = vpop.eup %4487 }
 0x2b4   : > { %2526 = vmatprep.mubr.f32.mxu1 %v404_v56  ;;  %v6696_v56 = vsel %vm2634_vm15, %v2635_v29, %v2633_v21  ;;  %v4490_v12 = vpop.eup %4489  ;;  %v6729_v19 = vmul.f32 0.6931472, %v4488_v62 }
 0x2b5   : > { %4501 = vlog2.f32 %v6696_v56  ;;  %v4492_v31 = vpop.eup %4491  ;;  %v6732_v34 = vmul.f32 0.6931472, %v4490_v12 }
 0x2b6   : > { %2123 = vmatmul.mubr.f32.gmra.mrb[22].mxu0 %v403_v46  ;;  %4503 = vlog2.f32 %v6701_v11  ;;  %v4494_v53 = vpop.eup %4493  ;;  %v6734_v42 = vmul.f32 0.6931472, %v4492_v31  ;;  %v6764_v31 = vadd.s32 %v2816_v44, %v6738_v10 }
 0x2b7   : > { %2527 = vmatmul.mubr.f32.gmra.mrb[22].mxu1 %v403_v46  ;;  %v2649_v46 = vand.u32 2147483648, %v6613_v48  ;;  %v2663_v48 = vand.u32 2147483648, %v6623_v17  ;;  %v4496_v17 = vpop.eup %4495  ;;  %v6740_v20 = vmul.f32 0.6931472, %v4494_v53 }
 0x2b8   : > { %v4498_v24 = vpop.eup %4497 }
 0x2b9   : > { %v6706_v23 = vsel %vm2648_vm3, %v2649_v46, %v2647_v41  ;;  %v6721_v27 = vsel %vm2662_vm7, %v2663_v48, %v2661_v37  ;;  %v4500_v54 = vpop.eup %4499  ;;  %v6742_v41 = vmul.f32 0.6931472, %v4496_v17  ;;  %v6744_v62 = vmul.f32 0.6931472, %v4498_v24 }
 0x2ba   : > { %4505 = vlog2.f32 %v6706_v23  ;;  %v6750_v37 = vshrl.u32 %v2798_v3, 7  ;;  %v2815_v48 = vadd.s32 128, %v6738_v10 }
 0x2bb   : > { %4507 = vlog2.f32 %v6717_v18 }
 0x2bc   : > { %4509 = vlog2.f32 %v6721_v27  ;;  %v6778_v24 = vadd.s32 %v2816_v44, %v2815_v48 }
 0x2bf   : > { %v4502_v30 = vpop.eup %4501 }
 0x2c0   : > { %v4504_v2 = vpop.eup %4503 }
 0x2c4   : > { %v4506_v46 = vpop.eup %4505 }
 0x375   : > { %v2094_v28 = vpop.f32.mrb[12].mxu0 }
 0x376   : > { %v2665_v52 = vmul.f32 %v2094_v28, %v2094_v28  ;;  %v2498_v49 = vpop.f32.mrb[12].mxu1  ;;  %v2096_v50 = vpop.f32.mrb[13].mxu0 }
 0x377   : > { %v2677_v4 = vmul.f32 %v2498_v49, %v2498_v49  ;;  %v2666_v8 = vmul.f32 %v2096_v50, %v2096_v50  ;;  %v2500_v13 = vpop.f32.mrb[13].mxu1 }
 0x378   : > { %v2678_v9 = vmul.f32 %v2500_v13, %v2500_v13  ;;  %v6756_v13 = vmul.f32 0.6931472, %v4502_v30 }
 0x379   : > { %v2689_v22 = vadd.f32 %v2677_v4, %v2665_v52  ;;  %v2100_v26 = vpop.f32.mrb[14].mxu0  ;;  %v6753_v4 = vmul.f32 0.6931472, %v4500_v54 }
 0x37a   : > { %v2690_v60 = vadd.f32 %v2678_v9, %v2666_v8  ;;  %v2504_v35 = vpop.f32.mrb[14].mxu1  ;;  %v2102_v39 = vpop.f32.mrb[15].mxu0  ;;  %v2667_v63 = vmul.f32 %v2100_v26, %v2100_v26  ;;  %v6758_v9 = vmul.f32 0.6931472, %v4504_v2 }
 0x37b   : > { %v6724_v57 = vmax.f32 %v2689_v22, 1e-07  ;;  %v2679_v0 = vmul.f32 %v2504_v35, %v2504_v35  ;;  %v2668_v1 = vmul.f32 %v2102_v39, %v2102_v39  ;;  %v2506_v6 = vpop.f32.mrb[15].mxu1  ;;  %v6760_v22 = vpop.eup %4507 }
 0x37c   : > { %v6726_v15 = vmax.f32 %v2690_v60, 1e-07  ;;  %v2680_v16 = vmul.f32 %v2506_v6, %v2506_v6  ;;  %v6766_v60 = vmul.f32 0.6931472, %v4506_v46 }
 0x37d   : > { %4511 = vrsqrt.f32 %v6724_v57  ;;  %v2106_v33 = vpop.f32.mrb[16].mxu0  ;;  %v2691_v32 = vadd.f32 %v2679_v0, %v2667_v63  ;;  %v6772_v0 = vpop.eup %4509  ;;  %vm2715_vm8 = vcmp.eq.f32.partialorder %v6724_v57, inf  ;;  %vm2717_vm9 = vcmp.eq.f32.partialorder %v6724_v57, 0.0 }
 0x37e   : > { %4513 = vrsqrt.f32 %v6726_v15  ;;  %v2510_v59 = vpop.f32.mrb[16].mxu1  ;;  %v2108_v7 = vpop.f32.mrb[17].mxu0  ;;  %v2692_v43 = vadd.f32 %v2680_v16, %v2668_v1  ;;  %v2669_v29 = vmul.f32 %v2106_v33, %v2106_v33  ;;  %v6776_v16 = vadd.s32 40, %v6750_v37 }
 0x37f   : > { %v2681_v25 = vmul.f32 %v2510_v59, %v2510_v59  ;;  %v2512_v21 = vpop.f32.mrb[17].mxu1  ;;  %v2670_v38 = vmul.f32 %v2108_v7, %v2108_v7  ;;  %v6746_v58 = vmax.f32 %v2691_v32, 1e-07  ;;  %v2718_v54 = vand.u32 2147483648, %v6724_v57 }
 0x380   : > { %v2682_v14 = vmul.f32 %v2512_v21, %v2512_v21  ;;  %v6748_v12 = vmax.f32 %v2692_v43, 1e-07  ;;  %vm2722_vm10 = vcmp.eq.f32.partialorder %v6726_v15, inf  ;;  %v2725_v32 = vand.u32 2147483648, %v6726_v15 }
 0x381   : > { %v2693_v55 = vadd.f32 %v2681_v25, %v2669_v29  ;;  %v2112_v28 = vpop.f32.mrb[18].mxu0  ;;  %4515 = vrsqrt.f32 %v6746_v58  ;;  %vm2729_vm11 = vcmp.eq.f32.partialorder %v6746_v58, inf  ;;  %v2732_v29 = vand.u32 2147483648, %v6746_v58 }
 0x382   : > { %v2694_v52 = vadd.f32 %v2682_v14, %v2670_v38  ;;  %v2516_v49 = vpop.f32.mrb[18].mxu1  ;;  %v2114_v50 = vpop.f32.mrb[19].mxu0  ;;  %4517 = vrsqrt.f32 %v6748_v12  ;;  %v2671_v26 = vmul.f32 %v2112_v28, %v2112_v28  ;;  %vm2724_vm12 = vcmp.eq.f32.partialorder %v6726_v15, 0.0 }
 0x383   : > { %v2518_v8 = vpop.f32.mrb[19].mxu1  ;;  %v6768_v35 = vmax.f32 %v2693_v55, 1e-07  ;;  %v2683_v3 = vmul.f32 %v2516_v49, %v2516_v49  ;;  %v2672_v53 = vmul.f32 %v2114_v50, %v2114_v50  ;;  %vm2736_vm13 = vcmp.eq.f32.partialorder %v6748_v12, inf }
 0x384   : > { %v6770_v39 = vmax.f32 %v2694_v52, 1e-07  ;;  %v2684_v1 = vmul.f32 %v2518_v8, %v2518_v8  ;;  %vm2731_vm14 = vcmp.eq.f32.partialorder %v6746_v58, 0.0  ;;  %vm2738_vm15 = vcmp.eq.f32.partialorder %v6748_v12, 0.0 }
 0x385   : > { %v2118_v63 = vpop.f32.mrb[20].mxu0  ;;  %4519 = vrsqrt.f32 %v6768_v35  ;;  %v2695_v25 = vadd.f32 %v2683_v3, %v2671_v26  ;;  %v2739_v3 = vand.u32 2147483648, %v6748_v12  ;;  %vm2743_vm0 = vcmp.eq.f32.partialorder %v6768_v35, inf }
 0x386   : > { %v2522_v6 = vpop.f32.mrb[20].mxu1  ;;  %v2120_v17 = vpop.f32.mrb[21].mxu0  ;;  %4521 = vrsqrt.f32 %v6770_v39  ;;  %v2673_v43 = vmul.f32 %v2118_v63, %v2118_v63  ;;  %v2696_v21 = vadd.f32 %v2684_v1, %v2672_v53  ;;  %vm2745_vm1 = vcmp.eq.f32.partialorder %v6768_v35, 0.0 }
 0x387   : > { %v4512_v33 = vpop.eup %4511  ;;  %v2524_v59 = vpop.f32.mrb[21].mxu1  ;;  %v2685_v2 = vmul.f32 %v2522_v6, %v2522_v6  ;;  %v2674_v46 = vmul.f32 %v2120_v17, %v2120_v17  ;;  %v6798_v49 = vmax.f32 %v2695_v25, 1e-07  ;;  %vm2750_vm2 = vcmp.eq.f32.partialorder %v6770_v39, inf }
 0x388   : > { %v4514_v7 = vpop.eup %4513  ;;  %v2714_v30 = vmul.f32 %v4512_v33, %v6724_v57  ;;  %v2686_v55 = vmul.f32 %v2524_v59, %v2524_v59  ;;  %v6800_v50 = vmax.f32 %v2696_v21, 1e-07  ;;  %vm2752_vm3 = vcmp.eq.f32.partialorder %v6770_v39, 0.0 }
 0x389   : > { %v2124_v38 = vpop.f32.mrb[22].mxu0  ;;  %v2721_v26 = vmul.f32 %v4514_v7, %v6726_v15  ;;  %v2697_v53 = vadd.f32 %v2685_v2, %v2673_v43  ;;  %vm2757_vm4 = vcmp.eq.f32.partialorder %v6798_v49, inf  ;;  %vm2759_vm5 = vcmp.eq.f32.partialorder %v6798_v49, 0.0 }
 0x38a   : > { %v2716_v14 = vsel %vm2715_vm8, %v6724_v57, %v2714_v30  ;;  %v2528_v28 = vpop.f32.mrb[22].mxu1  ;;  %v2126_v44 = vpop.f32.mrb[23].mxu0  ;;  %v2675_v48 = vmul.f32 %v2124_v38, %v2124_v38  ;;  %v2698_v63 = vadd.f32 %v2686_v55, %v2674_v46  ;;  %v2746_v38 = vand.u32 2147483648, %v6768_v35 }
 0x38b   : > { %v6796_v52 = vsel %vm2717_vm9, %v2718_v54, %v2716_v14  ;;  %v2530_v8 = vpop.f32.mrb[23].mxu1  ;;  %v4516_v1 = vpop.eup %4515  ;;  %v2687_v57 = vmul.f32 %v2528_v28, %v2528_v28  ;;  %v2676_v6 = vmul.f32 %v2126_v44, %v2126_v44  ;;  %v6809_v59 = vmax.f32 %v2697_v53, 1e-07 }
 0x38c   : > { %4523 = vlog2.f32 %v6796_v52  ;;  %v2688_v17 = vmul.f32 %v2530_v8, %v2530_v8  ;;  %v4518_v33 = vpop.eup %4517  ;;  %v2728_v54 = vmul.f32 %v4516_v1, %v6746_v58  ;;  %v6811_v7 = vmax.f32 %v2698_v63, 1e-07 }
 0x38d   : > { %4525 = vrsqrt.f32 %v6798_v49  ;;  %v2735_v30 = vmul.f32 %v4518_v33, %v6748_v12  ;;  %v2699_v43 = vadd.f32 %v2687_v57, %v2675_v48  ;;  %v2723_v21 = vsel %vm2722_vm10, %v6726_v15, %v2721_v26 }
 0x38e   : > { %4527 = vrsqrt.f32 %v6800_v50  ;;  %v2700_v25 = vadd.f32 %v2688_v17, %v2676_v6  ;;  %v2730_v55 = vsel %vm2729_vm11, %v6746_v58, %v2728_v54  ;;  %v6837_v8 = vsel %vm2724_vm12, %v2725_v32, %v2723_v21 }
 0x38f   : > { %4529 = vrsqrt.f32 %v6809_v59  ;;  %v4520_v2 = vpop.eup %4519  ;;  %v6824_v14 = vmax.f32 %v2699_v43, 1e-07  ;;  %v2737_v28 = vsel %vm2736_vm13, %v6748_v12, %v2735_v30  ;;  %v2753_v53 = vand.u32 2147483648, %v6770_v39 }
 0x390   : > { %4531 = vrsqrt.f32 %v6811_v7  ;;  %v4522_v46 = vpop.eup %4521  ;;  %v2742_v44 = vmul.f32 %v4520_v2, %v6768_v35  ;;  %v6833_v48 = vmax.f32 %v2700_v25, 1e-07  ;;  %v6850_v15 = vsel %vm2731_vm14, %v2732_v29, %v2730_v55 }
 0x391   : > { %v2749_v26 = vmul.f32 %v4522_v46, %v6770_v39  ;;  %4533 = vrsqrt.f32 %v6824_v14  ;;  %v6854_v32 = vsel %vm2738_vm15, %v2739_v3, %v2737_v28  ;;  %v2760_v6 = vand.u32 2147483648, %v6798_v49 }
 0x392   : > { %v2744_v63 = vsel %vm2743_vm0, %v6768_v35, %v2742_v44  ;;  %4535 = vrsqrt.f32 %v6833_v48  ;;  %vm2764_vm6 = vcmp.eq.f32.partialorder %v6800_v50, inf  ;;  %vm2766_vm7 = vcmp.eq.f32.partialorder %v6800_v50, 0.0 }
 0x393   : > { %v2751_v1 = vsel %vm2750_vm2, %v6770_v39, %v2749_v26  ;;  %v6862_v57 = vsel %vm2745_vm1, %v2746_v38, %v2744_v63  ;;  %v2767_v29 = vand.u32 2147483648, %v6800_v50  ;;  %vm2771_vm8 = vcmp.eq.f32.partialorder %v6809_v59, inf }
 0x394   : > { %v6869_v12 = vsel %vm2752_vm3, %v2753_v53, %v2751_v1  ;;  %vm2773_vm9 = vcmp.eq.f32.partialorder %v6809_v59, 0.0  ;;  %v2774_v35 = vand.u32 2147483648, %v6809_v59  ;;  %vm2778_vm10 = vcmp.eq.f32.partialorder %v6811_v7, inf }
 0x395   : > { %vm2780_vm11 = vcmp.eq.f32.partialorder %v6811_v7, 0.0  ;;  %v2781_v3 = vand.u32 2147483648, %v6811_v7  ;;  %v2839_v54 = vsub.f32 %v6796_v52, %v6627_v40  ;;  %v2840_v30 = vsub.f32 %v6837_v8, %v6631_v51 }
 0x396   : > { %v6867_v58 = vpop.eup %4523  ;;  %v2841_v43 = vsub.f32 %v6850_v15, %v6653_v36  ;;  %vm2825_vm12 = vcmp.lt.s32.totalorder %v6764_v31, 513  ;;  %v2842_v2 = vsub.f32 %v6854_v32, %v6660_v5  ;;  %v2843_v38 = vsub.f32 %v6862_v57, %v6671_v45 }
 0x397   : > { %v4526_v39 = vpop.eup %4525  ;;  %v2844_v40 = vsub.f32 %v6869_v12, %v6678_v47  ;;  %vm2785_vm13 = vcmp.eq.f32.partialorder %v6824_v14, inf  ;;  %vm2787_vm14 = vcmp.eq.f32.partialorder %v6824_v14, 0.0  ;;  %v2788_v55 = vand.u32 2147483648, %v6824_v14 }
 0x398   : > { %v4528_v17 = vpop.eup %4527  ;;  %v2756_v33 = vmul.f32 %v4526_v39, %v6798_v49  ;;  %v2851_v53 = vmul.f32 %v2839_v54, %v2839_v54  ;;  %vm2792_vm15 = vcmp.eq.f32.partialorder %v6833_v48, inf  ;;  %vm2794_vm0 = vcmp.eq.f32.partialorder %v6833_v48, 0.0 }
 0x399   : > { %v4530_v25 = vpop.eup %4529  ;;  %v2763_v21 = vmul.f32 %v4528_v17, %v6800_v50  ;;  %4537 = vlog2.f32 %v6837_v8  ;;  %vm2826_vm1 = vcmp.lt.s32.totalorder %v6778_v24, 513  ;;  %vm2824_vm2 = vcmp.lt.s32.totalorder %v6776_v16, 42 }
 0x39a   : > { %v4532_v46 = vpop.eup %4531  ;;  %v2758_v51 = vsel %vm2757_vm4, %v6798_v49, %v2756_v33  ;;  %v2770_v36 = vmul.f32 %v4530_v25, %v6809_v59  ;;  %v2795_v33 = vand.u32 2147483648, %v6833_v48  ;;  %v2863_v25 = vsel %vm2825_vm12, %v2851_v53, 0.0  ;;  %vm6996_vm3 = vmand %vm2824_vm2, %vm2825_vm12 }
 0x39b   : > { %v6901_v5 = vsel %vm2759_vm5, %v2760_v6, %v2758_v51  ;;  %v2765_v45 = vsel %vm2764_vm6, %v6800_v50, %v2763_v21  ;;  %v2777_v47 = vmul.f32 %v4532_v46, %v6811_v7  ;;  %v4534_v28 = vpop.eup %4533  ;;  %4539 = vlog2.f32 %v6850_v15  ;;  %vm7017_vm4 = vmand %vm2824_vm2, %vm2826_vm1 }
 0x39c   : > { %v6910_v44 = vsel %vm2766_vm7, %v2767_v29, %v2765_v45  ;;  %v2772_v26 = vsel %vm2771_vm8, %v6809_v59, %v2770_v36  ;;  %v2845_v49 = vsub.f32 %v6901_v5, %v6689_v61  ;;  %v4536_v63 = vpop.eup %4535  ;;  %v2784_v50 = vmul.f32 %v4534_v28, %v6824_v14 }
 0x39d   : > { %v6919_v1 = vsel %vm2773_vm9, %v2774_v35, %v2772_v26  ;;  %v2779_v6 = vsel %vm2778_vm10, %v6811_v7, %v2777_v47  ;;  %v2846_v29 = vsub.f32 %v6910_v44, %v6696_v56  ;;  %v2791_v61 = vmul.f32 %v4536_v63, %v6833_v48 }
 0x39e   : > { %v6929_v39 = vsel %vm2780_vm11, %v2781_v3, %v2779_v6  ;;  %v2847_v59 = vsub.f32 %v6919_v1, %v6701_v11  ;;  %v2852_v35 = vmul.f32 %v2840_v30, %v2840_v30  ;;  %v2786_v17 = vsel %vm2785_vm13, %v6824_v14, %v2784_v50 }
 0x39f   : > { %v2848_v56 = vsub.f32 %v6929_v39, %v6706_v23  ;;  %v6943_v7 = vsel %vm2787_vm14, %v2788_v55, %v2786_v17  ;;  %v2793_v3 = vsel %vm2792_vm15, %v6833_v48, %v2791_v61  ;;  %v2853_v11 = vmul.f32 %v2841_v43, %v2841_v43 }
 0x3a0   : > { %v6948_v54 = vsel %vm2794_vm0, %v2795_v33, %v2793_v3  ;;  %v2849_v30 = vsub.f32 %v6943_v7, %v6717_v18  ;;  %v2854_v14 = vmul.f32 %v2842_v2, %v2842_v2  ;;  %v2864_v48 = vsel %vm2826_vm1, %v2852_v35, 0.0 }
 0x3a1   : > { %v2850_v23 = vsub.f32 %v6948_v54, %v6721_v27  ;;  %v2855_v43 = vmul.f32 %v2843_v38, %v2843_v38  ;;  %v2856_v21 = vmul.f32 %v2844_v40, %v2844_v40  ;;  %v6961_v46 = vmul.f32 0.6931472, %v6760_v22 }
 0x3a2   : > { %v2857_v18 = vmul.f32 %v2845_v49, %v2845_v49  ;;  %v2865_v27 = vsel %vm2825_vm12, %v2853_v11, 0.0  ;;  %v6967_v2 = vmul.f32 0.6931472, %v6772_v0  ;;  %v2858_v51 = vmul.f32 %v2846_v29, %v2846_v29 }
 0x3a3   : > { %v2859_v36 = vmul.f32 %v2847_v59, %v2847_v59  ;;  %v2875_v45 = vadd.f32 %v2864_v48, %v2863_v25  ;;  %4541 = vlog2.f32 %v6854_v32  ;;  %v2860_v47 = vmul.f32 %v2848_v56, %v2848_v56  ;;  %v4538_v61 = vpop.eup %4537 }
 0x3a4   : > { %v6970_v38 = vmul.f32 %v2849_v30, %v2849_v30  ;;  %v2866_v22 = vsel %vm2826_vm1, %v2854_v14, 0.0  ;;  %4543 = vlog2.f32 %v6862_v57  ;;  %v2867_v40 = vsel %vm2825_vm12, %v2855_v43, 0.0 }
 0x3a5   : > { %v2868_v0 = vsel %vm2826_vm1, %v2856_v21, 0.0  ;;  %v2876_v55 = vadd.f32 %v2875_v45, %v2865_v27  ;;  %4545 = vlog2.f32 %v6869_v12  ;;  %v2869_v28 = vsel %vm2825_vm12, %v2857_v18, 0.0 }
 0x3a6   : > { %4547 = vlog2.f32 %v6901_v5  ;;  %v2895_v26 = vmul.f32 %v6796_v52, %v6796_v52  ;;  %v2896_v49 = vmul.f32 %v6837_v8, %v6837_v8  ;;  %v6987_v53 = vmul.f32 %v2850_v23, %v2850_v23 }
 0x3a7   : > { %v2870_v63 = vsel %vm2826_vm1, %v2858_v51, 0.0  ;;  %v2877_v6 = vadd.f32 %v2876_v55, %v2866_v22  ;;  %4549 = vlog2.f32 %v6910_v44  ;;  %v2871_v52 = vsel %vm2825_vm12, %v2859_v36, 0.0 }
 0x3a8   : > { %v2872_v8 = vsel %vm2826_vm1, %v2860_v47, 0.0  ;;  %4551 = vlog2.f32 %v6919_v1  ;;  %v2897_v29 = vmul.f32 %v6850_v15, %v6850_v15  ;;  %v2873_v59 = vsel %vm6996_vm3, %v6970_v38, 0.0 }
 0x3a9   : > { %v2878_v35 = vadd.f32 %v2877_v6, %v2867_v40  ;;  %4553 = vlog2.f32 %v6929_v39  ;;  %v2898_v17 = vmul.f32 %v6854_v32, %v6854_v32  ;;  %v2899_v15 = vmul.f32 %v6862_v57, %v6862_v57  ;;  %v4540_v32 = vpop.eup %4539 }
 0x3aa   : > { %4555 = vlog2.f32 %v6943_v7  ;;  %v2907_v56 = vsel %vm2825_vm12, %v2895_v26, 0.0  ;;  %v2908_v3 = vsel %vm2826_vm1, %v2896_v49, 0.0  ;;  %v2874_v16 = vsel %vm7017_vm4, %v6987_v53, 0.0 }
 0x3ab   : > { %v2879_v11 = vadd.f32 %v2878_v35, %v2868_v0  ;;  %4557 = vlog2.f32 %v6948_v54  ;;  %v2900_v30 = vmul.f32 %v6869_v12, %v6869_v12  ;;  %v2901_v57 = vmul.f32 %v6901_v5, %v6901_v5 }
 0x3ac   : > { %v2902_v23 = vmul.f32 %v6910_v44, %v6910_v44  ;;  %v2903_v14 = vmul.f32 %v6919_v1, %v6919_v1  ;;  %v2909_v25 = vsel %vm2825_vm12, %v2897_v29, 0.0  ;;  %v2919_v21 = vadd.f32 %v2908_v3, %v2907_v56 }
 0x3ad   : > { %v4542_v48 = vpop.eup %4541  ;;  %v2880_v43 = vadd.f32 %v2879_v11, %v2869_v28  ;;  %v2940_v18 = vmul.f32 0.6931472, %v6867_v58  ;;  %v2942_v27 = vmul.f32 0.6931472, %v4538_v61  ;;  %v2910_v12 = vsel %vm2826_vm1, %v2898_v17, 0.0 }
 0x3ae   : > { %v4544_v51 = vpop.eup %4543  ;;  %v2911_v5 = vsel %vm2825_vm12, %v2899_v15, 0.0  ;;  %v2944_v44 = vmul.f32 0.6931472, %v4540_v32  ;;  %v2946_v36 = vmul.f32 0.6931472, %v4542_v48  ;;  %v2920_v47 = vadd.f32 %v2919_v21, %v2909_v25 }
 0x3af   : > { %v4546_v45 = vpop.eup %4545  ;;  %v2881_v1 = vadd.f32 %v2880_v43, %v2870_v63  ;;  %v2948_v38 = vmul.f32 0.6931472, %v4544_v51  ;;  %v2987_v22 = vsub.f32 %v2940_v18, %v6729_v19  ;;  %v2988_v58 = vsub.f32 %v2942_v27, %v6732_v34 }
 0x3b0   : > { %v4548_v40 = vpop.eup %4547  ;;  %v2950_v0 = vmul.f32 0.6931472, %v4546_v45  ;;  %v2989_v55 = vsub.f32 %v2944_v44, %v6734_v42  ;;  %v2990_v28 = vsub.f32 %v2946_v36, %v6740_v20  ;;  %v2921_v53 = vadd.f32 %v2920_v47, %v2910_v12 }
 0x3b1   : > { %v4550_v26 = vpop.eup %4549  ;;  %v2882_v49 = vadd.f32 %v2881_v1, %v2871_v52  ;;  %v2952_v6 = vmul.f32 0.6931472, %v4548_v40  ;;  %v2991_v29 = vsub.f32 %v2948_v38, %v6742_v41  ;;  %v2904_v63 = vmul.f32 %v6929_v39, %v6929_v39 }
 0x3b2   : > { %v4552_v61 = vpop.eup %4551  ;;  %v2912_v19 = vsel %vm2826_vm1, %v2900_v30, 0.0  ;;  %v2954_v35 = vmul.f32 0.6931472, %v4550_v26  ;;  %v2992_v34 = vsub.f32 %v2950_v0, %v6744_v62  ;;  %v2922_v15 = vadd.f32 %v2921_v53, %v2911_v5 }
 0x3b3   : > { %v4554_v17 = vpop.eup %4553  ;;  %v2883_v42 = vadd.f32 %v2882_v49, %v2872_v8  ;;  %v2956_v20 = vmul.f32 0.6931472, %v4552_v61  ;;  %v2993_v52 = vsub.f32 %v2952_v6, %v6753_v4  ;;  %v2913_v41 = vsel %vm2825_vm12, %v2901_v57, 0.0 }
 0x3b4   : > { %v4556_v56 = vpop.eup %4555  ;;  %v2914_v3 = vsel %vm2826_vm1, %v2902_v23, 0.0  ;;  %v2958_v39 = vmul.f32 0.6931472, %v4554_v17  ;;  %v2994_v32 = vsub.f32 %v2954_v35, %v6756_v13  ;;  %v2923_v25 = vadd.f32 %v2922_v15, %v2912_v19 }
 0x3b5   : > { %v4558_v11 = vpop.eup %4557  ;;  %v2884_v30 = vadd.f32 %v2883_v42, %v2873_v59  ;;  %v2960_v62 = vmul.f32 0.6931472, %v4556_v56  ;;  %v2995_v8 = vsub.f32 %v2956_v20, %v6758_v9  ;;  %v2999_v4 = vand.u32 2147483647, %v2987_v22 }
 0x3b6   : > { %v2962_v48 = vmul.f32 0.6931472, %v4558_v11  ;;  %v2996_v43 = vsub.f32 %v2958_v39, %v6766_v60  ;;  %v3000_v21 = vand.u32 2147483647, %v2988_v58  ;;  %v2924_v27 = vadd.f32 %v2923_v25, %v2913_v41 }
 0x3b7   : > { %v2885_v18 = vadd.f32 %v2884_v30, %v2874_v16  ;;  %v2997_v57 = vsub.f32 %v2960_v62, %v6961_v46  ;;  %v2905_v23 = vmul.f32 %v6943_v7, %v6943_v7  ;;  %v2915_v13 = vsel %vm2825_vm12, %v2903_v14, 0.0 }
 0x3b8   : > { %v2998_v59 = vsub.f32 %v2962_v48, %v6967_v2  ;;  %v3001_v51 = vand.u32 2147483647, %v2989_v55  ;;  %v2906_v9 = vmul.f32 %v6948_v54, %v6948_v54  ;;  %v2925_v60 = vadd.f32 %v2924_v27, %v2914_v3 }
 0x3b9   : > { %2886 = vadd.xlane.f32.xlu0 %v2885_v18  ;;  %v2916_v16 = vsel %vm2826_vm1, %v2904_v63, 0.0  ;;  %v3002_v12 = vand.u32 2147483647, %v2990_v28  ;;  %v3011_v46 = vsel %vm2825_vm12, %v2999_v4, 0.0  ;;  %v3012_v7 = vsel %vm2826_vm1, %v3000_v21, 0.0 }
 0x3ba   : > { %v2926_v5 = vadd.f32 %v2925_v60, %v2915_v13  ;;  %v2917_v2 = vsel %vm6996_vm3, %v2905_v23, 0.0  ;;  %v3003_v14 = vand.u32 2147483647, %v2991_v29  ;;  %v3013_v44 = vsel %vm2825_vm12, %v3001_v51, 0.0 }
 0x3bb   : > { %v3023_v36 = vadd.f32 %v3012_v7, %v3011_v46  ;;  %v2918_v45 = vsel %vm7017_vm4, %v2906_v9, 0.0  ;;  %v3004_v1 = vand.u32 2147483647, %v2992_v34  ;;  %v3014_v47 = vsel %vm2826_vm1, %v3002_v12, 0.0 }
 0x3bc   : > { %v2927_v54 = vadd.f32 %v2926_v5, %v2916_v16  ;;  %v3005_v40 = vand.u32 2147483647, %v2993_v52  ;;  %v3015_v0 = vsel %vm2825_vm12, %v3003_v14, 0.0  ;;  %v3006_v28 = vand.u32 2147483647, %v2994_v32 }
 0x3bd   : > { %v3024_v22 = vadd.f32 %v3023_v36, %v3013_v44  ;;  %v3016_v26 = vsel %vm2826_vm1, %v3004_v1, 0.0  ;;  %v3007_v53 = vand.u32 2147483647, %v2995_v8  ;;  %v3008_v61 = vand.u32 2147483647, %v2996_v43 }
 0x3be   : > { %v2928_v38 = vadd.f32 %v2927_v54, %v2917_v2  ;;  %v3017_v6 = vsel %vm2825_vm12, %v3005_v40, 0.0  ;;  %v3018_v63 = vsel %vm2826_vm1, %v3006_v28, 0.0  ;;  %v3009_v35 = vand.u32 2147483647, %v2997_v57  ;;  %v3058_v2 = vld [vmem:[#allocation9] sm:$0xff] }
 0x3bf   : > { %v3025_v55 = vadd.f32 %v3024_v22, %v3014_v47  ;;  %v3019_v34 = vsel %vm2825_vm12, %v3007_v53, 0.0  ;;  %v3010_v42 = vand.u32 2147483647, %v2998_v59  ;;  %v3020_v15 = vsel %vm2826_vm1, %v3008_v61, 0.0 }
 0x3c0   : > { %v2929_v58 = vadd.f32 %v2928_v38, %v2918_v45  ;;  %v3021_v52 = vsel %vm6996_vm3, %v3009_v35, 0.0  ;;  %vm3048_vm5 = vcmp.eq.s32.totalorder %v6738_v10, 1  ;;  %vm3043_vm6 = vcmp.eq.s32.totalorder %v6750_v37, 0 }
 0x3c1   : > { %v3026_v49 = vadd.f32 %v3025_v55, %v3015_v0  ;;  %v3022_v41 = vsel %vm7017_vm4, %v3010_v42, 0.0  ;;  %vm3044_vm7 = vcmp.eq.s32.totalorder %v6738_v10, 0  ;;  %vm3049_vm8 = vmand %vm3043_vm6, %vm3048_vm5  ;;  %vm3053_vm9 = vcmp.eq.s32.totalorder %v6738_v10, 2 }
 0x3c2   : > { %2930 = vadd.xlane.f32.xlu0 %v2929_v58  ;;  %vm3045_vm10 = vmand %vm3043_vm6, %vm3044_vm7 }
 0x3c3   : > { %v3027_v29 = vadd.f32 %v3026_v49, %v3016_v26  ;;  %vm3054_vm11 = vmand %vm3043_vm6, %vm3053_vm9 }
 0x3c5   : > { %v3028_v19 = vadd.f32 %v3027_v29, %v3017_v6 }
 0x3c7   : > { %v3029_v17 = vadd.f32 %v3028_v19, %v3018_v63 }
 0x3c9   : > { %v3030_v20 = vadd.f32 %v3029_v17, %v3019_v34 }
 0x3cb   : > { %v3031_v56 = vadd.f32 %v3030_v20, %v3020_v15 }
 0x3cd   : > { %v3032_v3 = vadd.f32 %v3031_v56, %v3021_v52 }
 0x3cf   : > { %v3033_v39 = vadd.f32 %v3032_v3, %v3022_v41 }
 0x3d1   : > { %3034 = vadd.xlane.f32.xlu1 %v3033_v39 }
 0x446   : > { %v2887_v32 = vpop.xlane.xlu0 %2886 }
 0x447   : > { %v2888_v11 = vrot.slane %v2887_v32, 4 }
 0x449   : > { %v2889_v31 = vadd.f32 %v2888_v11, %v2887_v32 }
 0x44b   : > { %v2890_v30 = vrot.slane %v2889_v31, 2 }
 0x44d   : > { %v2891_v25 = vadd.f32 %v2890_v30, %v2889_v31 }
 0x44f   : > { %v2892_v62 = vrot.slane %v2891_v25, 1  ;;  %v2931_v8 = vpop.xlane.xlu0 %2930 }
 0x450   : > { %v2932_v24 = vrot.slane %v2931_v8, 4 }
 0x451   : > { %v2893_v48 = vadd.f32 %v2892_v62, %v2891_v25 }
 0x452   : > { %v2933_v43 = vadd.f32 %v2932_v24, %v2931_v8 }
 0x453   : > { %4363 = vpush %v2893_v48 }
 0x454   : > { %v2934_v50 = vrot.slane %v2933_v43, 2 }
 0x456   : > { %v2935_v4 = vadd.f32 %v2934_v50, %v2933_v43 }
 0x458   : > { %v2936_v21 = vrot.slane %v2935_v4, 1 }
 0x45a   : > { %v2937_v18 = vadd.f32 %v2936_v21, %v2935_v4 }
 0x45c   : > { %4365 = vpush %v2937_v18 }
 0x45e   : > { %v3035_v33 = vpop.xlane.xlu1 %3034 }
 0x45f   : > { %v3036_v27 = vrot.slane %v3035_v33, 4 }
 0x461   : > { %v3037_v57 = vadd.f32 %v3036_v27, %v3035_v33 }
 0x463   : > { %v3038_v23 = vrot.slane %v3037_v57, 2 }
 0x465   : > { %v3039_v13 = vadd.f32 %v3038_v23, %v3037_v57 }
 0x467   : > { %v3040_v59 = vrot.slane %v3039_v13, 1 }
 0x469   : > { %v3041_v51 = vadd.f32 %v3040_v59, %v3039_v13 }
 0x46b   : > { %4367 = vpush %v3041_v51 }
 0x484   : > { %s4364_s18 = spop %4363 }
 0x485   : > { %v3046_v60 = vstv %s4364_s18 }
 0x486   : > { %v3047_v12 = vsel %vm3045_vm10, %v3046_v60, 0.0 }
 0x48d   : > { %s4366_s9 = spop %4365 }
 0x48e   : > { %v3050_v9 = vstv %s4366_s9 }
 0x48f   : > { %v3051_v16 = vsel %vm3049_vm8, %v3050_v9, 0.0 }
 0x490   : > { %v3052_v46 = vadd.f32 %v3051_v16, %v3047_v12 }
 0x49c   : > { %s4368_s12 = spop %4367 }
 0x49d   : > { %v3055_v7 = vstv %s4368_s12 }
 0x49e   : > { %v3056_v5 = vsel %vm3054_vm11, %v3055_v7, 0.0 }
 0x49f   : > { %v3057_v37 = vadd.f32 %v3056_v5, %v3052_v46 }
 0x4a1   : > { %v3059_v14 = vadd.f32 %v3058_v2, %v3057_v37 }
 0x4a3   : > { %3060 = vst [vmem:[#allocation9] sm:$0xff] %v3059_v14 }
 0x4a4   : > { %4688 = shalt.err (!%p4685_p10)
}
 0x4a5   : > { %s4689_s13 = scalar_lea.hbm %s7152_s4, 128 }
 0x4a6   : > { %p4690_p8 = scmp.ne.s32.totalorder %s7152_s4, %s4689_s13  ;;  %p4695_p4 = scmp.lt.u32.totalorder %s4689_s13, %s7152_s4 }
 0x4a8   : > { %p4691_p1 = pnand %p4690_p8, %p4404_p7 }
 0x4aa   : > { %p4692_p11 = pneg %p4691_p1 }
 0x4ac   : > { %p4697_p12 = pnand %p4695_p4, %p4692_p11 }
 0x4ae   : > { %4700 = shalt.err (!%p4697_p12)
}
 0x4af   : > { %4382 = dma.vmem_to_hbm [thread:$0]  (%p4404_p7), %s3069_s2, 128, %s7152_s4, [#allocation4]  }
 0x4b0   : > { %4738 = dma.done.wait (%p4404_p7), [#allocation4], 128  }
 0x4b1   : > { %4740 = vsyncadd (%p4404_p7), [#allocation4], 4294967168 }
 0x4b2 PF: > { %s7801_s6 = sld [smem:[#allocation15_spill]]  ;;  %s7802_s10 = sld [smem:[#allocation14_spill]] }
 0x4b3   : > { %s7803_s17 = sld [smem:[#allocation17_spill]]  ;;  %s7804_s11 = sld [smem:[#allocation16_spill]] }
 0x4b4   : > { %s7805_s15 = smov %s4747_s16  ;;  %s7807_s18 = smov %s4759_s19 }
 0x4b8   : > { %s17_s20 = sadd.s32 1, %s7801_s6   ;;  %s7806_s16 = smov %s7802_s10 }
 0x4b9   : > { %p14_p5 = scmp.ge.s32.totalorder %s17_s20, 5   ;;  %s7808_s19 = smov %s7804_s11 }
 0x4bb   :  { %16 = sbr.rel (!%p14_p5) target bundleno = 8 (0x8), region = 97 }
 0x4c2   :  { %3081 = vsyncpa [#allocation3], 1 }
 0x4c3   :  { %3083 = vsyncpa [#allocation3 + $0x1], 1 }
 0x4c4   :  { %3084 = vsyncpa [#allocation6], 1 }
 0x4c5   :  { %3085 = vsyncpa [#allocation4], 1 }
 0x4c6   :  { %3087 = vsyncpa [#allocation4 + $0x1], 1 }

</bundles_post_ra>
